<compile_context>
chip_gen: v7x
topology: tpu7x:2x2x1
jax: 0.10.0
libtpu: 0.0.40
codegen_flags: <defaults>
</compile_context>

<pallas_src>
import functools

import jax
import jax.numpy as jnp
from jax.experimental import pallas as pl
from jax.experimental.pallas import tpu as pltpu

EPS = 1e-5       # BatchNorm eps
ALPHA = 0.1      # module's self.alpha
KSIZE = 5        # conv1 / conv3 kernel size
PAD = 2          # 'SAME' padding for the 5x5 convs


# ----------------------------- in-kernel helpers -----------------------------

def _swish(x):
    # x * sigmoid(x).  Exact divide keeps numerics tight; swap for
    # pl.reciprocal(..., approx=True) if the VPU ever becomes the binding unit.
    return x * (1.0 / (1.0 + jnp.exp(-x)))


def _bn_swish(y, mask, inv_n, gamma, beta):
    """Training-mode BatchNorm2d (batch stats, biased var) + Swish.

    y     : (C, P) conv output in padded-flat layout (garbage at pad slots).
    mask  : (1, P) 1.0 at valid (image-interior) slots, 0.0 elsewhere.
    inv_n : 1 / (N*H*W)  (static python float).
    gamma, beta : (C, 1) per-channel affine params.
    Pad slots of the result are garbage; callers re-mask before a 5x5 conv.
    """
    ym = y * mask
    mu = jnp.sum(ym, axis=1, keepdims=True) * inv_n
    cen = ym - mu
    var = jnp.sum(jnp.square(cen * mask), axis=1, keepdims=True) * inv_n
    bn = cen * jax.lax.rsqrt(var + EPS) * gamma + beta
    return _swish(bn)


def _conv5x5(x, w_ref, wp):
    """5x5 'SAME' conv as 25 in-VMEM tap matmuls (no im2col, no HBM blowup).

    x     : (C_in, P) activations in zero-padded flat layout; P covers
            B*(H+2*PAD)*(W+2*PAD) and the pad ring is exactly zero, so every
            tap is a pure lane shift (wrap-around only lands in pad slots).
    w_ref : (25, C_out, C_in) per-tap transposed weights.
    wp    : padded image width (python int) -> lane shift for one row step.
    Returns (C_out, P); only valid slots are meaningful.
    """
    pbuf = x.shape[1]
    acc = None
    for t in range(KSIZE * KSIZE):
        di, dj = divmod(t, KSIZE)
        s = (di - PAD) * wp + (dj - PAD)                 # static tap offset
        xs = x if s == 0 else pltpu.roll(x, shift=(-s) % pbuf, axis=1)
        # default MXU precision (bf16 inputs, f32 accumulation)
        contrib = jnp.dot(w_ref[t], xs, preferred_element_type=jnp.float32)
        acc = contrib if acc is None else acc + contrib
    return acc


# ---------------------------------- kernel -----------------------------------

def _residual_block_kernel(wp, inv_n,
                           x_ref, mask_ref,
                           w1_ref, b1_ref, g1_ref, be1_ref,
                           w2_ref, b2_ref, g2_ref, be2_ref,
                           w3_ref, b3_ref, g3_ref, be3_ref,
                           o_ref):
    mask = mask_ref[...]                                 # loaded once, reused
    x = x_ref[...]                                       # (C, P), zero pad ring

    # conv1 5x5 -> BN -> Swish
    y = _conv5x5(x, w1_ref, wp) + b1_ref[...]
    a1 = _bn_swish(y, mask, inv_n, g1_ref[...], be1_ref[...])

    # conv2 1x1 -> BN -> Swish (positional; its input needs no re-masking)
    y = jnp.dot(w2_ref[...], a1, preferred_element_type=jnp.float32) + b2_ref[...]
    a2 = _bn_swish(y, mask, inv_n, g2_ref[...], be2_ref[...])

    # conv3 5x5 -> BN -> Swish; its input must have an exactly-zero pad ring
    y = _conv5x5(a2 * mask, w3_ref, wp) + b3_ref[...]
    a3 = _bn_swish(y, mask, inv_n, g3_ref[...], be3_ref[...])

    # residual: out = x_in + alpha * act(seq(x)); pad slots are sliced away
    o_ref[...] = x + ALPHA * a3


# ------------------------------- JAX-side glue --------------------------------

def _vmem():
    return pl.BlockSpec(memory_space=pltpu.MemorySpace.VMEM)


@jax.jit
def residual_block(x_nchw, p):
    """Pallas implementation of ResidualBlock.forward (NCHW in / NCHW out)."""
    B, C, H, W = x_nchw.shape
    hp, wp = H + 2 * PAD, W + 2 * PAD
    p_flat = B * hp * wp                        # flattened padded positions
    p_buf = ((p_flat + 127) // 128) * 128       # lane-dense (multiple of 128)
    inv_n = 1.0 / (B * H * W)                   # BN stats over valid slots

    xf = x_nchw.astype(jnp.float32)

    # Activations in transposed, zero-padded, flattened layout: (C, P) with the
    # big axis on lanes.  Zero pad ring -> 5x5 taps become pure lane shifts.
    x_pad = jnp.pad(jnp.transpose(xf, (1, 0, 2, 3)),
                    ((0, 0), (0, 0), (PAD, PAD), (PAD, PAD)))
    x_pad = x_pad.reshape(C, p_flat)
    x_pad = jnp.pad(x_pad, ((0, 0), (0, p_buf - p_flat)))

    # Validity mask in the same flat layout (1 at image-interior slots).
    mask = jnp.pad(jnp.ones((1, B, H, W), jnp.float32),
                   ((0, 0), (0, 0), (PAD, PAD), (PAD, PAD)))
    mask = jnp.pad(mask.reshape(1, p_flat), ((0, 0), (0, p_buf - p_flat)))

    def per_tap_wT(w_flat, cin, cout):          # (k*k*cin, cout) -> (k*k, cout, cin)
        return jnp.transpose(w_flat.reshape(KSIZE * KSIZE, cin, cout), (0, 2, 1))

    def col(v):                                 # (1, c) -> (c, 1)
        return jnp.reshape(v, (-1, 1))

    w1t = per_tap_wT(p["w1"], C, C)
    w2t = jnp.transpose(p["w2"])                # (C//2, C)
    w3t = per_tap_wT(p["w3"], C // 2, C)

    kernel = functools.partial(_residual_block_kernel, wp, inv_n)

    out_pad = pl.pallas_call(
        kernel,
        out_shape=jax.ShapeDtypeStruct((C, p_buf), jnp.float32),
        in_specs=[_vmem()] * 14,
        out_specs=_vmem(),
        input_output_aliases={0: 0},            # residual input aliases output
        compiler_params=pltpu.CompilerParams(vmem_limit_bytes=32 * 1024 * 1024),
    )(x_pad, mask,
      w1t, col(p["b1"]), col(p["g1"]), col(p["be1"]),
      w2t, col(p["b2"]), col(p["g2"]), col(p["be2"]),
      w3t, col(p["b3"]), col(p["g3"]), col(p["be3"]))

    out = out_pad[:, :p_flat].reshape(C, B, hp, wp)[:, :, PAD:PAD + H, PAD:PAD + W]
    return jnp.transpose(out, (1, 0, 2, 3))


# ------------------------------ params / reference ----------------------------

def init_params(key, dim):
    ks = jax.random.split(key, 12)

    def conv_w(rng, kh, kw, cin, cout):
        fan_in = kh * kw * cin
        w = jax.random.normal(rng, (kh, kw, cin, cout), jnp.float32)
        return (w / jnp.sqrt(fan_in)).reshape(kh * kw * cin, cout)

    def vec(rng, c, scale=0.1, offset=0.0):
        return offset + scale * jax.random.normal(rng, (1, c), jnp.float32)

    return {
        # conv1: Conv2d(dim, dim, 5, padding=2) ; BN(dim)
        "w1": conv_w(ks[0], 5, 5, dim, dim),
        "b1": vec(ks[1], dim),
        "g1": vec(ks[2], dim, offset=1.0),
        "be1": vec(ks[3], dim),
        # conv2: Conv2d(dim, dim//2, 1) ; BN(dim//2)
        "w2": conv_w(ks[4], 1, 1, dim, dim // 2),
        "b2": vec(ks[5], dim // 2),
        "g2": vec(ks[6], dim // 2, offset=1.0),
        "be2": vec(ks[7], dim // 2),
        # conv3: Conv2d(dim//2, dim, 5, padding=2) ; BN(dim)
        "w3": conv_w(ks[8], 5, 5, dim // 2, dim),
        "b3": vec(ks[9], dim),
        "g3": vec(ks[10], dim, offset=1.0),
        "be3": vec(ks[11], dim),
    }


def ref_forward(x_nchw, p, dim):
    """Pure-JAX reference (lax.conv, HIGHEST precision) of the PyTorch forward."""
    def conv(x, w_flat, kh, kw, cin, cout, b):
        w = w_flat.reshape(kh, kw, cin, cout)
        y = jax.lax.conv_general_dilated(
            x, w, window_strides=(1, 1), padding="SAME",
            dimension_numbers=("NHWC", "HWIO", "NHWC"),
            precision=jax.lax.Precision.HIGHEST)
        return y + b.reshape(1, 1, 1, -1)

    def bn(y, g, be):
        mu = jnp.mean(y, axis=(0, 1, 2), keepdims=True)
        var = jnp.mean(jnp.square(y - mu), axis=(0, 1, 2), keepdims=True)
        return (y - mu) / jnp.sqrt(var + EPS) * g.reshape(1, 1, 1, -1) \
            + be.reshape(1, 1, 1, -1)

    def swish(y):
        return y * jax.nn.sigmoid(y)

    x_in = jnp.transpose(x_nchw, (0, 2, 3, 1)).astype(jnp.float32)
    y = swish(bn(conv(x_in, p["w1"], 5, 5, dim, dim, p["b1"]), p["g1"], p["be1"]))
    y = swish(bn(conv(y, p["w2"], 1, 1, dim, dim // 2, p["b2"]), p["g2"], p["be2"]))
    y = swish(bn(conv(y, p["w3"], 5, 5, dim // 2, dim, p["b3"]), p["g3"], p["be3"]))
    out = x_in + ALPHA * y
    return jnp.transpose(out, (0, 3, 1, 2))


# ----------------------------------- main -------------------------------------

if __name__ == "__main__":
    dim, B, H, W = 8, 2, 16, 16
    key = jax.random.PRNGKey(0)
    kx, kp = jax.random.split(key)
    x = jax.random.normal(kx, (B, dim, H, W), jnp.float32)   # NCHW, like PyTorch
    params = init_params(kp, dim)

    out = jax.block_until_ready(residual_block(x, params))
    ref = jax.block_until_ready(ref_forward(x, params, dim))

    assert out.shape == x.shape and out.dtype == jnp.float32
    assert bool(jnp.all(jnp.isfinite(out)))
    # Kernel matmuls use default MXU precision (bf16 inputs / f32 accumulation)
    # per the perf review; the reference uses Precision.HIGHEST f32, hence the
    # slightly relaxed comparison tolerance.
    assert bool(jnp.allclose(out, ref, rtol=2e-2, atol=2e-2)), \
        float(jnp.max(jnp.abs(out - ref)))
    print("KERNEL_OK")
</pallas_src>

<mosaic_0001>
module attributes {stable_mosaic.version = 11 : i64} {
  func.func @_residual_block_kernel(%arg0: memref<8x896xf32, #tpu.memory_space<vmem>>, %arg1: memref<1x896xf32, #tpu.memory_space<vmem>>, %arg2: memref<25x8x8xf32, #tpu.memory_space<vmem>>, %arg3: memref<8x1xf32, #tpu.memory_space<vmem>>, %arg4: memref<8x1xf32, #tpu.memory_space<vmem>>, %arg5: memref<8x1xf32, #tpu.memory_space<vmem>>, %arg6: memref<4x8xf32, #tpu.memory_space<vmem>>, %arg7: memref<4x1xf32, #tpu.memory_space<vmem>>, %arg8: memref<4x1xf32, #tpu.memory_space<vmem>>, %arg9: memref<4x1xf32, #tpu.memory_space<vmem>>, %arg10: memref<25x8x4xf32, #tpu.memory_space<vmem>>, %arg11: memref<8x1xf32, #tpu.memory_space<vmem>>, %arg12: memref<8x1xf32, #tpu.memory_space<vmem>>, %arg13: memref<8x1xf32, #tpu.memory_space<vmem>>, %arg14: memref<8x896xf32, #tpu.memory_space<vmem>>) attributes {dimension_semantics = [], scalar_prefetch = 0 : i64, scratch_operands = 0 : i64, tpu.core_type = #tpu.core_type<tc>} {
    %c0 = arith.constant 0 : index
    %c0_0 = arith.constant 0 : index
    %0 = vector.load %arg1[%c0, %c0_0] : memref<1x896xf32, #tpu.memory_space<vmem>>, vector<1x896xf32>
    %c0_1 = arith.constant 0 : index
    %c0_2 = arith.constant 0 : index
    %1 = vector.load %arg0[%c0_1, %c0_2] : memref<8x896xf32, #tpu.memory_space<vmem>>, vector<8x896xf32>
    %c42_i32 = arith.constant 42 : i32
    %2 = tpu.dynamic_rotate %1 by %c42_i32 dim 1 : vector<8x896xf32>, i32 -> vector<8x896xf32>
    %c0_3 = arith.constant 0 : index
    %c0_4 = arith.constant 0 : index
    %c0_5 = arith.constant 0 : index
    %3 = vector.load %arg2[%c0_3, %c0_4, %c0_5] : memref<25x8x8xf32, #tpu.memory_space<vmem>>, vector<1x8x8xf32>
    %4 = vector.shape_cast %3 : vector<1x8x8xf32> to vector<8x8xf32>
    %cst = arith.constant dense<0.000000e+00> : vector<8x896xf32>
    %5 = tpu.matmul %4, %2, %cst {dimension_numbers = #tpu.dot_dimension_numbers<[1], [0], [0], [1], [0, 0, 1, 1], [], []>} : vector<8x8xf32>, vector<8x896xf32>, vector<8x896xf32> -> vector<8x896xf32>
    %c41_i32 = arith.constant 41 : i32
    %6 = tpu.dynamic_rotate %1 by %c41_i32 dim 1 : vector<8x896xf32>, i32 -> vector<8x896xf32>
    %c1 = arith.constant 1 : index
    %c0_6 = arith.constant 0 : index
    %c0_7 = arith.constant 0 : index
    %7 = vector.load %arg2[%c1, %c0_6, %c0_7] : memref<25x8x8xf32, #tpu.memory_space<vmem>>, vector<1x8x8xf32>
    %8 = vector.shape_cast %7 : vector<1x8x8xf32> to vector<8x8xf32>
    %cst_8 = arith.constant dense<0.000000e+00> : vector<8x896xf32>
    %9 = tpu.matmul %8, %6, %cst_8 {dimension_numbers = #tpu.dot_dimension_numbers<[1], [0], [0], [1], [0, 0, 1, 1], [], []>} : vector<8x8xf32>, vector<8x896xf32>, vector<8x896xf32> -> vector<8x896xf32>
    %10 = arith.addf %5, %9 : vector<8x896xf32>
    %c40_i32 = arith.constant 40 : i32
    %11 = tpu.dynamic_rotate %1 by %c40_i32 dim 1 : vector<8x896xf32>, i32 -> vector<8x896xf32>
    %c2 = arith.constant 2 : index
    %c0_9 = arith.constant 0 : index
    %c0_10 = arith.constant 0 : index
    %12 = vector.load %arg2[%c2, %c0_9, %c0_10] : memref<25x8x8xf32, #tpu.memory_space<vmem>>, vector<1x8x8xf32>
    %13 = vector.shape_cast %12 : vector<1x8x8xf32> to vector<8x8xf32>
    %cst_11 = arith.constant dense<0.000000e+00> : vector<8x896xf32>
    %14 = tpu.matmul %13, %11, %cst_11 {dimension_numbers = #tpu.dot_dimension_numbers<[1], [0], [0], [1], [0, 0, 1, 1], [], []>} : vector<8x8xf32>, vector<8x896xf32>, vector<8x896xf32> -> vector<8x896xf32>
    %15 = arith.addf %10, %14 : vector<8x896xf32>
    %c39_i32 = arith.constant 39 : i32
    %16 = tpu.dynamic_rotate %1 by %c39_i32 dim 1 : vector<8x896xf32>, i32 -> vector<8x896xf32>
    %c3 = arith.constant 3 : index
    %c0_12 = arith.constant 0 : index
    %c0_13 = arith.constant 0 : index
    %17 = vector.load %arg2[%c3, %c0_12, %c0_13] : memref<25x8x8xf32, #tpu.memory_space<vmem>>, vector<1x8x8xf32>
    %18 = vector.shape_cast %17 : vector<1x8x8xf32> to vector<8x8xf32>
    %cst_14 = arith.constant dense<0.000000e+00> : vector<8x896xf32>
    %19 = tpu.matmul %18, %16, %cst_14 {dimension_numbers = #tpu.dot_dimension_numbers<[1], [0], [0], [1], [0, 0, 1, 1], [], []>} : vector<8x8xf32>, vector<8x896xf32>, vector<8x896xf32> -> vector<8x896xf32>
    %20 = arith.addf %15, %19 : vector<8x896xf32>
    %c38_i32 = arith.constant 38 : i32
    %21 = tpu.dynamic_rotate %1 by %c38_i32 dim 1 : vector<8x896xf32>, i32 -> vector<8x896xf32>
    %c4 = arith.constant 4 : index
    %c0_15 = arith.constant 0 : index
    %c0_16 = arith.constant 0 : index
    %22 = vector.load %arg2[%c4, %c0_15, %c0_16] : memref<25x8x8xf32, #tpu.memory_space<vmem>>, vector<1x8x8xf32>
    %23 = vector.shape_cast %22 : vector<1x8x8xf32> to vector<8x8xf32>
    %cst_17 = arith.constant dense<0.000000e+00> : vector<8x896xf32>
    %24 = tpu.matmul %23, %21, %cst_17 {dimension_numbers = #tpu.dot_dimension_numbers<[1], [0], [0], [1], [0, 0, 1, 1], [], []>} : vector<8x8xf32>, vector<8x896xf32>, vector<8x896xf32> -> vector<8x896xf32>
    %25 = arith.addf %20, %24 : vector<8x896xf32>
    %c22_i32 = arith.constant 22 : i32
    %26 = tpu.dynamic_rotate %1 by %c22_i32 dim 1 : vector<8x896xf32>, i32 -> vector<8x896xf32>
    %c5 = arith.constant 5 : index
    %c0_18 = arith.constant 0 : index
    %c0_19 = arith.constant 0 : index
    %27 = vector.load %arg2[%c5, %c0_18, %c0_19] : memref<25x8x8xf32, #tpu.memory_space<vmem>>, vector<1x8x8xf32>
    %28 = vector.shape_cast %27 : vector<1x8x8xf32> to vector<8x8xf32>
    %cst_20 = arith.constant dense<0.000000e+00> : vector<8x896xf32>
    %29 = tpu.matmul %28, %26, %cst_20 {dimension_numbers = #tpu.dot_dimension_numbers<[1], [0], [0], [1], [0, 0, 1, 1], [], []>} : vector<8x8xf32>, vector<8x896xf32>, vector<8x896xf32> -> vector<8x896xf32>
    %30 = arith.addf %25, %29 : vector<8x896xf32>
    %c21_i32 = arith.constant 21 : i32
    %31 = tpu.dynamic_rotate %1 by %c21_i32 dim 1 : vector<8x896xf32>, i32 -> vector<8x896xf32>
    %c6 = arith.constant 6 : index
    %c0_21 = arith.constant 0 : index
    %c0_22 = arith.constant 0 : index
    %32 = vector.load %arg2[%c6, %c0_21, %c0_22] : memref<25x8x8xf32, #tpu.memory_space<vmem>>, vector<1x8x8xf32>
    %33 = vector.shape_cast %32 : vector<1x8x8xf32> to vector<8x8xf32>
    %cst_23 = arith.constant dense<0.000000e+00> : vector<8x896xf32>
    %34 = tpu.matmul %33, %31, %cst_23 {dimension_numbers = #tpu.dot_dimension_numbers<[1], [0], [0], [1], [0, 0, 1, 1], [], []>} : vector<8x8xf32>, vector<8x896xf32>, vector<8x896xf32> -> vector<8x896xf32>
    %35 = arith.addf %30, %34 : vector<8x896xf32>
    %c20_i32 = arith.constant 20 : i32
    %36 = tpu.dynamic_rotate %1 by %c20_i32 dim 1 : vector<8x896xf32>, i32 -> vector<8x896xf32>
    %c7 = arith.constant 7 : index
    %c0_24 = arith.constant 0 : index
    %c0_25 = arith.constant 0 : index
    %37 = vector.load %arg2[%c7, %c0_24, %c0_25] : memref<25x8x8xf32, #tpu.memory_space<vmem>>, vector<1x8x8xf32>
    %38 = vector.shape_cast %37 : vector<1x8x8xf32> to vector<8x8xf32>
    %cst_26 = arith.constant dense<0.000000e+00> : vector<8x896xf32>
    %39 = tpu.matmul %38, %36, %cst_26 {dimension_numbers = #tpu.dot_dimension_numbers<[1], [0], [0], [1], [0, 0, 1, 1], [], []>} : vector<8x8xf32>, vector<8x896xf32>, vector<8x896xf32> -> vector<8x896xf32>
    %40 = arith.addf %35, %39 : vector<8x896xf32>
    %c19_i32 = arith.constant 19 : i32
    %41 = tpu.dynamic_rotate %1 by %c19_i32 dim 1 : vector<8x896xf32>, i32 -> vector<8x896xf32>
    %c8 = arith.constant 8 : index
    %c0_27 = arith.constant 0 : index
    %c0_28 = arith.constant 0 : index
    %42 = vector.load %arg2[%c8, %c0_27, %c0_28] : memref<25x8x8xf32, #tpu.memory_space<vmem>>, vector<1x8x8xf32>
    %43 = vector.shape_cast %42 : vector<1x8x8xf32> to vector<8x8xf32>
    %cst_29 = arith.constant dense<0.000000e+00> : vector<8x896xf32>
    %44 = tpu.matmul %43, %41, %cst_29 {dimension_numbers = #tpu.dot_dimension_numbers<[1], [0], [0], [1], [0, 0, 1, 1], [], []>} : vector<8x8xf32>, vector<8x896xf32>, vector<8x896xf32> -> vector<8x896xf32>
    %45 = arith.addf %40, %44 : vector<8x896xf32>
    %c18_i32 = arith.constant 18 : i32
    %46 = tpu.dynamic_rotate %1 by %c18_i32 dim 1 : vector<8x896xf32>, i32 -> vector<8x896xf32>
    %c9 = arith.constant 9 : index
    %c0_30 = arith.constant 0 : index
    %c0_31 = arith.constant 0 : index
    %47 = vector.load %arg2[%c9, %c0_30, %c0_31] : memref<25x8x8xf32, #tpu.memory_space<vmem>>, vector<1x8x8xf32>
    %48 = vector.shape_cast %47 : vector<1x8x8xf32> to vector<8x8xf32>
    %cst_32 = arith.constant dense<0.000000e+00> : vector<8x896xf32>
    %49 = tpu.matmul %48, %46, %cst_32 {dimension_numbers = #tpu.dot_dimension_numbers<[1], [0], [0], [1], [0, 0, 1, 1], [], []>} : vector<8x8xf32>, vector<8x896xf32>, vector<8x896xf32> -> vector<8x896xf32>
    %50 = arith.addf %45, %49 : vector<8x896xf32>
    %c2_i32 = arith.constant 2 : i32
    %51 = tpu.dynamic_rotate %1 by %c2_i32 dim 1 : vector<8x896xf32>, i32 -> vector<8x896xf32>
    %c10 = arith.constant 10 : index
    %c0_33 = arith.constant 0 : index
    %c0_34 = arith.constant 0 : index
    %52 = vector.load %arg2[%c10, %c0_33, %c0_34] : memref<25x8x8xf32, #tpu.memory_space<vmem>>, vector<1x8x8xf32>
    %53 = vector.shape_cast %52 : vector<1x8x8xf32> to vector<8x8xf32>
    %cst_35 = arith.constant dense<0.000000e+00> : vector<8x896xf32>
    %54 = tpu.matmul %53, %51, %cst_35 {dimension_numbers = #tpu.dot_dimension_numbers<[1], [0], [0], [1], [0, 0, 1, 1], [], []>} : vector<8x8xf32>, vector<8x896xf32>, vector<8x896xf32> -> vector<8x896xf32>
    %55 = arith.addf %50, %54 : vector<8x896xf32>
    %c1_i32 = arith.constant 1 : i32
    %56 = tpu.dynamic_rotate %1 by %c1_i32 dim 1 : vector<8x896xf32>, i32 -> vector<8x896xf32>
    %c11 = arith.constant 11 : index
    %c0_36 = arith.constant 0 : index
    %c0_37 = arith.constant 0 : index
    %57 = vector.load %arg2[%c11, %c0_36, %c0_37] : memref<25x8x8xf32, #tpu.memory_space<vmem>>, vector<1x8x8xf32>
    %58 = vector.shape_cast %57 : vector<1x8x8xf32> to vector<8x8xf32>
    %cst_38 = arith.constant dense<0.000000e+00> : vector<8x896xf32>
    %59 = tpu.matmul %58, %56, %cst_38 {dimension_numbers = #tpu.dot_dimension_numbers<[1], [0], [0], [1], [0, 0, 1, 1], [], []>} : vector<8x8xf32>, vector<8x896xf32>, vector<8x896xf32> -> vector<8x896xf32>
    %60 = arith.addf %55, %59 : vector<8x896xf32>
    %c12 = arith.constant 12 : index
    %c0_39 = arith.constant 0 : index
    %c0_40 = arith.constant 0 : index
    %61 = vector.load %arg2[%c12, %c0_39, %c0_40] : memref<25x8x8xf32, #tpu.memory_space<vmem>>, vector<1x8x8xf32>
    %62 = vector.shape_cast %61 : vector<1x8x8xf32> to vector<8x8xf32>
    %cst_41 = arith.constant dense<0.000000e+00> : vector<8x896xf32>
    %63 = tpu.matmul %62, %1, %cst_41 {dimension_numbers = #tpu.dot_dimension_numbers<[1], [0], [0], [1], [0, 0, 1, 1], [], []>} : vector<8x8xf32>, vector<8x896xf32>, vector<8x896xf32> -> vector<8x896xf32>
    %64 = arith.addf %60, %63 : vector<8x896xf32>
    %c895_i32 = arith.constant 895 : i32
    %65 = tpu.dynamic_rotate %1 by %c895_i32 dim 1 : vector<8x896xf32>, i32 -> vector<8x896xf32>
    %c13 = arith.constant 13 : index
    %c0_42 = arith.constant 0 : index
    %c0_43 = arith.constant 0 : index
    %66 = vector.load %arg2[%c13, %c0_42, %c0_43] : memref<25x8x8xf32, #tpu.memory_space<vmem>>, vector<1x8x8xf32>
    %67 = vector.shape_cast %66 : vector<1x8x8xf32> to vector<8x8xf32>
    %cst_44 = arith.constant dense<0.000000e+00> : vector<8x896xf32>
    %68 = tpu.matmul %67, %65, %cst_44 {dimension_numbers = #tpu.dot_dimension_numbers<[1], [0], [0], [1], [0, 0, 1, 1], [], []>} : vector<8x8xf32>, vector<8x896xf32>, vector<8x896xf32> -> vector<8x896xf32>
    %69 = arith.addf %64, %68 : vector<8x896xf32>
    %c894_i32 = arith.constant 894 : i32
    %70 = tpu.dynamic_rotate %1 by %c894_i32 dim 1 : vector<8x896xf32>, i32 -> vector<8x896xf32>
    %c14 = arith.constant 14 : index
    %c0_45 = arith.constant 0 : index
    %c0_46 = arith.constant 0 : index
    %71 = vector.load %arg2[%c14, %c0_45, %c0_46] : memref<25x8x8xf32, #tpu.memory_space<vmem>>, vector<1x8x8xf32>
    %72 = vector.shape_cast %71 : vector<1x8x8xf32> to vector<8x8xf32>
    %cst_47 = arith.constant dense<0.000000e+00> : vector<8x896xf32>
    %73 = tpu.matmul %72, %70, %cst_47 {dimension_numbers = #tpu.dot_dimension_numbers<[1], [0], [0], [1], [0, 0, 1, 1], [], []>} : vector<8x8xf32>, vector<8x896xf32>, vector<8x896xf32> -> vector<8x896xf32>
    %74 = arith.addf %69, %73 : vector<8x896xf32>
    %c878_i32 = arith.constant 878 : i32
    %75 = tpu.dynamic_rotate %1 by %c878_i32 dim 1 : vector<8x896xf32>, i32 -> vector<8x896xf32>
    %c15 = arith.constant 15 : index
    %c0_48 = arith.constant 0 : index
    %c0_49 = arith.constant 0 : index
    %76 = vector.load %arg2[%c15, %c0_48, %c0_49] : memref<25x8x8xf32, #tpu.memory_space<vmem>>, vector<1x8x8xf32>
    %77 = vector.shape_cast %76 : vector<1x8x8xf32> to vector<8x8xf32>
    %cst_50 = arith.constant dense<0.000000e+00> : vector<8x896xf32>
    %78 = tpu.matmul %77, %75, %cst_50 {dimension_numbers = #tpu.dot_dimension_numbers<[1], [0], [0], [1], [0, 0, 1, 1], [], []>} : vector<8x8xf32>, vector<8x896xf32>, vector<8x896xf32> -> vector<8x896xf32>
    %79 = arith.addf %74, %78 : vector<8x896xf32>
    %c877_i32 = arith.constant 877 : i32
    %80 = tpu.dynamic_rotate %1 by %c877_i32 dim 1 : vector<8x896xf32>, i32 -> vector<8x896xf32>
    %c16 = arith.constant 16 : index
    %c0_51 = arith.constant 0 : index
    %c0_52 = arith.constant 0 : index
    %81 = vector.load %arg2[%c16, %c0_51, %c0_52] : memref<25x8x8xf32, #tpu.memory_space<vmem>>, vector<1x8x8xf32>
    %82 = vector.shape_cast %81 : vector<1x8x8xf32> to vector<8x8xf32>
    %cst_53 = arith.constant dense<0.000000e+00> : vector<8x896xf32>
    %83 = tpu.matmul %82, %80, %cst_53 {dimension_numbers = #tpu.dot_dimension_numbers<[1], [0], [0], [1], [0, 0, 1, 1], [], []>} : vector<8x8xf32>, vector<8x896xf32>, vector<8x896xf32> -> vector<8x896xf32>
    %84 = arith.addf %79, %83 : vector<8x896xf32>
    %c876_i32 = arith.constant 876 : i32
    %85 = tpu.dynamic_rotate %1 by %c876_i32 dim 1 : vector<8x896xf32>, i32 -> vector<8x896xf32>
    %c17 = arith.constant 17 : index
    %c0_54 = arith.constant 0 : index
    %c0_55 = arith.constant 0 : index
    %86 = vector.load %arg2[%c17, %c0_54, %c0_55] : memref<25x8x8xf32, #tpu.memory_space<vmem>>, vector<1x8x8xf32>
    %87 = vector.shape_cast %86 : vector<1x8x8xf32> to vector<8x8xf32>
    %cst_56 = arith.constant dense<0.000000e+00> : vector<8x896xf32>
    %88 = tpu.matmul %87, %85, %cst_56 {dimension_numbers = #tpu.dot_dimension_numbers<[1], [0], [0], [1], [0, 0, 1, 1], [], []>} : vector<8x8xf32>, vector<8x896xf32>, vector<8x896xf32> -> vector<8x896xf32>
    %89 = arith.addf %84, %88 : vector<8x896xf32>
    %c875_i32 = arith.constant 875 : i32
    %90 = tpu.dynamic_rotate %1 by %c875_i32 dim 1 : vector<8x896xf32>, i32 -> vector<8x896xf32>
    %c18 = arith.constant 18 : index
    %c0_57 = arith.constant 0 : index
    %c0_58 = arith.constant 0 : index
    %91 = vector.load %arg2[%c18, %c0_57, %c0_58] : memref<25x8x8xf32, #tpu.memory_space<vmem>>, vector<1x8x8xf32>
    %92 = vector.shape_cast %91 : vector<1x8x8xf32> to vector<8x8xf32>
    %cst_59 = arith.constant dense<0.000000e+00> : vector<8x896xf32>
    %93 = tpu.matmul %92, %90, %cst_59 {dimension_numbers = #tpu.dot_dimension_numbers<[1], [0], [0], [1], [0, 0, 1, 1], [], []>} : vector<8x8xf32>, vector<8x896xf32>, vector<8x896xf32> -> vector<8x896xf32>
    %94 = arith.addf %89, %93 : vector<8x896xf32>
    %c874_i32 = arith.constant 874 : i32
    %95 = tpu.dynamic_rotate %1 by %c874_i32 dim 1 : vector<8x896xf32>, i32 -> vector<8x896xf32>
    %c19 = arith.constant 19 : index
    %c0_60 = arith.constant 0 : index
    %c0_61 = arith.constant 0 : index
    %96 = vector.load %arg2[%c19, %c0_60, %c0_61] : memref<25x8x8xf32, #tpu.memory_space<vmem>>, vector<1x8x8xf32>
    %97 = vector.shape_cast %96 : vector<1x8x8xf32> to vector<8x8xf32>
    %cst_62 = arith.constant dense<0.000000e+00> : vector<8x896xf32>
    %98 = tpu.matmul %97, %95, %cst_62 {dimension_numbers = #tpu.dot_dimension_numbers<[1], [0], [0], [1], [0, 0, 1, 1], [], []>} : vector<8x8xf32>, vector<8x896xf32>, vector<8x896xf32> -> vector<8x896xf32>
    %99 = arith.addf %94, %98 : vector<8x896xf32>
    %c858_i32 = arith.constant 858 : i32
    %100 = tpu.dynamic_rotate %1 by %c858_i32 dim 1 : vector<8x896xf32>, i32 -> vector<8x896xf32>
    %c20 = arith.constant 20 : index
    %c0_63 = arith.constant 0 : index
    %c0_64 = arith.constant 0 : index
    %101 = vector.load %arg2[%c20, %c0_63, %c0_64] : memref<25x8x8xf32, #tpu.memory_space<vmem>>, vector<1x8x8xf32>
    %102 = vector.shape_cast %101 : vector<1x8x8xf32> to vector<8x8xf32>
    %cst_65 = arith.constant dense<0.000000e+00> : vector<8x896xf32>
    %103 = tpu.matmul %102, %100, %cst_65 {dimension_numbers = #tpu.dot_dimension_numbers<[1], [0], [0], [1], [0, 0, 1, 1], [], []>} : vector<8x8xf32>, vector<8x896xf32>, vector<8x896xf32> -> vector<8x896xf32>
    %104 = arith.addf %99, %103 : vector<8x896xf32>
    %c857_i32 = arith.constant 857 : i32
    %105 = tpu.dynamic_rotate %1 by %c857_i32 dim 1 : vector<8x896xf32>, i32 -> vector<8x896xf32>
    %c21 = arith.constant 21 : index
    %c0_66 = arith.constant 0 : index
    %c0_67 = arith.constant 0 : index
    %106 = vector.load %arg2[%c21, %c0_66, %c0_67] : memref<25x8x8xf32, #tpu.memory_space<vmem>>, vector<1x8x8xf32>
    %107 = vector.shape_cast %106 : vector<1x8x8xf32> to vector<8x8xf32>
    %cst_68 = arith.constant dense<0.000000e+00> : vector<8x896xf32>
    %108 = tpu.matmul %107, %105, %cst_68 {dimension_numbers = #tpu.dot_dimension_numbers<[1], [0], [0], [1], [0, 0, 1, 1], [], []>} : vector<8x8xf32>, vector<8x896xf32>, vector<8x896xf32> -> vector<8x896xf32>
    %109 = arith.addf %104, %108 : vector<8x896xf32>
    %c856_i32 = arith.constant 856 : i32
    %110 = tpu.dynamic_rotate %1 by %c856_i32 dim 1 : vector<8x896xf32>, i32 -> vector<8x896xf32>
    %c22 = arith.constant 22 : index
    %c0_69 = arith.constant 0 : index
    %c0_70 = arith.constant 0 : index
    %111 = vector.load %arg2[%c22, %c0_69, %c0_70] : memref<25x8x8xf32, #tpu.memory_space<vmem>>, vector<1x8x8xf32>
    %112 = vector.shape_cast %111 : vector<1x8x8xf32> to vector<8x8xf32>
    %cst_71 = arith.constant dense<0.000000e+00> : vector<8x896xf32>
    %113 = tpu.matmul %112, %110, %cst_71 {dimension_numbers = #tpu.dot_dimension_numbers<[1], [0], [0], [1], [0, 0, 1, 1], [], []>} : vector<8x8xf32>, vector<8x896xf32>, vector<8x896xf32> -> vector<8x896xf32>
    %114 = arith.addf %109, %113 : vector<8x896xf32>
    %c855_i32 = arith.constant 855 : i32
    %115 = tpu.dynamic_rotate %1 by %c855_i32 dim 1 : vector<8x896xf32>, i32 -> vector<8x896xf32>
    %c23 = arith.constant 23 : index
    %c0_72 = arith.constant 0 : index
    %c0_73 = arith.constant 0 : index
    %116 = vector.load %arg2[%c23, %c0_72, %c0_73] : memref<25x8x8xf32, #tpu.memory_space<vmem>>, vector<1x8x8xf32>
    %117 = vector.shape_cast %116 : vector<1x8x8xf32> to vector<8x8xf32>
    %cst_74 = arith.constant dense<0.000000e+00> : vector<8x896xf32>
    %118 = tpu.matmul %117, %115, %cst_74 {dimension_numbers = #tpu.dot_dimension_numbers<[1], [0], [0], [1], [0, 0, 1, 1], [], []>} : vector<8x8xf32>, vector<8x896xf32>, vector<8x896xf32> -> vector<8x896xf32>
    %119 = arith.addf %114, %118 : vector<8x896xf32>
    %c854_i32 = arith.constant 854 : i32
    %120 = tpu.dynamic_rotate %1 by %c854_i32 dim 1 : vector<8x896xf32>, i32 -> vector<8x896xf32>
    %c24 = arith.constant 24 : index
    %c0_75 = arith.constant 0 : index
    %c0_76 = arith.constant 0 : index
    %121 = vector.load %arg2[%c24, %c0_75, %c0_76] : memref<25x8x8xf32, #tpu.memory_space<vmem>>, vector<1x8x8xf32>
    %122 = vector.shape_cast %121 : vector<1x8x8xf32> to vector<8x8xf32>
    %cst_77 = arith.constant dense<0.000000e+00> : vector<8x896xf32>
    %123 = tpu.matmul %122, %120, %cst_77 {dimension_numbers = #tpu.dot_dimension_numbers<[1], [0], [0], [1], [0, 0, 1, 1], [], []>} : vector<8x8xf32>, vector<8x896xf32>, vector<8x896xf32> -> vector<8x896xf32>
    %124 = arith.addf %119, %123 : vector<8x896xf32>
    %c0_78 = arith.constant 0 : index
    %c0_79 = arith.constant 0 : index
    %125 = vector.load %arg3[%c0_78, %c0_79] : memref<8x1xf32, #tpu.memory_space<vmem>>, vector<8x1xf32>
    %126 = vector.broadcast %125 : vector<8x1xf32> to vector<8x896xf32>
    %127 = arith.addf %124, %126 : vector<8x896xf32>
    %c0_80 = arith.constant 0 : index
    %c0_81 = arith.constant 0 : index
    %128 = vector.load %arg4[%c0_80, %c0_81] : memref<8x1xf32, #tpu.memory_space<vmem>>, vector<8x1xf32>
    %c0_82 = arith.constant 0 : index
    %c0_83 = arith.constant 0 : index
    %129 = vector.load %arg5[%c0_82, %c0_83] : memref<8x1xf32, #tpu.memory_space<vmem>>, vector<8x1xf32>
    %130 = vector.broadcast %0 : vector<1x896xf32> to vector<8x896xf32>
    %131 = arith.mulf %127, %130 : vector<8x896xf32>
    %cst_84 = arith.constant dense<0.000000e+00> : vector<8xf32>
    %132 = vector.multi_reduction <add>, %131, %cst_84 [1] : vector<8x896xf32> to vector<8xf32>
    %133 = vector.shape_cast %132 : vector<8xf32> to vector<8x1xf32>
    %cst_85 = arith.constant 0.001953125 : f32
    %134 = vector.broadcast %cst_85 : f32 to vector<8x1xf32>
    %135 = arith.mulf %133, %134 : vector<8x1xf32>
    %136 = vector.broadcast %135 : vector<8x1xf32> to vector<8x896xf32>
    %137 = arith.subf %131, %136 : vector<8x896xf32>
    %138 = vector.broadcast %0 : vector<1x896xf32> to vector<8x896xf32>
    %139 = arith.mulf %137, %138 : vector<8x896xf32>
    %140 = arith.mulf %139, %139 : vector<8x896xf32>
    %cst_86 = arith.constant dense<0.000000e+00> : vector<8xf32>
    %141 = vector.multi_reduction <add>, %140, %cst_86 [1] : vector<8x896xf32> to vector<8xf32>
    %142 = vector.shape_cast %141 : vector<8xf32> to vector<8x1xf32>
    %cst_87 = arith.constant 0.001953125 : f32
    %143 = vector.broadcast %cst_87 : f32 to vector<8x1xf32>
    %144 = arith.mulf %142, %143 : vector<8x1xf32>
    %cst_88 = arith.constant 9.99999974E-6 : f32
    %145 = vector.broadcast %cst_88 : f32 to vector<8x1xf32>
    %146 = arith.addf %144, %145 : vector<8x1xf32>
    %147 = math.rsqrt %146 : vector<8x1xf32>
    %148 = vector.broadcast %147 : vector<8x1xf32> to vector<8x896xf32>
    %149 = arith.mulf %137, %148 : vector<8x896xf32>
    %150 = vector.broadcast %128 : vector<8x1xf32> to vector<8x896xf32>
    %151 = arith.mulf %149, %150 : vector<8x896xf32>
    %152 = vector.broadcast %129 : vector<8x1xf32> to vector<8x896xf32>
    %153 = arith.addf %151, %152 : vector<8x896xf32>
    %cst_89 = arith.constant 0.000000e+00 : f32
    %154 = vector.broadcast %cst_89 : f32 to vector<8x896xf32>
    %155 = arith.subf %154, %153 : vector<8x896xf32>
    %156 = math.exp %155 : vector<8x896xf32>
    %cst_90 = arith.constant 1.000000e+00 : f32
    %157 = vector.broadcast %cst_90 : f32 to vector<8x896xf32>
    %158 = arith.addf %157, %156 : vector<8x896xf32>
    %cst_91 = arith.constant 1.000000e+00 : f32
    %159 = vector.broadcast %cst_91 : f32 to vector<8x896xf32>
    %160 = arith.divf %159, %158 : vector<8x896xf32>
    %161 = arith.mulf %153, %160 : vector<8x896xf32>
    %c0_92 = arith.constant 0 : index
    %c0_93 = arith.constant 0 : index
    %162 = vector.load %arg6[%c0_92, %c0_93] : memref<4x8xf32, #tpu.memory_space<vmem>>, vector<4x8xf32>
    %cst_94 = arith.constant dense<0.000000e+00> : vector<4x896xf32>
    %163 = tpu.matmul %162, %161, %cst_94 {dimension_numbers = #tpu.dot_dimension_numbers<[1], [0], [0], [1], [0, 0, 1, 1], [], []>} : vector<4x8xf32>, vector<8x896xf32>, vector<4x896xf32> -> vector<4x896xf32>
    %c0_95 = arith.constant 0 : index
    %c0_96 = arith.constant 0 : index
    %164 = vector.load %arg7[%c0_95, %c0_96] : memref<4x1xf32, #tpu.memory_space<vmem>>, vector<4x1xf32>
    %165 = vector.broadcast %164 : vector<4x1xf32> to vector<4x896xf32>
    %166 = arith.addf %163, %165 : vector<4x896xf32>
    %c0_97 = arith.constant 0 : index
    %c0_98 = arith.constant 0 : index
    %167 = vector.load %arg8[%c0_97, %c0_98] : memref<4x1xf32, #tpu.memory_space<vmem>>, vector<4x1xf32>
    %c0_99 = arith.constant 0 : index
    %c0_100 = arith.constant 0 : index
    %168 = vector.load %arg9[%c0_99, %c0_100] : memref<4x1xf32, #tpu.memory_space<vmem>>, vector<4x1xf32>
    %169 = vector.broadcast %0 : vector<1x896xf32> to vector<4x896xf32>
    %170 = arith.mulf %166, %169 : vector<4x896xf32>
    %cst_101 = arith.constant dense<0.000000e+00> : vector<4xf32>
    %171 = vector.multi_reduction <add>, %170, %cst_101 [1] : vector<4x896xf32> to vector<4xf32>
    %172 = vector.shape_cast %171 : vector<4xf32> to vector<4x1xf32>
    %cst_102 = arith.constant 0.001953125 : f32
    %173 = vector.broadcast %cst_102 : f32 to vector<4x1xf32>
    %174 = arith.mulf %172, %173 : vector<4x1xf32>
    %175 = vector.broadcast %174 : vector<4x1xf32> to vector<4x896xf32>
    %176 = arith.subf %170, %175 : vector<4x896xf32>
    %177 = vector.broadcast %0 : vector<1x896xf32> to vector<4x896xf32>
    %178 = arith.mulf %176, %177 : vector<4x896xf32>
    %179 = arith.mulf %178, %178 : vector<4x896xf32>
    %cst_103 = arith.constant dense<0.000000e+00> : vector<4xf32>
    %180 = vector.multi_reduction <add>, %179, %cst_103 [1] : vector<4x896xf32> to vector<4xf32>
    %181 = vector.shape_cast %180 : vector<4xf32> to vector<4x1xf32>
    %cst_104 = arith.constant 0.001953125 : f32
    %182 = vector.broadcast %cst_104 : f32 to vector<4x1xf32>
    %183 = arith.mulf %181, %182 : vector<4x1xf32>
    %cst_105 = arith.constant 9.99999974E-6 : f32
    %184 = vector.broadcast %cst_105 : f32 to vector<4x1xf32>
    %185 = arith.addf %183, %184 : vector<4x1xf32>
    %186 = math.rsqrt %185 : vector<4x1xf32>
    %187 = vector.broadcast %186 : vector<4x1xf32> to vector<4x896xf32>
    %188 = arith.mulf %176, %187 : vector<4x896xf32>
    %189 = vector.broadcast %167 : vector<4x1xf32> to vector<4x896xf32>
    %190 = arith.mulf %188, %189 : vector<4x896xf32>
    %191 = vector.broadcast %168 : vector<4x1xf32> to vector<4x896xf32>
    %192 = arith.addf %190, %191 : vector<4x896xf32>
    %cst_106 = arith.constant 0.000000e+00 : f32
    %193 = vector.broadcast %cst_106 : f32 to vector<4x896xf32>
    %194 = arith.subf %193, %192 : vector<4x896xf32>
    %195 = math.exp %194 : vector<4x896xf32>
    %cst_107 = arith.constant 1.000000e+00 : f32
    %196 = vector.broadcast %cst_107 : f32 to vector<4x896xf32>
    %197 = arith.addf %196, %195 : vector<4x896xf32>
    %cst_108 = arith.constant 1.000000e+00 : f32
    %198 = vector.broadcast %cst_108 : f32 to vector<4x896xf32>
    %199 = arith.divf %198, %197 : vector<4x896xf32>
    %200 = arith.mulf %192, %199 : vector<4x896xf32>
    %201 = vector.broadcast %0 : vector<1x896xf32> to vector<4x896xf32>
    %202 = arith.mulf %200, %201 : vector<4x896xf32>
    %c42_i32_109 = arith.constant 42 : i32
    %203 = tpu.dynamic_rotate %202 by %c42_i32_109 dim 1 : vector<4x896xf32>, i32 -> vector<4x896xf32>
    %c0_110 = arith.constant 0 : index
    %c0_111 = arith.constant 0 : index
    %c0_112 = arith.constant 0 : index
    %204 = vector.load %arg10[%c0_110, %c0_111, %c0_112] : memref<25x8x4xf32, #tpu.memory_space<vmem>>, vector<1x8x4xf32>
    %205 = vector.shape_cast %204 : vector<1x8x4xf32> to vector<8x4xf32>
    %cst_113 = arith.constant dense<0.000000e+00> : vector<8x896xf32>
    %206 = tpu.matmul %205, %203, %cst_113 {dimension_numbers = #tpu.dot_dimension_numbers<[1], [0], [0], [1], [0, 0, 1, 1], [], []>} : vector<8x4xf32>, vector<4x896xf32>, vector<8x896xf32> -> vector<8x896xf32>
    %c41_i32_114 = arith.constant 41 : i32
    %207 = tpu.dynamic_rotate %202 by %c41_i32_114 dim 1 : vector<4x896xf32>, i32 -> vector<4x896xf32>
    %c1_115 = arith.constant 1 : index
    %c0_116 = arith.constant 0 : index
    %c0_117 = arith.constant 0 : index
    %208 = vector.load %arg10[%c1_115, %c0_116, %c0_117] : memref<25x8x4xf32, #tpu.memory_space<vmem>>, vector<1x8x4xf32>
    %209 = vector.shape_cast %208 : vector<1x8x4xf32> to vector<8x4xf32>
    %cst_118 = arith.constant dense<0.000000e+00> : vector<8x896xf32>
    %210 = tpu.matmul %209, %207, %cst_118 {dimension_numbers = #tpu.dot_dimension_numbers<[1], [0], [0], [1], [0, 0, 1, 1], [], []>} : vector<8x4xf32>, vector<4x896xf32>, vector<8x896xf32> -> vector<8x896xf32>
    %211 = arith.addf %206, %210 : vector<8x896xf32>
    %c40_i32_119 = arith.constant 40 : i32
    %212 = tpu.dynamic_rotate %202 by %c40_i32_119 dim 1 : vector<4x896xf32>, i32 -> vector<4x896xf32>
    %c2_120 = arith.constant 2 : index
    %c0_121 = arith.constant 0 : index
    %c0_122 = arith.constant 0 : index
    %213 = vector.load %arg10[%c2_120, %c0_121, %c0_122] : memref<25x8x4xf32, #tpu.memory_space<vmem>>, vector<1x8x4xf32>
    %214 = vector.shape_cast %213 : vector<1x8x4xf32> to vector<8x4xf32>
    %cst_123 = arith.constant dense<0.000000e+00> : vector<8x896xf32>
    %215 = tpu.matmul %214, %212, %cst_123 {dimension_numbers = #tpu.dot_dimension_numbers<[1], [0], [0], [1], [0, 0, 1, 1], [], []>} : vector<8x4xf32>, vector<4x896xf32>, vector<8x896xf32> -> vector<8x896xf32>
    %216 = arith.addf %211, %215 : vector<8x896xf32>
    %c39_i32_124 = arith.constant 39 : i32
    %217 = tpu.dynamic_rotate %202 by %c39_i32_124 dim 1 : vector<4x896xf32>, i32 -> vector<4x896xf32>
    %c3_125 = arith.constant 3 : index
    %c0_126 = arith.constant 0 : index
    %c0_127 = arith.constant 0 : index
    %218 = vector.load %arg10[%c3_125, %c0_126, %c0_127] : memref<25x8x4xf32, #tpu.memory_space<vmem>>, vector<1x8x4xf32>
    %219 = vector.shape_cast %218 : vector<1x8x4xf32> to vector<8x4xf32>
    %cst_128 = arith.constant dense<0.000000e+00> : vector<8x896xf32>
    %220 = tpu.matmul %219, %217, %cst_128 {dimension_numbers = #tpu.dot_dimension_numbers<[1], [0], [0], [1], [0, 0, 1, 1], [], []>} : vector<8x4xf32>, vector<4x896xf32>, vector<8x896xf32> -> vector<8x896xf32>
    %221 = arith.addf %216, %220 : vector<8x896xf32>
    %c38_i32_129 = arith.constant 38 : i32
    %222 = tpu.dynamic_rotate %202 by %c38_i32_129 dim 1 : vector<4x896xf32>, i32 -> vector<4x896xf32>
    %c4_130 = arith.constant 4 : index
    %c0_131 = arith.constant 0 : index
    %c0_132 = arith.constant 0 : index
    %223 = vector.load %arg10[%c4_130, %c0_131, %c0_132] : memref<25x8x4xf32, #tpu.memory_space<vmem>>, vector<1x8x4xf32>
    %224 = vector.shape_cast %223 : vector<1x8x4xf32> to vector<8x4xf32>
    %cst_133 = arith.constant dense<0.000000e+00> : vector<8x896xf32>
    %225 = tpu.matmul %224, %222, %cst_133 {dimension_numbers = #tpu.dot_dimension_numbers<[1], [0], [0], [1], [0, 0, 1, 1], [], []>} : vector<8x4xf32>, vector<4x896xf32>, vector<8x896xf32> -> vector<8x896xf32>
    %226 = arith.addf %221, %225 : vector<8x896xf32>
    %c22_i32_134 = arith.constant 22 : i32
    %227 = tpu.dynamic_rotate %202 by %c22_i32_134 dim 1 : vector<4x896xf32>, i32 -> vector<4x896xf32>
    %c5_135 = arith.constant 5 : index
    %c0_136 = arith.constant 0 : index
    %c0_137 = arith.constant 0 : index
    %228 = vector.load %arg10[%c5_135, %c0_136, %c0_137] : memref<25x8x4xf32, #tpu.memory_space<vmem>>, vector<1x8x4xf32>
    %229 = vector.shape_cast %228 : vector<1x8x4xf32> to vector<8x4xf32>
    %cst_138 = arith.constant dense<0.000000e+00> : vector<8x896xf32>
    %230 = tpu.matmul %229, %227, %cst_138 {dimension_numbers = #tpu.dot_dimension_numbers<[1], [0], [0], [1], [0, 0, 1, 1], [], []>} : vector<8x4xf32>, vector<4x896xf32>, vector<8x896xf32> -> vector<8x896xf32>
    %231 = arith.addf %226, %230 : vector<8x896xf32>
    %c21_i32_139 = arith.constant 21 : i32
    %232 = tpu.dynamic_rotate %202 by %c21_i32_139 dim 1 : vector<4x896xf32>, i32 -> vector<4x896xf32>
    %c6_140 = arith.constant 6 : index
    %c0_141 = arith.constant 0 : index
    %c0_142 = arith.constant 0 : index
    %233 = vector.load %arg10[%c6_140, %c0_141, %c0_142] : memref<25x8x4xf32, #tpu.memory_space<vmem>>, vector<1x8x4xf32>
    %234 = vector.shape_cast %233 : vector<1x8x4xf32> to vector<8x4xf32>
    %cst_143 = arith.constant dense<0.000000e+00> : vector<8x896xf32>
    %235 = tpu.matmul %234, %232, %cst_143 {dimension_numbers = #tpu.dot_dimension_numbers<[1], [0], [0], [1], [0, 0, 1, 1], [], []>} : vector<8x4xf32>, vector<4x896xf32>, vector<8x896xf32> -> vector<8x896xf32>
    %236 = arith.addf %231, %235 : vector<8x896xf32>
    %c20_i32_144 = arith.constant 20 : i32
    %237 = tpu.dynamic_rotate %202 by %c20_i32_144 dim 1 : vector<4x896xf32>, i32 -> vector<4x896xf32>
    %c7_145 = arith.constant 7 : index
    %c0_146 = arith.constant 0 : index
    %c0_147 = arith.constant 0 : index
    %238 = vector.load %arg10[%c7_145, %c0_146, %c0_147] : memref<25x8x4xf32, #tpu.memory_space<vmem>>, vector<1x8x4xf32>
    %239 = vector.shape_cast %238 : vector<1x8x4xf32> to vector<8x4xf32>
    %cst_148 = arith.constant dense<0.000000e+00> : vector<8x896xf32>
    %240 = tpu.matmul %239, %237, %cst_148 {dimension_numbers = #tpu.dot_dimension_numbers<[1], [0], [0], [1], [0, 0, 1, 1], [], []>} : vector<8x4xf32>, vector<4x896xf32>, vector<8x896xf32> -> vector<8x896xf32>
    %241 = arith.addf %236, %240 : vector<8x896xf32>
    %c19_i32_149 = arith.constant 19 : i32
    %242 = tpu.dynamic_rotate %202 by %c19_i32_149 dim 1 : vector<4x896xf32>, i32 -> vector<4x896xf32>
    %c8_150 = arith.constant 8 : index
    %c0_151 = arith.constant 0 : index
    %c0_152 = arith.constant 0 : index
    %243 = vector.load %arg10[%c8_150, %c0_151, %c0_152] : memref<25x8x4xf32, #tpu.memory_space<vmem>>, vector<1x8x4xf32>
    %244 = vector.shape_cast %243 : vector<1x8x4xf32> to vector<8x4xf32>
    %cst_153 = arith.constant dense<0.000000e+00> : vector<8x896xf32>
    %245 = tpu.matmul %244, %242, %cst_153 {dimension_numbers = #tpu.dot_dimension_numbers<[1], [0], [0], [1], [0, 0, 1, 1], [], []>} : vector<8x4xf32>, vector<4x896xf32>, vector<8x896xf32> -> vector<8x896xf32>
    %246 = arith.addf %241, %245 : vector<8x896xf32>
    %c18_i32_154 = arith.constant 18 : i32
    %247 = tpu.dynamic_rotate %202 by %c18_i32_154 dim 1 : vector<4x896xf32>, i32 -> vector<4x896xf32>
    %c9_155 = arith.constant 9 : index
    %c0_156 = arith.constant 0 : index
    %c0_157 = arith.constant 0 : index
    %248 = vector.load %arg10[%c9_155, %c0_156, %c0_157] : memref<25x8x4xf32, #tpu.memory_space<vmem>>, vector<1x8x4xf32>
    %249 = vector.shape_cast %248 : vector<1x8x4xf32> to vector<8x4xf32>
    %cst_158 = arith.constant dense<0.000000e+00> : vector<8x896xf32>
    %250 = tpu.matmul %249, %247, %cst_158 {dimension_numbers = #tpu.dot_dimension_numbers<[1], [0], [0], [1], [0, 0, 1, 1], [], []>} : vector<8x4xf32>, vector<4x896xf32>, vector<8x896xf32> -> vector<8x896xf32>
    %251 = arith.addf %246, %250 : vector<8x896xf32>
    %c2_i32_159 = arith.constant 2 : i32
    %252 = tpu.dynamic_rotate %202 by %c2_i32_159 dim 1 : vector<4x896xf32>, i32 -> vector<4x896xf32>
    %c10_160 = arith.constant 10 : index
    %c0_161 = arith.constant 0 : index
    %c0_162 = arith.constant 0 : index
    %253 = vector.load %arg10[%c10_160, %c0_161, %c0_162] : memref<25x8x4xf32, #tpu.memory_space<vmem>>, vector<1x8x4xf32>
    %254 = vector.shape_cast %253 : vector<1x8x4xf32> to vector<8x4xf32>
    %cst_163 = arith.constant dense<0.000000e+00> : vector<8x896xf32>
    %255 = tpu.matmul %254, %252, %cst_163 {dimension_numbers = #tpu.dot_dimension_numbers<[1], [0], [0], [1], [0, 0, 1, 1], [], []>} : vector<8x4xf32>, vector<4x896xf32>, vector<8x896xf32> -> vector<8x896xf32>
    %256 = arith.addf %251, %255 : vector<8x896xf32>
    %c1_i32_164 = arith.constant 1 : i32
    %257 = tpu.dynamic_rotate %202 by %c1_i32_164 dim 1 : vector<4x896xf32>, i32 -> vector<4x896xf32>
    %c11_165 = arith.constant 11 : index
    %c0_166 = arith.constant 0 : index
    %c0_167 = arith.constant 0 : index
    %258 = vector.load %arg10[%c11_165, %c0_166, %c0_167] : memref<25x8x4xf32, #tpu.memory_space<vmem>>, vector<1x8x4xf32>
    %259 = vector.shape_cast %258 : vector<1x8x4xf32> to vector<8x4xf32>
    %cst_168 = arith.constant dense<0.000000e+00> : vector<8x896xf32>
    %260 = tpu.matmul %259, %257, %cst_168 {dimension_numbers = #tpu.dot_dimension_numbers<[1], [0], [0], [1], [0, 0, 1, 1], [], []>} : vector<8x4xf32>, vector<4x896xf32>, vector<8x896xf32> -> vector<8x896xf32>
    %261 = arith.addf %256, %260 : vector<8x896xf32>
    %c12_169 = arith.constant 12 : index
    %c0_170 = arith.constant 0 : index
    %c0_171 = arith.constant 0 : index
    %262 = vector.load %arg10[%c12_169, %c0_170, %c0_171] : memref<25x8x4xf32, #tpu.memory_space<vmem>>, vector<1x8x4xf32>
    %263 = vector.shape_cast %262 : vector<1x8x4xf32> to vector<8x4xf32>
    %cst_172 = arith.constant dense<0.000000e+00> : vector<8x896xf32>
    %264 = tpu.matmul %263, %202, %cst_172 {dimension_numbers = #tpu.dot_dimension_numbers<[1], [0], [0], [1], [0, 0, 1, 1], [], []>} : vector<8x4xf32>, vector<4x896xf32>, vector<8x896xf32> -> vector<8x896xf32>
    %265 = arith.addf %261, %264 : vector<8x896xf32>
    %c895_i32_173 = arith.constant 895 : i32
    %266 = tpu.dynamic_rotate %202 by %c895_i32_173 dim 1 : vector<4x896xf32>, i32 -> vector<4x896xf32>
    %c13_174 = arith.constant 13 : index
    %c0_175 = arith.constant 0 : index
    %c0_176 = arith.constant 0 : index
    %267 = vector.load %arg10[%c13_174, %c0_175, %c0_176] : memref<25x8x4xf32, #tpu.memory_space<vmem>>, vector<1x8x4xf32>
    %268 = vector.shape_cast %267 : vector<1x8x4xf32> to vector<8x4xf32>
    %cst_177 = arith.constant dense<0.000000e+00> : vector<8x896xf32>
    %269 = tpu.matmul %268, %266, %cst_177 {dimension_numbers = #tpu.dot_dimension_numbers<[1], [0], [0], [1], [0, 0, 1, 1], [], []>} : vector<8x4xf32>, vector<4x896xf32>, vector<8x896xf32> -> vector<8x896xf32>
    %270 = arith.addf %265, %269 : vector<8x896xf32>
    %c894_i32_178 = arith.constant 894 : i32
    %271 = tpu.dynamic_rotate %202 by %c894_i32_178 dim 1 : vector<4x896xf32>, i32 -> vector<4x896xf32>
    %c14_179 = arith.constant 14 : index
    %c0_180 = arith.constant 0 : index
    %c0_181 = arith.constant 0 : index
    %272 = vector.load %arg10[%c14_179, %c0_180, %c0_181] : memref<25x8x4xf32, #tpu.memory_space<vmem>>, vector<1x8x4xf32>
    %273 = vector.shape_cast %272 : vector<1x8x4xf32> to vector<8x4xf32>
    %cst_182 = arith.constant dense<0.000000e+00> : vector<8x896xf32>
    %274 = tpu.matmul %273, %271, %cst_182 {dimension_numbers = #tpu.dot_dimension_numbers<[1], [0], [0], [1], [0, 0, 1, 1], [], []>} : vector<8x4xf32>, vector<4x896xf32>, vector<8x896xf32> -> vector<8x896xf32>
    %275 = arith.addf %270, %274 : vector<8x896xf32>
    %c878_i32_183 = arith.constant 878 : i32
    %276 = tpu.dynamic_rotate %202 by %c878_i32_183 dim 1 : vector<4x896xf32>, i32 -> vector<4x896xf32>
    %c15_184 = arith.constant 15 : index
    %c0_185 = arith.constant 0 : index
    %c0_186 = arith.constant 0 : index
    %277 = vector.load %arg10[%c15_184, %c0_185, %c0_186] : memref<25x8x4xf32, #tpu.memory_space<vmem>>, vector<1x8x4xf32>
    %278 = vector.shape_cast %277 : vector<1x8x4xf32> to vector<8x4xf32>
    %cst_187 = arith.constant dense<0.000000e+00> : vector<8x896xf32>
    %279 = tpu.matmul %278, %276, %cst_187 {dimension_numbers = #tpu.dot_dimension_numbers<[1], [0], [0], [1], [0, 0, 1, 1], [], []>} : vector<8x4xf32>, vector<4x896xf32>, vector<8x896xf32> -> vector<8x896xf32>
    %280 = arith.addf %275, %279 : vector<8x896xf32>
    %c877_i32_188 = arith.constant 877 : i32
    %281 = tpu.dynamic_rotate %202 by %c877_i32_188 dim 1 : vector<4x896xf32>, i32 -> vector<4x896xf32>
    %c16_189 = arith.constant 16 : index
    %c0_190 = arith.constant 0 : index
    %c0_191 = arith.constant 0 : index
    %282 = vector.load %arg10[%c16_189, %c0_190, %c0_191] : memref<25x8x4xf32, #tpu.memory_space<vmem>>, vector<1x8x4xf32>
    %283 = vector.shape_cast %282 : vector<1x8x4xf32> to vector<8x4xf32>
    %cst_192 = arith.constant dense<0.000000e+00> : vector<8x896xf32>
    %284 = tpu.matmul %283, %281, %cst_192 {dimension_numbers = #tpu.dot_dimension_numbers<[1], [0], [0], [1], [0, 0, 1, 1], [], []>} : vector<8x4xf32>, vector<4x896xf32>, vector<8x896xf32> -> vector<8x896xf32>
    %285 = arith.addf %280, %284 : vector<8x896xf32>
    %c876_i32_193 = arith.constant 876 : i32
    %286 = tpu.dynamic_rotate %202 by %c876_i32_193 dim 1 : vector<4x896xf32>, i32 -> vector<4x896xf32>
    %c17_194 = arith.constant 17 : index
    %c0_195 = arith.constant 0 : index
    %c0_196 = arith.constant 0 : index
    %287 = vector.load %arg10[%c17_194, %c0_195, %c0_196] : memref<25x8x4xf32, #tpu.memory_space<vmem>>, vector<1x8x4xf32>
    %288 = vector.shape_cast %287 : vector<1x8x4xf32> to vector<8x4xf32>
    %cst_197 = arith.constant dense<0.000000e+00> : vector<8x896xf32>
    %289 = tpu.matmul %288, %286, %cst_197 {dimension_numbers = #tpu.dot_dimension_numbers<[1], [0], [0], [1], [0, 0, 1, 1], [], []>} : vector<8x4xf32>, vector<4x896xf32>, vector<8x896xf32> -> vector<8x896xf32>
    %290 = arith.addf %285, %289 : vector<8x896xf32>
    %c875_i32_198 = arith.constant 875 : i32
    %291 = tpu.dynamic_rotate %202 by %c875_i32_198 dim 1 : vector<4x896xf32>, i32 -> vector<4x896xf32>
    %c18_199 = arith.constant 18 : index
    %c0_200 = arith.constant 0 : index
    %c0_201 = arith.constant 0 : index
    %292 = vector.load %arg10[%c18_199, %c0_200, %c0_201] : memref<25x8x4xf32, #tpu.memory_space<vmem>>, vector<1x8x4xf32>
    %293 = vector.shape_cast %292 : vector<1x8x4xf32> to vector<8x4xf32>
    %cst_202 = arith.constant dense<0.000000e+00> : vector<8x896xf32>
    %294 = tpu.matmul %293, %291, %cst_202 {dimension_numbers = #tpu.dot_dimension_numbers<[1], [0], [0], [1], [0, 0, 1, 1], [], []>} : vector<8x4xf32>, vector<4x896xf32>, vector<8x896xf32> -> vector<8x896xf32>
    %295 = arith.addf %290, %294 : vector<8x896xf32>
    %c874_i32_203 = arith.constant 874 : i32
    %296 = tpu.dynamic_rotate %202 by %c874_i32_203 dim 1 : vector<4x896xf32>, i32 -> vector<4x896xf32>
    %c19_204 = arith.constant 19 : index
    %c0_205 = arith.constant 0 : index
    %c0_206 = arith.constant 0 : index
    %297 = vector.load %arg10[%c19_204, %c0_205, %c0_206] : memref<25x8x4xf32, #tpu.memory_space<vmem>>, vector<1x8x4xf32>
    %298 = vector.shape_cast %297 : vector<1x8x4xf32> to vector<8x4xf32>
    %cst_207 = arith.constant dense<0.000000e+00> : vector<8x896xf32>
    %299 = tpu.matmul %298, %296, %cst_207 {dimension_numbers = #tpu.dot_dimension_numbers<[1], [0], [0], [1], [0, 0, 1, 1], [], []>} : vector<8x4xf32>, vector<4x896xf32>, vector<8x896xf32> -> vector<8x896xf32>
    %300 = arith.addf %295, %299 : vector<8x896xf32>
    %c858_i32_208 = arith.constant 858 : i32
    %301 = tpu.dynamic_rotate %202 by %c858_i32_208 dim 1 : vector<4x896xf32>, i32 -> vector<4x896xf32>
    %c20_209 = arith.constant 20 : index
    %c0_210 = arith.constant 0 : index
    %c0_211 = arith.constant 0 : index
    %302 = vector.load %arg10[%c20_209, %c0_210, %c0_211] : memref<25x8x4xf32, #tpu.memory_space<vmem>>, vector<1x8x4xf32>
    %303 = vector.shape_cast %302 : vector<1x8x4xf32> to vector<8x4xf32>
    %cst_212 = arith.constant dense<0.000000e+00> : vector<8x896xf32>
    %304 = tpu.matmul %303, %301, %cst_212 {dimension_numbers = #tpu.dot_dimension_numbers<[1], [0], [0], [1], [0, 0, 1, 1], [], []>} : vector<8x4xf32>, vector<4x896xf32>, vector<8x896xf32> -> vector<8x896xf32>
    %305 = arith.addf %300, %304 : vector<8x896xf32>
    %c857_i32_213 = arith.constant 857 : i32
    %306 = tpu.dynamic_rotate %202 by %c857_i32_213 dim 1 : vector<4x896xf32>, i32 -> vector<4x896xf32>
    %c21_214 = arith.constant 21 : index
    %c0_215 = arith.constant 0 : index
    %c0_216 = arith.constant 0 : index
    %307 = vector.load %arg10[%c21_214, %c0_215, %c0_216] : memref<25x8x4xf32, #tpu.memory_space<vmem>>, vector<1x8x4xf32>
    %308 = vector.shape_cast %307 : vector<1x8x4xf32> to vector<8x4xf32>
    %cst_217 = arith.constant dense<0.000000e+00> : vector<8x896xf32>
    %309 = tpu.matmul %308, %306, %cst_217 {dimension_numbers = #tpu.dot_dimension_numbers<[1], [0], [0], [1], [0, 0, 1, 1], [], []>} : vector<8x4xf32>, vector<4x896xf32>, vector<8x896xf32> -> vector<8x896xf32>
    %310 = arith.addf %305, %309 : vector<8x896xf32>
    %c856_i32_218 = arith.constant 856 : i32
    %311 = tpu.dynamic_rotate %202 by %c856_i32_218 dim 1 : vector<4x896xf32>, i32 -> vector<4x896xf32>
    %c22_219 = arith.constant 22 : index
    %c0_220 = arith.constant 0 : index
    %c0_221 = arith.constant 0 : index
    %312 = vector.load %arg10[%c22_219, %c0_220, %c0_221] : memref<25x8x4xf32, #tpu.memory_space<vmem>>, vector<1x8x4xf32>
    %313 = vector.shape_cast %312 : vector<1x8x4xf32> to vector<8x4xf32>
    %cst_222 = arith.constant dense<0.000000e+00> : vector<8x896xf32>
    %314 = tpu.matmul %313, %311, %cst_222 {dimension_numbers = #tpu.dot_dimension_numbers<[1], [0], [0], [1], [0, 0, 1, 1], [], []>} : vector<8x4xf32>, vector<4x896xf32>, vector<8x896xf32> -> vector<8x896xf32>
    %315 = arith.addf %310, %314 : vector<8x896xf32>
    %c855_i32_223 = arith.constant 855 : i32
    %316 = tpu.dynamic_rotate %202 by %c855_i32_223 dim 1 : vector<4x896xf32>, i32 -> vector<4x896xf32>
    %c23_224 = arith.constant 23 : index
    %c0_225 = arith.constant 0 : index
    %c0_226 = arith.constant 0 : index
    %317 = vector.load %arg10[%c23_224, %c0_225, %c0_226] : memref<25x8x4xf32, #tpu.memory_space<vmem>>, vector<1x8x4xf32>
    %318 = vector.shape_cast %317 : vector<1x8x4xf32> to vector<8x4xf32>
    %cst_227 = arith.constant dense<0.000000e+00> : vector<8x896xf32>
    %319 = tpu.matmul %318, %316, %cst_227 {dimension_numbers = #tpu.dot_dimension_numbers<[1], [0], [0], [1], [0, 0, 1, 1], [], []>} : vector<8x4xf32>, vector<4x896xf32>, vector<8x896xf32> -> vector<8x896xf32>
    %320 = arith.addf %315, %319 : vector<8x896xf32>
    %c854_i32_228 = arith.constant 854 : i32
    %321 = tpu.dynamic_rotate %202 by %c854_i32_228 dim 1 : vector<4x896xf32>, i32 -> vector<4x896xf32>
    %c24_229 = arith.constant 24 : index
    %c0_230 = arith.constant 0 : index
    %c0_231 = arith.constant 0 : index
    %322 = vector.load %arg10[%c24_229, %c0_230, %c0_231] : memref<25x8x4xf32, #tpu.memory_space<vmem>>, vector<1x8x4xf32>
    %323 = vector.shape_cast %322 : vector<1x8x4xf32> to vector<8x4xf32>
    %cst_232 = arith.constant dense<0.000000e+00> : vector<8x896xf32>
    %324 = tpu.matmul %323, %321, %cst_232 {dimension_numbers = #tpu.dot_dimension_numbers<[1], [0], [0], [1], [0, 0, 1, 1], [], []>} : vector<8x4xf32>, vector<4x896xf32>, vector<8x896xf32> -> vector<8x896xf32>
    %325 = arith.addf %320, %324 : vector<8x896xf32>
    %c0_233 = arith.constant 0 : index
    %c0_234 = arith.constant 0 : index
    %326 = vector.load %arg11[%c0_233, %c0_234] : memref<8x1xf32, #tpu.memory_space<vmem>>, vector<8x1xf32>
    %327 = vector.broadcast %326 : vector<8x1xf32> to vector<8x896xf32>
    %328 = arith.addf %325, %327 : vector<8x896xf32>
    %c0_235 = arith.constant 0 : index
    %c0_236 = arith.constant 0 : index
    %329 = vector.load %arg12[%c0_235, %c0_236] : memref<8x1xf32, #tpu.memory_space<vmem>>, vector<8x1xf32>
    %c0_237 = arith.constant 0 : index
    %c0_238 = arith.constant 0 : index
    %330 = vector.load %arg13[%c0_237, %c0_238] : memref<8x1xf32, #tpu.memory_space<vmem>>, vector<8x1xf32>
    %331 = vector.broadcast %0 : vector<1x896xf32> to vector<8x896xf32>
    %332 = arith.mulf %328, %331 : vector<8x896xf32>
    %cst_239 = arith.constant dense<0.000000e+00> : vector<8xf32>
    %333 = vector.multi_reduction <add>, %332, %cst_239 [1] : vector<8x896xf32> to vector<8xf32>
    %334 = vector.shape_cast %333 : vector<8xf32> to vector<8x1xf32>
    %cst_240 = arith.constant 0.001953125 : f32
    %335 = vector.broadcast %cst_240 : f32 to vector<8x1xf32>
    %336 = arith.mulf %334, %335 : vector<8x1xf32>
    %337 = vector.broadcast %336 : vector<8x1xf32> to vector<8x896xf32>
    %338 = arith.subf %332, %337 : vector<8x896xf32>
    %339 = vector.broadcast %0 : vector<1x896xf32> to vector<8x896xf32>
    %340 = arith.mulf %338, %339 : vector<8x896xf32>
    %341 = arith.mulf %340, %340 : vector<8x896xf32>
    %cst_241 = arith.constant dense<0.000000e+00> : vector<8xf32>
    %342 = vector.multi_reduction <add>, %341, %cst_241 [1] : vector<8x896xf32> to vector<8xf32>
    %343 = vector.shape_cast %342 : vector<8xf32> to vector<8x1xf32>
    %cst_242 = arith.constant 0.001953125 : f32
    %344 = vector.broadcast %cst_242 : f32 to vector<8x1xf32>
    %345 = arith.mulf %343, %344 : vector<8x1xf32>
    %cst_243 = arith.constant 9.99999974E-6 : f32
    %346 = vector.broadcast %cst_243 : f32 to vector<8x1xf32>
    %347 = arith.addf %345, %346 : vector<8x1xf32>
    %348 = math.rsqrt %347 : vector<8x1xf32>
    %349 = vector.broadcast %348 : vector<8x1xf32> to vector<8x896xf32>
    %350 = arith.mulf %338, %349 : vector<8x896xf32>
    %351 = vector.broadcast %329 : vector<8x1xf32> to vector<8x896xf32>
    %352 = arith.mulf %350, %351 : vector<8x896xf32>
    %353 = vector.broadcast %330 : vector<8x1xf32> to vector<8x896xf32>
    %354 = arith.addf %352, %353 : vector<8x896xf32>
    %cst_244 = arith.constant 0.000000e+00 : f32
    %355 = vector.broadcast %cst_244 : f32 to vector<8x896xf32>
    %356 = arith.subf %355, %354 : vector<8x896xf32>
    %357 = math.exp %356 : vector<8x896xf32>
    %cst_245 = arith.constant 1.000000e+00 : f32
    %358 = vector.broadcast %cst_245 : f32 to vector<8x896xf32>
    %359 = arith.addf %358, %357 : vector<8x896xf32>
    %cst_246 = arith.constant 1.000000e+00 : f32
    %360 = vector.broadcast %cst_246 : f32 to vector<8x896xf32>
    %361 = arith.divf %360, %359 : vector<8x896xf32>
    %362 = arith.mulf %354, %361 : vector<8x896xf32>
    %cst_247 = arith.constant 1.000000e-01 : f32
    %363 = vector.broadcast %cst_247 : f32 to vector<8x896xf32>
    %364 = arith.mulf %363, %362 : vector<8x896xf32>
    %365 = arith.addf %1, %364 : vector<8x896xf32>
    %c0_248 = arith.constant 0 : index
    %c0_249 = arith.constant 0 : index
    %366 = vector.load %arg14[%c0_248, %c0_249] : memref<8x896xf32, #tpu.memory_space<vmem>>, vector<8x896xf32>
    tpu.vector_store %arg14[%c0_248, %c0_249], %365 {strides = array<i32>} : memref<8x896xf32, #tpu.memory_space<vmem>>, vector<8x896xf32>,
    return
  }
}

</mosaic_0001>

<bundles_post_ra>
// kernel: residual_block.1
= control target key start
LH: loop header
LB: loop body
LE: loop exit
PB: predicated region body
PF: predicated region fallthrough
CT: control target
= control target key end

     0   :  { %v18333_v2 = vmov 0.0   ;;  %s18334_s17 = smov 41   ;;  %s18335_s28 = smov 42   ;;  %v69_v8 = vlaneseq  ;;  %vm104_vm1 = vcmask 64512   ;;  %vm18344_vm3 = vmmov 0   ;;  %s20908_s0 = inlined_call_operand.vmem [shape: f32[8,896], index: 0, kind: input, shape index: {}, may-alias: {0,14}]   ;;  %s20909_s2 = inlined_call_operand.vmem [shape: f32[25,8,8], index: 2, kind: input, shape index: {}]   ;;  %s20910_s3 = inlined_call_operand.vmem [shape: f32[8,1], index: 3, kind: input, shape index: {}]   ;;  %s20911_s1 = inlined_call_operand.vmem [shape: f32[1,896], index: 1, kind: input, shape index: {}]   ;;  %s20912_s4 = inlined_call_operand.vmem [shape: f32[8,1], index: 4, kind: input, shape index: {}]   ;;  %s20913_s7 = inlined_call_operand.vmem [shape: f32[4,1], index: 7, kind: input, shape index: {}]   ;;  %s20914_s5 = inlined_call_operand.vmem [shape: f32[8,1], index: 5, kind: input, shape index: {}]   ;;  %s20915_s8 = inlined_call_operand.vmem [shape: f32[4,1], index: 8, kind: input, shape index: {}]   ;;  %s20916_s6 = inlined_call_operand.vmem [shape: f32[4,8], index: 6, kind: input, shape index: {}]   ;;  %s20917_s9 = inlined_call_operand.vmem [shape: f32[4,1], index: 9, kind: input, shape index: {}]   ;;  %s20918_s10 = inlined_call_operand.vmem [shape: f32[25,8,4], index: 10, kind: input, shape index: {}]   ;;  %s20919_s11 = inlined_call_operand.vmem [shape: f32[8,1], index: 11, kind: input, shape index: {}]   ;;  %s20920_s12 = inlined_call_operand.vmem [shape: f32[8,1], index: 12, kind: input, shape index: {}]   ;;  %s20921_s13 = inlined_call_operand.vmem [shape: f32[8,1], index: 13, kind: input, shape index: {}]   ;;  %s20922_s14 = inlined_call_operand.vmem [shape: f32[8,896], index: 14, kind: output, shape index: {}, may-alias: {0,14}]  }
   0x1   :  { %v18438_v0 = vld [vmem:[%s20908_s0 + $0x30] sm:$0xff]  ;;  %v18443_v1 = vld [vmem:[%s20908_s0] sm:$0xff]  ;;  %243 = vmatprep.mubr.f32.mxu1 %v18333_v2  ;;  %172 = vmatprep.mubr.f32.mxu0 %v18333_v2  ;;  %v18459_v4 = vld [vmem:[%s20908_s0 + $0x8] sm:$0xff]  ;;  %s18336_s29 = smov 40   ;;  %s18337_s30 = smov 39  }
   0x2   :  { %92 = vrot.lane.b32.xlu1 %v18438_v0, %s18334_s17  ;;  %80 = vrot.lane.b32.xlu0 %v18443_v1, %s18334_s17  ;;  %v18454_v3 = vld [vmem:[%s20908_s0 + $0x10] sm:$0xff]  ;;  %v18468_v5 = vld [vmem:[%s20908_s0 + $0x20] sm:$0xff]  ;;  %s18338_s15 = smov 38   ;;  %s18339_s16 = smov 22   ;;  %v18589_v11 = vand.u32 127, %v69_v8 }
   0x3   :  { %v18473_v6 = vld [vmem:[%s20908_s0 + $0x18] sm:$0xff]  ;;  %v18482_v7 = vld [vmem:[%s20908_s0 + $0x28] sm:$0xff]  ;;  %s18340_s18 = smov 21   ;;  %s18341_s19 = smov 20   ;;  %v79_v30 = vld [vmem:[%s20909_s2] sm:$0xff] }
   0x4   :  { %s18342_s20 = smov 19   ;;  %vm94_vm0 = vcmp.lt.s32.totalorder %v18589_v11, 41  ;;  %v17128_v15 = vld [vmem:[%s20909_s2 + $0x8] sm:$0xff]  ;;  %s20941_s23 = smov 18   ;;  %vm71_vm2 = vcmp.lt.s32.totalorder %v18589_v11, 42  ;;  %vm691_vm4 = vcmp.lt.s32.totalorder %v18589_v11, 40 }
   0x5   :  { %s20939_s26 = smov 2   ;;  %v17137_v46 = vld [vmem:[%s20909_s2 + $0x10] sm:$0xff]  ;;  %s20937_s22 = smov 1   ;;  %vm1008_vm5 = vcmp.lt.s32.totalorder %v18589_v11, 39  ;;  %v17142_v60 = vld [vmem:[%s20909_s2 + $0x18] sm:$0xff]  ;;  %vm1325_vm6 = vcmp.lt.s32.totalorder %v18589_v11, 38 }
   0x6   :  { %84 = vrot.lane.b32.xlu1 %v18454_v3, %s18334_s17  ;;  %82 = vrot.lane.b32.xlu0 %v18459_v4, %s18334_s17  ;;  %s20925_s27 = smov 127   ;;  %s20923_s25 = smov 126   ;;  %vm1642_vm7 = vcmp.lt.s32.totalorder %v18589_v11, 22  ;;  %vm1959_vm8 = vcmp.lt.s32.totalorder %v18589_v11, 21  ;;  %vm2276_vm9 = vcmp.lt.s32.totalorder %v18589_v11, 20  ;;  %vm2593_vm10 = vcmp.lt.s32.totalorder %v18589_v11, 19 }
   0x7   :  { %s20929_s21 = smov 110   ;;  %vm2910_vm11 = vcmp.lt.s32.totalorder %v18589_v11, 18  ;;  %vm3227_vm12 = vcmp.lt.s32.totalorder %v18589_v11, 2  ;;  %vm3544_vm13 = vcmp.lt.s32.totalorder %v18589_v11, 1  ;;  %vm20943_vm14 = vcmp.lt.s32.totalorder %v18589_v11, 127 }
   0x8   :  { %vm20944_vm15 = vcmp.lt.s32.totalorder %v18589_v11, 126 }
   0xa   :  { %88 = vrot.lane.b32.xlu1 %v18468_v5, %s18334_s17  ;;  %86 = vrot.lane.b32.xlu0 %v18473_v6, %s18334_s17 }
   0xe   :  { %55 = vrot.lane.b32.xlu1 %v18443_v1, %s18335_s28  ;;  %90 = vrot.lane.b32.xlu0 %v18482_v7, %s18334_s17 }
  0x12   :  { %67 = vrot.lane.b32.xlu1 %v18438_v0, %s18335_s28  ;;  %57 = vrot.lane.b32.xlu0 %v18459_v4, %s18335_s28 }
  0x16   :  { %61 = vrot.lane.b32.xlu1 %v18473_v6, %s18335_s28  ;;  %59 = vrot.lane.b32.xlu0 %v18454_v3, %s18335_s28 }
  0x1a   :  { %65 = vrot.lane.b32.xlu1 %v18482_v7, %s18335_s28  ;;  %63 = vrot.lane.b32.xlu0 %v18468_v5, %s18335_s28 }
  0x1e   :  { %679 = vrot.lane.b32.xlu1 %v18459_v4, %s18336_s29  ;;  %677 = vrot.lane.b32.xlu0 %v18443_v1, %s18336_s29 }
  0x22   :  { %681 = vrot.lane.b32.xlu1 %v18454_v3, %s18336_s29  ;;  %689 = vrot.lane.b32.xlu0 %v18438_v0, %s18336_s29 }
  0x26   :  { %685 = vrot.lane.b32.xlu1 %v18468_v5, %s18336_s29  ;;  %683 = vrot.lane.b32.xlu0 %v18473_v6, %s18336_s29 }
  0x2a   :  { %994 = vrot.lane.b32.xlu1 %v18443_v1, %s18337_s30  ;;  %687 = vrot.lane.b32.xlu0 %v18482_v7, %s18336_s29 }
  0x2e   :  { %1006 = vrot.lane.b32.xlu1 %v18438_v0, %s18337_s30  ;;  %996 = vrot.lane.b32.xlu0 %v18459_v4, %s18337_s30 }
  0x32   :  { %1000 = vrot.lane.b32.xlu1 %v18473_v6, %s18337_s30  ;;  %998 = vrot.lane.b32.xlu0 %v18454_v3, %s18337_s30 }
  0x36   :  { %1004 = vrot.lane.b32.xlu1 %v18482_v7, %s18337_s30  ;;  %1002 = vrot.lane.b32.xlu0 %v18468_v5, %s18337_s30 }
  0x3a   :  { %1313 = vrot.lane.b32.xlu1 %v18459_v4, %s18338_s15  ;;  %1311 = vrot.lane.b32.xlu0 %v18443_v1, %s18338_s15 }
  0x3e   :  { %1315 = vrot.lane.b32.xlu1 %v18454_v3, %s18338_s15  ;;  %1323 = vrot.lane.b32.xlu0 %v18438_v0, %s18338_s15 }
  0x42   :  { %1319 = vrot.lane.b32.xlu1 %v18468_v5, %s18338_s15  ;;  %1317 = vrot.lane.b32.xlu0 %v18473_v6, %s18338_s15 }
  0x46   :  { %1628 = vrot.lane.b32.xlu1 %v18443_v1, %s18339_s16  ;;  %1321 = vrot.lane.b32.xlu0 %v18482_v7, %s18338_s15 }
  0x4a   :  { %1640 = vrot.lane.b32.xlu1 %v18438_v0, %s18339_s16  ;;  %1630 = vrot.lane.b32.xlu0 %v18459_v4, %s18339_s16 }
  0x4e   :  { %1634 = vrot.lane.b32.xlu1 %v18473_v6, %s18339_s16  ;;  %1632 = vrot.lane.b32.xlu0 %v18454_v3, %s18339_s16 }
  0x52   :  { %1638 = vrot.lane.b32.xlu1 %v18482_v7, %s18339_s16  ;;  %1636 = vrot.lane.b32.xlu0 %v18468_v5, %s18339_s16 }
  0x56   :  { %1947 = vrot.lane.b32.xlu1 %v18459_v4, %s18340_s18  ;;  %1945 = vrot.lane.b32.xlu0 %v18443_v1, %s18340_s18 }
  0x5a   :  { %1949 = vrot.lane.b32.xlu1 %v18454_v3, %s18340_s18  ;;  %1957 = vrot.lane.b32.xlu0 %v18438_v0, %s18340_s18 }
  0x5e   :  { %1953 = vrot.lane.b32.xlu1 %v18468_v5, %s18340_s18  ;;  %1951 = vrot.lane.b32.xlu0 %v18473_v6, %s18340_s18 }
  0x62   :  { %2262 = vrot.lane.b32.xlu1 %v18443_v1, %s18341_s19  ;;  %1955 = vrot.lane.b32.xlu0 %v18482_v7, %s18340_s18 }
  0x66   :  { %2274 = vrot.lane.b32.xlu1 %v18438_v0, %s18341_s19  ;;  %2264 = vrot.lane.b32.xlu0 %v18459_v4, %s18341_s19 }
  0x6a   :  { %2268 = vrot.lane.b32.xlu1 %v18473_v6, %s18341_s19  ;;  %2266 = vrot.lane.b32.xlu0 %v18454_v3, %s18341_s19 }
  0x6e   :  { %2272 = vrot.lane.b32.xlu1 %v18482_v7, %s18341_s19  ;;  %2270 = vrot.lane.b32.xlu0 %v18468_v5, %s18341_s19 }
  0x72   :  { %2581 = vrot.lane.b32.xlu1 %v18459_v4, %s18342_s20  ;;  %2579 = vrot.lane.b32.xlu0 %v18443_v1, %s18342_s20 }
  0x74   :  { %v93_v9 = vpop.permute.xlu1 %92  ;;  %v81_v10 = vpop.permute.xlu0 %80 }
  0x75   :  { %v101_v16 = vsel %vm94_vm0, %v93_v9, %v81_v10 }
  0x76   :  { %2583 = vrot.lane.b32.xlu1 %v18454_v3, %s18342_s20  ;;  %2591 = vrot.lane.b32.xlu0 %v18438_v0, %s18342_s20 }
  0x78   :  { %v85_v12 = vpop.permute.xlu1 %84  ;;  %v83_v13 = vpop.permute.xlu0 %82 }
  0x79   :  { %v100_v14 = vsel %vm94_vm0, %v81_v10, %v83_v13  ;;  %v99_v20 = vsel %vm94_vm0, %v83_v13, %v85_v12 }
  0x7a   :  { %2587 = vrot.lane.b32.xlu1 %v18468_v5, %s18342_s20  ;;  %2585 = vrot.lane.b32.xlu0 %v18473_v6, %s18342_s20 }
  0x7b   :  { %108 = vmatprep.subr.mxu0 %v100_v14 }
  0x7c   :  { %109 = vmatpush1.msra.mxu0 %v101_v16  ;;  %v89_v17 = vpop.permute.xlu1 %88  ;;  %v87_v18 = vpop.permute.xlu0 %86 }
  0x7d   :  { %v98_v19 = vsel %vm94_vm0, %v85_v12, %v87_v18  ;;  %17129 = vmatmul.mubr.msk.f32.vlgmr.msra.gmra.mrb[0].mxu0 %vm104_vm1, %v17128_v15  ;;  %v97_v25 = vsel %vm94_vm0, %v87_v18, %v89_v17 }
  0x7e   :  { %2896 = vrot.lane.b32.xlu1 %v18443_v1, %s20941_s23  ;;  %2589 = vrot.lane.b32.xlu0 %v18482_v7, %s18342_s20 }
  0x7f   :  { %179 = vmatprep.subr.mxu1 %v98_v19  ;;  %314 = vmatprep.mubr.f32.mxu0 %v18333_v2 }
  0x80   :  { %180 = vmatpush1.msra.mxu1 %v99_v20  ;;  %v56_v21 = vpop.permute.xlu1 %55  ;;  %v91_v22 = vpop.permute.xlu0 %90 }
  0x81   :  { %17657 = vmatprep.subr.mxu1 %v18333_v2  ;;  %17130 = vmatmul.mubr.msk.f32.vlgmr.msra.gmra.mrb[0].mxu1 %vm104_vm1, %v17128_v15  ;;  %v96_v23 = vsel %vm94_vm0, %v89_v17, %v91_v22  ;;  %v95_v24 = vsel %vm94_vm0, %v91_v22, %v93_v9  ;;  %v17147_v22 = vld [vmem:[%s20909_s2 + $0x20] sm:$0xff] }
  0x82   :  { %2908 = vrot.lane.b32.xlu1 %v18438_v0, %s20941_s23  ;;  %2898 = vrot.lane.b32.xlu0 %v18459_v4, %s20941_s23 }
  0x83   :  { %250 = vmatprep.subr.mxu0 %v96_v23  ;;  %17658 = vmatpush3.msra.mxu1 %v95_v24 }
  0x84   :  { %251 = vmatpush1.msra.mxu0 %v97_v25  ;;  %v68_v26 = vpop.permute.xlu1 %67  ;;  %v58_v27 = vpop.permute.xlu0 %57  ;;  %17659 = vmatprep.mubr.msk.f32.mxu1 %vm18344_vm3, %v18333_v2 }
  0x85   :  { %v77_v28 = vsel %vm71_vm2, %v56_v21, %v58_v27  ;;  %17131 = vmatmul.mubr.msk.f32.vlgmr.msra.gmra.mrb[2].mxu0 %vm104_vm1, %v17128_v15  ;;  %v78_v29 = vsel %vm71_vm2, %v68_v26, %v56_v21  ;;  %17660 = vmatmul.mubr.msk.f32.vlgmr.msra.gmra.mrb[2].mxu1 %vm104_vm1, %v17128_v15 }
  0x86   :  { %2902 = vrot.lane.b32.xlu1 %v18473_v6, %s20941_s23  ;;  %2900 = vrot.lane.b32.xlu0 %v18454_v3, %s20941_s23 }
  0x87   :  { %394 = vmatprep.subr.mxu0 %v77_v28  ;;  %529 = vmatprep.mubr.f32.mxu1 %v18333_v2 }
  0x88   :  { %395 = vmatpush1.msra.mxu0 %v78_v29  ;;  %v62_v31 = vpop.permute.xlu1 %61  ;;  %v60_v32 = vpop.permute.xlu0 %59  ;;  %458 = vmatprep.mubr.f32.mxu0 %v18333_v2 }
  0x89   :  { %v75_v33 = vsel %vm71_vm2, %v60_v32, %v62_v31  ;;  %v76_v34 = vsel %vm71_vm2, %v58_v27, %v60_v32  ;;  %17133 = vmatmul.mubr.msk.f32.vlgmr.msra.gmra.mrb[0].mxu0 %vm104_vm1, %v79_v30 }
  0x8a   :  { %2906 = vrot.lane.b32.xlu1 %v18482_v7, %s20941_s23  ;;  %2904 = vrot.lane.b32.xlu0 %v18468_v5, %s20941_s23  ;;  %s18356_s23 = smov 88  }
  0x8b   :  { %465 = vmatprep.subr.mxu1 %v75_v33  ;;  %600 = vmatprep.mubr.f32.mxu0 %v18333_v2 }
  0x8c   :  { %466 = vmatpush1.msra.mxu1 %v76_v34  ;;  %v66_v35 = vpop.permute.xlu1 %65  ;;  %v64_v36 = vpop.permute.xlu0 %63 }
  0x8d   :  { %17662 = vmatprep.subr.mxu1 %v18333_v2  ;;  %17134 = vmatmul.mubr.msk.f32.vlgmr.msra.gmra.mrb[0].mxu1 %vm104_vm1, %v79_v30  ;;  %v73_v37 = vsel %vm71_vm2, %v64_v36, %v66_v35  ;;  %v72_v38 = vsel %vm71_vm2, %v66_v35, %v68_v26  ;;  %v74_v39 = vsel %vm71_vm2, %v62_v31, %v64_v36  ;;  %v17152_v36 = vld [vmem:[%s20909_s2 + $0x28] sm:$0xff] }
  0x8e   :  { %3215 = vrot.lane.b32.xlu1 %v18459_v4, %s20939_s26  ;;  %3213 = vrot.lane.b32.xlu0 %v18443_v1, %s20939_s26 }
  0x8f   :  { %536 = vmatprep.subr.mxu0 %v73_v37  ;;  %17663 = vmatpush3.msra.mxu1 %v72_v38 }
  0x90   :  { %537 = vmatpush1.msra.mxu0 %v74_v39  ;;  %v680_v40 = vpop.permute.xlu1 %679  ;;  %v678_v41 = vpop.permute.xlu0 %677  ;;  %17664 = vmatprep.mubr.msk.f32.mxu1 %vm18344_vm3, %v18333_v2 }
  0x91   :  { %v697_v42 = vsel %vm691_vm4, %v678_v41, %v680_v40  ;;  %17135 = vmatmul.mubr.msk.f32.vlgmr.msra.gmra.mrb[2].mxu0 %vm104_vm1, %v79_v30  ;;  %17665 = vmatmul.mubr.msk.f32.vlgmr.msra.gmra.mrb[4].mxu1 %vm104_vm1, %v79_v30 }
  0x92   :  { %3217 = vrot.lane.b32.xlu1 %v18454_v3, %s20939_s26  ;;  %3225 = vrot.lane.b32.xlu0 %v18438_v0, %s20939_s26 }
  0x93   :  { %704 = vmatprep.subr.mxu0 %v697_v42  ;;  %839 = vmatprep.mubr.f32.mxu1 %v18333_v2 }
  0x94   :  { %v682_v43 = vpop.permute.xlu1 %681  ;;  %v690_v44 = vpop.permute.xlu0 %689  ;;  %768 = vmatprep.mubr.f32.mxu0 %v18333_v2 }
  0x95   :  { %v698_v45 = vsel %vm691_vm4, %v690_v44, %v678_v41  ;;  %v696_v50 = vsel %vm691_vm4, %v680_v40, %v682_v43 }
  0x96   :  { %3221 = vrot.lane.b32.xlu1 %v18468_v5, %s20939_s26  ;;  %3219 = vrot.lane.b32.xlu0 %v18473_v6, %s20939_s26 }
  0x97   :  { %705 = vmatpush1.msra.mxu0 %v698_v45 }
  0x98   :  { %v686_v47 = vpop.permute.xlu1 %685  ;;  %v684_v48 = vpop.permute.xlu0 %683  ;;  %17138 = vmatmul.mubr.msk.f32.vlgmr.msra.gmra.mrb[0].mxu0 %vm104_vm1, %v17137_v46 }
  0x99   :  { %v695_v49 = vsel %vm691_vm4, %v682_v43, %v684_v48  ;;  %910 = vmatprep.mubr.f32.mxu0 %v18333_v2  ;;  %v694_v55 = vsel %vm691_vm4, %v684_v48, %v686_v47 }
  0x9a   :  { %3530 = vrot.lane.b32.xlu1 %v18443_v1, %s20937_s22  ;;  %3223 = vrot.lane.b32.xlu0 %v18482_v7, %s20939_s26  ;;  %s20952_s26 = smov 87  }
  0x9b   :  { %775 = vmatprep.subr.mxu1 %v695_v49 }
  0x9c   :  { %776 = vmatpush1.msra.mxu1 %v696_v50  ;;  %v995_v51 = vpop.permute.xlu1 %994  ;;  %v688_v52 = vpop.permute.xlu0 %687 }
  0x9d   :  { %17667 = vmatprep.subr.mxu1 %v18333_v2  ;;  %17139 = vmatmul.mubr.msk.f32.vlgmr.msra.gmra.mrb[0].mxu1 %vm104_vm1, %v17137_v46  ;;  %v693_v53 = vsel %vm691_vm4, %v686_v47, %v688_v52  ;;  %v692_v54 = vsel %vm691_vm4, %v688_v52, %v690_v44  ;;  %v17157_v52 = vld [vmem:[%s20909_s2 + $0x30] sm:$0xff] }
  0x9e   :  { %3542 = vrot.lane.b32.xlu1 %v18438_v0, %s20937_s22  ;;  %3532 = vrot.lane.b32.xlu0 %v18459_v4, %s20937_s22 }
  0x9f   :  { %846 = vmatprep.subr.mxu0 %v693_v53  ;;  %17668 = vmatpush3.msra.mxu1 %v692_v54 }
  0xa0   :  { %847 = vmatpush1.msra.mxu0 %v694_v55  ;;  %v1007_v56 = vpop.permute.xlu1 %1006  ;;  %v997_v57 = vpop.permute.xlu0 %996  ;;  %17669 = vmatprep.mubr.msk.f32.mxu1 %vm18344_vm3, %v18333_v2 }
  0xa1   :  { %v1014_v58 = vsel %vm1008_vm5, %v995_v51, %v997_v57  ;;  %17140 = vmatmul.mubr.msk.f32.vlgmr.msra.gmra.mrb[2].mxu0 %vm104_vm1, %v17137_v46  ;;  %v1015_v59 = vsel %vm1008_vm5, %v1007_v56, %v995_v51  ;;  %17670 = vmatmul.mubr.msk.f32.vlgmr.msra.gmra.mrb[6].mxu1 %vm104_vm1, %v17137_v46 }
  0xa2   :  { %3536 = vrot.lane.b32.xlu1 %v18473_v6, %s20937_s22  ;;  %3534 = vrot.lane.b32.xlu0 %v18454_v3, %s20937_s22 }
  0xa3   :  { %1021 = vmatprep.subr.mxu0 %v1014_v58  ;;  %1156 = vmatprep.mubr.f32.mxu1 %v18333_v2 }
  0xa4   :  { %1022 = vmatpush1.msra.mxu0 %v1015_v59  ;;  %v1001_v61 = vpop.permute.xlu1 %1000  ;;  %v999_v62 = vpop.permute.xlu0 %998  ;;  %1085 = vmatprep.mubr.f32.mxu0 %v18333_v2 }
  0xa5   :  { %v1012_v63 = vsel %vm1008_vm5, %v999_v62, %v1001_v61  ;;  %v1013_v9 = vsel %vm1008_vm5, %v997_v57, %v999_v62  ;;  %17143 = vmatmul.mubr.msk.f32.vlgmr.msra.gmra.mrb[0].mxu0 %vm104_vm1, %v17142_v60 }
  0xa6   :  { %3540 = vrot.lane.b32.xlu1 %v18482_v7, %s20937_s22  ;;  %3538 = vrot.lane.b32.xlu0 %v18468_v5, %s20937_s22  ;;  %s18355_s22 = smov 89  }
  0xa7   :  { %1092 = vmatprep.subr.mxu1 %v1012_v63  ;;  %1227 = vmatprep.mubr.f32.mxu0 %v18333_v2 }
  0xa8   :  { %1093 = vmatpush1.msra.mxu1 %v1013_v9  ;;  %v1005_v10 = vpop.permute.xlu1 %1004  ;;  %v1003_v12 = vpop.permute.xlu0 %1002 }
  0xa9   :  { %17672 = vmatprep.subr.mxu1 %v18333_v2  ;;  %17144 = vmatmul.mubr.msk.f32.vlgmr.msra.gmra.mrb[0].mxu1 %vm104_vm1, %v17142_v60  ;;  %v1010_v13 = vsel %vm1008_vm5, %v1003_v12, %v1005_v10  ;;  %v1009_v14 = vsel %vm1008_vm5, %v1005_v10, %v1007_v56  ;;  %v1011_v15 = vsel %vm1008_vm5, %v1001_v61, %v1003_v12  ;;  %v17162_v12 = vld [vmem:[%s20909_s2 + $0x38] sm:$0xff] }
  0xaa   :  { %4146 = vrot.lane.b32.xlu1 %v18454_v3, %s20925_s27  ;;  %4144 = vrot.lane.b32.xlu0 %v18459_v4, %s20925_s27 }
  0xab   :  { %1163 = vmatprep.subr.mxu0 %v1010_v13  ;;  %17673 = vmatpush3.msra.mxu1 %v1009_v14 }
  0xac   :  { %1164 = vmatpush1.msra.mxu0 %v1011_v15  ;;  %v1314_v16 = vpop.permute.xlu1 %1313  ;;  %v1312_v17 = vpop.permute.xlu0 %1311  ;;  %17674 = vmatprep.mubr.msk.f32.mxu1 %vm18344_vm3, %v18333_v2 }
  0xad   :  { %v1331_v18 = vsel %vm1325_vm6, %v1312_v17, %v1314_v16  ;;  %17145 = vmatmul.mubr.msk.f32.vlgmr.msra.gmra.mrb[2].mxu0 %vm104_vm1, %v17142_v60  ;;  %17675 = vmatmul.mubr.msk.f32.vlgmr.msra.gmra.mrb[8].mxu1 %vm104_vm1, %v17142_v60 }
  0xae   :  { %4148 = vrot.lane.b32.xlu1 %v18473_v6, %s20925_s27  ;;  %4142 = vrot.lane.b32.xlu0 %v18443_v1, %s20925_s27 }
  0xaf   :  { %1338 = vmatprep.subr.mxu0 %v1331_v18  ;;  %1473 = vmatprep.mubr.f32.mxu1 %v18333_v2 }
  0xb0   :  { %v1316_v19 = vpop.permute.xlu1 %1315  ;;  %v1324_v20 = vpop.permute.xlu0 %1323  ;;  %1402 = vmatprep.mubr.f32.mxu0 %v18333_v2 }
  0xb1   :  { %v1332_v21 = vsel %vm1325_vm6, %v1324_v20, %v1312_v17  ;;  %v1330_v26 = vsel %vm1325_vm6, %v1314_v16, %v1316_v19 }
  0xb2   :  { %4152 = vrot.lane.b32.xlu1 %v18482_v7, %s20925_s27  ;;  %4150 = vrot.lane.b32.xlu0 %v18468_v5, %s20925_s27 }
  0xb3   :  { %1339 = vmatpush1.msra.mxu0 %v1332_v21 }
  0xb4   :  { %v1320_v23 = vpop.permute.xlu1 %1319  ;;  %v1318_v24 = vpop.permute.xlu0 %1317  ;;  %17148 = vmatmul.mubr.msk.f32.vlgmr.msra.gmra.mrb[0].mxu0 %vm104_vm1, %v17147_v22 }
  0xb5   :  { %v1329_v25 = vsel %vm1325_vm6, %v1316_v19, %v1318_v24  ;;  %1544 = vmatprep.mubr.f32.mxu0 %v18333_v2  ;;  %v1328_v31 = vsel %vm1325_vm6, %v1318_v24, %v1320_v23 }
  0xb6   :  { %4461 = vrot.lane.b32.xlu1 %v18459_v4, %s20923_s25  ;;  %4154 = vrot.lane.b32.xlu0 %v18438_v0, %s20925_s27  ;;  %s20927_s27 = smov 109  }
  0xb7   :  { %1409 = vmatprep.subr.mxu1 %v1329_v25 }
  0xb8   :  { %1410 = vmatpush1.msra.mxu1 %v1330_v26  ;;  %v1629_v27 = vpop.permute.xlu1 %1628  ;;  %v1322_v28 = vpop.permute.xlu0 %1321 }
  0xb9   :  { %17677 = vmatprep.subr.mxu1 %v18333_v2  ;;  %17149 = vmatmul.mubr.msk.f32.vlgmr.msra.gmra.mrb[0].mxu1 %vm104_vm1, %v17147_v22  ;;  %v1327_v29 = vsel %vm1325_vm6, %v1320_v23, %v1322_v28  ;;  %v1326_v30 = vsel %vm1325_vm6, %v1322_v28, %v1324_v20  ;;  %v17167_v28 = vld [vmem:[%s20909_s2 + $0x40] sm:$0xff] }
  0xba   :  { %4459 = vrot.lane.b32.xlu1 %v18443_v1, %s20923_s25  ;;  %4463 = vrot.lane.b32.xlu0 %v18454_v3, %s20923_s25 }
  0xbb   :  { %1480 = vmatprep.subr.mxu0 %v1327_v29  ;;  %17678 = vmatpush3.msra.mxu1 %v1326_v30 }
  0xbc   :  { %1481 = vmatpush1.msra.mxu0 %v1328_v31  ;;  %v1641_v32 = vpop.permute.xlu1 %1640  ;;  %v1631_v33 = vpop.permute.xlu0 %1630  ;;  %17679 = vmatprep.mubr.msk.f32.mxu1 %vm18344_vm3, %v18333_v2 }
  0xbd   :  { %v1648_v34 = vsel %vm1642_vm7, %v1629_v27, %v1631_v33  ;;  %17150 = vmatmul.mubr.msk.f32.vlgmr.msra.gmra.mrb[2].mxu0 %vm104_vm1, %v17147_v22  ;;  %v1649_v35 = vsel %vm1642_vm7, %v1641_v32, %v1629_v27  ;;  %17680 = vmatmul.mubr.msk.f32.vlgmr.msra.gmra.mrb[10].mxu1 %vm104_vm1, %v17147_v22 }
  0xbe   :  { %4467 = vrot.lane.b32.xlu1 %v18468_v5, %s20923_s25  ;;  %4465 = vrot.lane.b32.xlu0 %v18473_v6, %s20923_s25 }
  0xbf   :  { %1655 = vmatprep.subr.mxu0 %v1648_v34  ;;  %1790 = vmatprep.mubr.f32.mxu1 %v18333_v2 }
  0xc0   :  { %1656 = vmatpush1.msra.mxu0 %v1649_v35  ;;  %v1635_v37 = vpop.permute.xlu1 %1634  ;;  %v1633_v38 = vpop.permute.xlu0 %1632  ;;  %1719 = vmatprep.mubr.f32.mxu0 %v18333_v2 }
  0xc1   :  { %v1646_v39 = vsel %vm1642_vm7, %v1633_v38, %v1635_v37  ;;  %v1647_v40 = vsel %vm1642_vm7, %v1631_v33, %v1633_v38  ;;  %17153 = vmatmul.mubr.msk.f32.vlgmr.msra.gmra.mrb[0].mxu0 %vm104_vm1, %v17152_v36 }
  0xc2   :  { %4471 = vrot.lane.b32.xlu1 %v18438_v0, %s20923_s25  ;;  %4469 = vrot.lane.b32.xlu0 %v18482_v7, %s20923_s25  ;;  %s20933_s25 = smov 108  }
  0xc3   :  { %1726 = vmatprep.subr.mxu1 %v1646_v39  ;;  %1861 = vmatprep.mubr.f32.mxu0 %v18333_v2 }
  0xc4   :  { %1727 = vmatpush1.msra.mxu1 %v1647_v40  ;;  %v1639_v41 = vpop.permute.xlu1 %1638  ;;  %v1637_v42 = vpop.permute.xlu0 %1636 }
  0xc5   :  { %17682 = vmatprep.subr.mxu1 %v18333_v2  ;;  %17154 = vmatmul.mubr.msk.f32.vlgmr.msra.gmra.mrb[0].mxu1 %vm104_vm1, %v17152_v36  ;;  %v1644_v43 = vsel %vm1642_vm7, %v1637_v42, %v1639_v41  ;;  %v1643_v44 = vsel %vm1642_vm7, %v1639_v41, %v1641_v32  ;;  %v1645_v45 = vsel %vm1642_vm7, %v1635_v37, %v1637_v42  ;;  %v17172_v42 = vld [vmem:[%s20909_s2 + $0x48] sm:$0xff] }
  0xc6   :  { %4780 = vrot.lane.b32.xlu1 %v18454_v3, %s20929_s21  ;;  %4778 = vrot.lane.b32.xlu0 %v18459_v4, %s20929_s21 }
  0xc7   :  { %1797 = vmatprep.subr.mxu0 %v1644_v43  ;;  %17683 = vmatpush3.msra.mxu1 %v1643_v44 }
  0xc8   :  { %1798 = vmatpush1.msra.mxu0 %v1645_v45  ;;  %v1948_v46 = vpop.permute.xlu1 %1947  ;;  %v1946_v47 = vpop.permute.xlu0 %1945  ;;  %17684 = vmatprep.mubr.msk.f32.mxu1 %vm18344_vm3, %v18333_v2 }
  0xc9   :  { %v1965_v48 = vsel %vm1959_vm8, %v1946_v47, %v1948_v46  ;;  %17155 = vmatmul.mubr.msk.f32.vlgmr.msra.gmra.mrb[2].mxu0 %vm104_vm1, %v17152_v36  ;;  %17685 = vmatmul.mubr.msk.f32.vlgmr.msra.gmra.mrb[12].mxu1 %vm104_vm1, %v17152_v36 }
  0xca   :  { %4782 = vrot.lane.b32.xlu1 %v18473_v6, %s20929_s21  ;;  %4776 = vrot.lane.b32.xlu0 %v18443_v1, %s20929_s21 }
  0xcb   :  { %1972 = vmatprep.subr.mxu0 %v1965_v48  ;;  %2107 = vmatprep.mubr.f32.mxu1 %v18333_v2 }
  0xcc   :  { %v1950_v49 = vpop.permute.xlu1 %1949  ;;  %v1958_v50 = vpop.permute.xlu0 %1957  ;;  %2036 = vmatprep.mubr.f32.mxu0 %v18333_v2 }
  0xcd   :  { %v1966_v51 = vsel %vm1959_vm8, %v1958_v50, %v1946_v47  ;;  %v1964_v56 = vsel %vm1959_vm8, %v1948_v46, %v1950_v49 }
  0xce   :  { %4786 = vrot.lane.b32.xlu1 %v18482_v7, %s20929_s21  ;;  %4784 = vrot.lane.b32.xlu0 %v18468_v5, %s20929_s21 }
  0xcf   :  { %1973 = vmatpush1.msra.mxu0 %v1966_v51 }
  0xd0   :  { %v1954_v53 = vpop.permute.xlu1 %1953  ;;  %v1952_v54 = vpop.permute.xlu0 %1951  ;;  %17158 = vmatmul.mubr.msk.f32.vlgmr.msra.gmra.mrb[0].mxu0 %vm104_vm1, %v17157_v52 }
  0xd1   :  { %v1963_v55 = vsel %vm1959_vm8, %v1950_v49, %v1952_v54  ;;  %2178 = vmatprep.mubr.f32.mxu0 %v18333_v2  ;;  %v1962_v61 = vsel %vm1959_vm8, %v1952_v54, %v1954_v53 }
  0xd2   :  { %5095 = vrot.lane.b32.xlu1 %v18459_v4, %s20927_s27  ;;  %4788 = vrot.lane.b32.xlu0 %v18438_v0, %s20929_s21  ;;  %s20931_s21 = smov 107  }
  0xd3   :  { %2043 = vmatprep.subr.mxu1 %v1963_v55 }
  0xd4   :  { %2044 = vmatpush1.msra.mxu1 %v1964_v56  ;;  %v2263_v57 = vpop.permute.xlu1 %2262  ;;  %v1956_v58 = vpop.permute.xlu0 %1955 }
  0xd5   :  { %17687 = vmatprep.subr.mxu1 %v18333_v2  ;;  %17159 = vmatmul.mubr.msk.f32.vlgmr.msra.gmra.mrb[0].mxu1 %vm104_vm1, %v17157_v52  ;;  %v1961_v59 = vsel %vm1959_vm8, %v1954_v53, %v1956_v58  ;;  %v1960_v60 = vsel %vm1959_vm8, %v1956_v58, %v1958_v50  ;;  %v17177_v58 = vld [vmem:[%s20909_s2 + $0x50] sm:$0xff] }
  0xd6   :  { %5093 = vrot.lane.b32.xlu1 %v18443_v1, %s20927_s27  ;;  %5097 = vrot.lane.b32.xlu0 %v18454_v3, %s20927_s27 }
  0xd7   :  { %2114 = vmatprep.subr.mxu0 %v1961_v59  ;;  %17688 = vmatpush3.msra.mxu1 %v1960_v60 }
  0xd8   :  { %2115 = vmatpush1.msra.mxu0 %v1962_v61  ;;  %v2275_v62 = vpop.permute.xlu1 %2274  ;;  %v2265_v63 = vpop.permute.xlu0 %2264  ;;  %17689 = vmatprep.mubr.msk.f32.mxu1 %vm18344_vm3, %v18333_v2 }
  0xd9   :  { %v2282_v9 = vsel %vm2276_vm9, %v2263_v57, %v2265_v63  ;;  %17160 = vmatmul.mubr.msk.f32.vlgmr.msra.gmra.mrb[2].mxu0 %vm104_vm1, %v17157_v52  ;;  %v2283_v10 = vsel %vm2276_vm9, %v2275_v62, %v2263_v57  ;;  %17690 = vmatmul.mubr.msk.f32.vlgmr.msra.gmra.mrb[14].mxu1 %vm104_vm1, %v17157_v52 }
  0xda   :  { %5101 = vrot.lane.b32.xlu1 %v18468_v5, %s20927_s27  ;;  %5099 = vrot.lane.b32.xlu0 %v18473_v6, %s20927_s27 }
  0xdb   :  { %2289 = vmatprep.subr.mxu0 %v2282_v9  ;;  %2424 = vmatprep.mubr.f32.mxu1 %v18333_v2 }
  0xdc   :  { %2290 = vmatpush1.msra.mxu0 %v2283_v10  ;;  %v2269_v13 = vpop.permute.xlu1 %2268  ;;  %v2267_v14 = vpop.permute.xlu0 %2266  ;;  %2353 = vmatprep.mubr.f32.mxu0 %v18333_v2 }
  0xdd   :  { %v2280_v15 = vsel %vm2276_vm9, %v2267_v14, %v2269_v13  ;;  %v2281_v16 = vsel %vm2276_vm9, %v2265_v63, %v2267_v14  ;;  %17163 = vmatmul.mubr.msk.f32.vlgmr.msra.gmra.mrb[0].mxu0 %vm104_vm1, %v17162_v12 }
  0xde   :  { %5105 = vrot.lane.b32.xlu1 %v18438_v0, %s20927_s27  ;;  %5103 = vrot.lane.b32.xlu0 %v18482_v7, %s20927_s27  ;;  %s20935_s27 = smov 106  }
  0xdf   :  { %2360 = vmatprep.subr.mxu1 %v2280_v15  ;;  %2495 = vmatprep.mubr.f32.mxu0 %v18333_v2 }
  0xe0   :  { %2361 = vmatpush1.msra.mxu1 %v2281_v16  ;;  %v2273_v17 = vpop.permute.xlu1 %2272  ;;  %v2271_v18 = vpop.permute.xlu0 %2270 }
  0xe1   :  { %17692 = vmatprep.subr.mxu1 %v18333_v2  ;;  %17164 = vmatmul.mubr.msk.f32.vlgmr.msra.gmra.mrb[0].mxu1 %vm104_vm1, %v17162_v12  ;;  %v2278_v19 = vsel %vm2276_vm9, %v2271_v18, %v2273_v17  ;;  %v2277_v20 = vsel %vm2276_vm9, %v2273_v17, %v2275_v62  ;;  %v2279_v21 = vsel %vm2276_vm9, %v2269_v13, %v2271_v18  ;;  %v17182_v13 = vld [vmem:[%s20909_s2 + $0x58] sm:$0xff]  ;;  %v19085_v18 = vld [vmem:[%s20908_s0 + $0x30] sm:$0xff] }
  0xe2   :  { %5414 = vrot.lane.b32.xlu1 %v18454_v3, %s20933_s25  ;;  %5412 = vrot.lane.b32.xlu0 %v18459_v4, %s20933_s25 }
  0xe3   :  { %2431 = vmatprep.subr.mxu0 %v2278_v19  ;;  %17693 = vmatpush3.msra.mxu1 %v2277_v20  ;;  %v19092_v19 = vld [vmem:[%s20908_s0 + $0x28] sm:$0xff] }
  0xe4   :  { %2432 = vmatpush1.msra.mxu0 %v2279_v21  ;;  %v2582_v22 = vpop.permute.xlu1 %2581  ;;  %v2580_v23 = vpop.permute.xlu0 %2579  ;;  %17694 = vmatprep.mubr.msk.f32.mxu1 %vm18344_vm3, %v18333_v2 }
  0xe5   :  { %v2599_v24 = vsel %vm2593_vm10, %v2580_v23, %v2582_v22  ;;  %17165 = vmatmul.mubr.msk.f32.vlgmr.msra.gmra.mrb[2].mxu0 %vm104_vm1, %v17162_v12  ;;  %17695 = vmatmul.mubr.msk.f32.vlgmr.msra.gmra.mrb[16].mxu1 %vm104_vm1, %v17162_v12  ;;  %v19068_v12 = vld [vmem:[%s20908_s0 + $0x18] sm:$0xff] }
  0xe6   :  { %5416 = vrot.lane.b32.xlu1 %v18473_v6, %s20933_s25  ;;  %5410 = vrot.lane.b32.xlu0 %v18443_v1, %s20933_s25 }
  0xe7   :  { %2606 = vmatprep.subr.mxu0 %v2599_v24  ;;  %2741 = vmatprep.mubr.f32.mxu1 %v18333_v2 }
  0xe8   :  { %v2584_v25 = vpop.permute.xlu1 %2583  ;;  %v2592_v26 = vpop.permute.xlu0 %2591  ;;  %2670 = vmatprep.mubr.f32.mxu0 %v18333_v2 }
  0xe9   :  { %v2600_v27 = vsel %vm2593_vm10, %v2592_v26, %v2580_v23  ;;  %v2598_v32 = vsel %vm2593_vm10, %v2582_v22, %v2584_v25 }
  0xea   :  { %5420 = vrot.lane.b32.xlu1 %v18482_v7, %s20933_s25  ;;  %5418 = vrot.lane.b32.xlu0 %v18468_v5, %s20933_s25 }
  0xeb   :  { %2607 = vmatpush1.msra.mxu0 %v2600_v27 }
  0xec   :  { %v2588_v29 = vpop.permute.xlu1 %2587  ;;  %v2586_v30 = vpop.permute.xlu0 %2585  ;;  %17168 = vmatmul.mubr.msk.f32.vlgmr.msra.gmra.mrb[0].mxu0 %vm104_vm1, %v17167_v28 }
  0xed   :  { %v2597_v31 = vsel %vm2593_vm10, %v2584_v25, %v2586_v30  ;;  %2812 = vmatprep.mubr.f32.mxu0 %v18333_v2  ;;  %v2596_v37 = vsel %vm2593_vm10, %v2586_v30, %v2588_v29  ;;  %v19108_v25 = vld [vmem:[%s20908_s0 + $0x10] sm:$0xff]  ;;  %v17187_v30 = vld [vmem:[%s20909_s2 + $0x60] sm:$0xff] }
  0xee   :  { %5729 = vrot.lane.b32.xlu1 %v18459_v4, %s20931_s21  ;;  %5422 = vrot.lane.b32.xlu0 %v18438_v0, %s20933_s25  ;;  %s18354_s25 = smov 90  }
  0xef   :  { %2677 = vmatprep.subr.mxu1 %v2597_v31 }
  0xf0   :  { %2678 = vmatpush1.msra.mxu1 %v2598_v32  ;;  %v2897_v33 = vpop.permute.xlu1 %2896  ;;  %v2590_v34 = vpop.permute.xlu0 %2589 }
  0xf1   :  { %17697 = vmatprep.subr.mxu1 %v18333_v2  ;;  %17169 = vmatmul.mubr.msk.f32.vlgmr.msra.gmra.mrb[0].mxu1 %vm104_vm1, %v17167_v28  ;;  %v2595_v35 = vsel %vm2593_vm10, %v2588_v29, %v2590_v34  ;;  %v2594_v36 = vsel %vm2593_vm10, %v2590_v34, %v2592_v26  ;;  %v19115_v26 = vld [vmem:[%s20908_s0 + $0x8] sm:$0xff]  ;;  %v19129_v29 = vld [vmem:[%s20908_s0] sm:$0xff] }
  0xf2   :  { %5727 = vrot.lane.b32.xlu1 %v18443_v1, %s20931_s21  ;;  %5731 = vrot.lane.b32.xlu0 %v18454_v3, %s20931_s21 }
  0xf3   :  { %2748 = vmatprep.subr.mxu0 %v2595_v35  ;;  %17698 = vmatpush3.msra.mxu1 %v2594_v36 }
  0xf4   :  { %2749 = vmatpush1.msra.mxu0 %v2596_v37  ;;  %v2909_v38 = vpop.permute.xlu1 %2908  ;;  %v2899_v39 = vpop.permute.xlu0 %2898  ;;  %17699 = vmatprep.mubr.msk.f32.mxu1 %vm18344_vm3, %v18333_v2 }
  0xf5   :  { %v2916_v40 = vsel %vm2910_vm11, %v2897_v33, %v2899_v39  ;;  %17170 = vmatmul.mubr.msk.f32.vlgmr.msra.gmra.mrb[2].mxu0 %vm104_vm1, %v17167_v28  ;;  %v2917_v41 = vsel %vm2910_vm11, %v2909_v38, %v2897_v33  ;;  %17700 = vmatmul.mubr.msk.f32.vlgmr.msra.gmra.mrb[18].mxu1 %vm104_vm1, %v17167_v28 }
  0xf6   :  { %5735 = vrot.lane.b32.xlu1 %v18468_v5, %s20931_s21  ;;  %5733 = vrot.lane.b32.xlu0 %v18473_v6, %s20931_s21 }
  0xf7   :  { %2923 = vmatprep.subr.mxu0 %v2916_v40  ;;  %3058 = vmatprep.mubr.f32.mxu1 %v18333_v2  ;;  %v17192_v40 = vld [vmem:[%s20909_s2 + $0x68] sm:$0xff] }
  0xf8   :  { %2924 = vmatpush1.msra.mxu0 %v2917_v41  ;;  %v2903_v43 = vpop.permute.xlu1 %2902  ;;  %v2901_v44 = vpop.permute.xlu0 %2900  ;;  %2987 = vmatprep.mubr.f32.mxu0 %v18333_v2 }
  0xf9   :  { %v2914_v45 = vsel %vm2910_vm11, %v2901_v44, %v2903_v43  ;;  %v2915_v46 = vsel %vm2910_vm11, %v2899_v39, %v2901_v44  ;;  %17173 = vmatmul.mubr.msk.f32.vlgmr.msra.gmra.mrb[0].mxu0 %vm104_vm1, %v17172_v42 }
  0xfa   :  { %5739 = vrot.lane.b32.xlu1 %v18438_v0, %s20931_s21  ;;  %5737 = vrot.lane.b32.xlu0 %v18482_v7, %s20931_s21 }
  0xfb   :  { %2994 = vmatprep.subr.mxu1 %v2914_v45  ;;  %3129 = vmatprep.mubr.f32.mxu0 %v18333_v2 }
  0xfc   :  { %2995 = vmatpush1.msra.mxu1 %v2915_v46  ;;  %v2907_v47 = vpop.permute.xlu1 %2906  ;;  %v2905_v48 = vpop.permute.xlu0 %2904 }
  0xfd   :  { %17702 = vmatprep.subr.mxu1 %v18333_v2  ;;  %17174 = vmatmul.mubr.msk.f32.vlgmr.msra.gmra.mrb[0].mxu1 %vm104_vm1, %v17172_v42  ;;  %v2912_v49 = vsel %vm2910_vm11, %v2905_v48, %v2907_v47  ;;  %v2911_v50 = vsel %vm2910_vm11, %v2907_v47, %v2909_v38  ;;  %v2913_v51 = vsel %vm2910_vm11, %v2903_v43, %v2905_v48 }
  0xfe   :  { %6048 = vrot.lane.b32.xlu1 %v18454_v3, %s20935_s27  ;;  %6046 = vrot.lane.b32.xlu0 %v18459_v4, %s20935_s27 }
  0xff   :  { %3065 = vmatprep.subr.mxu0 %v2912_v49  ;;  %17703 = vmatpush3.msra.mxu1 %v2911_v50 }
 0x100   :  { %3066 = vmatpush1.msra.mxu0 %v2913_v51  ;;  %v3216_v52 = vpop.permute.xlu1 %3215  ;;  %v3214_v53 = vpop.permute.xlu0 %3213  ;;  %17704 = vmatprep.mubr.msk.f32.mxu1 %vm18344_vm3, %v18333_v2 }
 0x101   :  { %v3233_v54 = vsel %vm3227_vm12, %v3214_v53, %v3216_v52  ;;  %17175 = vmatmul.mubr.msk.f32.vlgmr.msra.gmra.mrb[2].mxu0 %vm104_vm1, %v17172_v42  ;;  %17705 = vmatmul.mubr.msk.f32.vlgmr.msra.gmra.mrb[20].mxu1 %vm104_vm1, %v17172_v42 }
 0x102   :  { %6050 = vrot.lane.b32.xlu1 %v18473_v6, %s20935_s27  ;;  %6044 = vrot.lane.b32.xlu0 %v18443_v1, %s20935_s27 }
 0x103   :  { %3240 = vmatprep.subr.mxu0 %v3233_v54  ;;  %3375 = vmatprep.mubr.f32.mxu1 %v18333_v2  ;;  %v17197_v54 = vld [vmem:[%s20909_s2 + $0x70] sm:$0xff] }
 0x104   :  { %v3218_v55 = vpop.permute.xlu1 %3217  ;;  %v3226_v56 = vpop.permute.xlu0 %3225  ;;  %3304 = vmatprep.mubr.f32.mxu0 %v18333_v2 }
 0x105   :  { %v3234_v57 = vsel %vm3227_vm12, %v3226_v56, %v3214_v53 }
 0x106   :  { %6054 = vrot.lane.b32.xlu1 %v18482_v7, %s20935_s27  ;;  %6052 = vrot.lane.b32.xlu0 %v18468_v5, %s20935_s27  ;;  %v3232_v5 = vsel %vm3227_vm12, %v3216_v52, %v3218_v55 }
 0x107   :  { %3241 = vmatpush1.msra.mxu0 %v3234_v57 }
 0x108   :  { %v3222_v6 = vpop.permute.xlu1 %3221  ;;  %v3220_v59 = vpop.permute.xlu0 %3219  ;;  %17178 = vmatmul.mubr.msk.f32.vlgmr.msra.gmra.mrb[0].mxu0 %vm104_vm1, %v17177_v58 }
 0x109   :  { %v3231_v60 = vsel %vm3227_vm12, %v3218_v55, %v3220_v59  ;;  %3446 = vmatprep.mubr.f32.mxu0 %v18333_v2 }
 0x10a   :  { %6363 = vrot.lane.b32.xlu1 %v18459_v4, %s18354_s25  ;;  %6056 = vrot.lane.b32.xlu0 %v18438_v0, %s20935_s27  ;;  %v3230_v0 = vsel %vm3227_vm12, %v3220_v59, %v3222_v6  ;;  %s20950_s27 = smov 86  }
 0x10b   :  { %3311 = vmatprep.subr.mxu1 %v3231_v60 }
 0x10c   :  { %3312 = vmatpush1.msra.mxu1 %v3232_v5  ;;  %v3531_v7 = vpop.permute.xlu1 %3530  ;;  %v3224_v61 = vpop.permute.xlu0 %3223 }
 0x10d   :  { %17707 = vmatprep.subr.mxu1 %v18333_v2  ;;  %17179 = vmatmul.mubr.msk.f32.vlgmr.msra.gmra.mrb[0].mxu1 %vm104_vm1, %v17177_v58  ;;  %v3229_v62 = vsel %vm3227_vm12, %v3222_v6, %v3224_v61  ;;  %v3228_v4 = vsel %vm3227_vm12, %v3224_v61, %v3226_v56 }
 0x10e   :  { %6361 = vrot.lane.b32.xlu1 %v18443_v1, %s18354_s25  ;;  %6365 = vrot.lane.b32.xlu0 %v18454_v3, %s18354_s25  ;;  %v19061_v3 = vld [vmem:[%s20908_s0 + $0x20] sm:$0xff] }
 0x10f   :  { %3382 = vmatprep.subr.mxu0 %v3229_v62  ;;  %17708 = vmatpush3.msra.mxu1 %v3228_v4 }
 0x110   :  { %3383 = vmatpush1.msra.mxu0 %v3230_v0  ;;  %v3543_v63 = vpop.permute.xlu1 %3542  ;;  %v3533_v9 = vpop.permute.xlu0 %3532  ;;  %17709 = vmatprep.mubr.msk.f32.mxu1 %vm18344_vm3, %v18333_v2 }
 0x111   :  { %v3550_v10 = vsel %vm3544_vm13, %v3531_v7, %v3533_v9  ;;  %17180 = vmatmul.mubr.msk.f32.vlgmr.msra.gmra.mrb[2].mxu0 %vm104_vm1, %v17177_v58  ;;  %v3551_v1 = vsel %vm3544_vm13, %v3543_v63, %v3531_v7  ;;  %17710 = vmatmul.mubr.msk.f32.vlgmr.msra.gmra.mrb[22].mxu1 %vm104_vm1, %v17177_v58 }
 0x112   :  { %6369 = vrot.lane.b32.xlu1 %v19061_v3, %s18354_s25  ;;  %6367 = vrot.lane.b32.xlu0 %v19068_v12, %s18354_s25 }
 0x113   :  { %3557 = vmatprep.subr.mxu0 %v3550_v10  ;;  %3621 = vmatprep.mubr.f32.mxu0 %v18333_v2 }
 0x114   :  { %3558 = vmatpush1.msra.mxu0 %v3551_v1  ;;  %v3537_v14 = vpop.permute.xlu1 %3536  ;;  %v3535_v15 = vpop.permute.xlu0 %3534  ;;  %3692 = vmatprep.mubr.f32.mxu1 %v18333_v2 }
 0x115   :  { %v3548_v16 = vsel %vm3544_vm13, %v3535_v15, %v3537_v14  ;;  %v3549_v17 = vsel %vm3544_vm13, %v3533_v9, %v3535_v15  ;;  %17183 = vmatmul.mubr.msk.f32.vlgmr.msra.gmra.mrb[0].mxu0 %vm104_vm1, %v17182_v13 }
 0x116   :  { %6373 = vrot.lane.b32.xlu1 %v19085_v18, %s18354_s25  ;;  %6371 = vrot.lane.b32.xlu0 %v19092_v19, %s18354_s25 }
 0x117   :  { %3628 = vmatprep.subr.mxu1 %v3548_v16  ;;  %3763 = vmatprep.mubr.f32.mxu0 %v18333_v2 }
 0x118   :  { %3629 = vmatpush1.msra.mxu1 %v3549_v17  ;;  %v3541_v20 = vpop.permute.xlu1 %3540  ;;  %v3539_v21 = vpop.permute.xlu0 %3538 }
 0x119   :  { %17184 = vmatmul.mubr.msk.f32.vlgmr.msra.gmra.mrb[0].mxu1 %vm104_vm1, %v17182_v13  ;;  %17712 = vmatprep.subr.mxu1 %v18333_v2  ;;  %v3546_v22 = vsel %vm3544_vm13, %v3539_v21, %v3541_v20  ;;  %v3545_v23 = vsel %vm3544_vm13, %v3541_v20, %v3543_v63  ;;  %v3547_v24 = vsel %vm3544_vm13, %v3537_v14, %v3539_v21  ;;  %v17202_v63 = vld [vmem:[%s20909_s2 + $0x78] sm:$0xff] }
 0x11a   :  { %6682 = vrot.lane.b32.xlu1 %v19108_v25, %s18355_s22  ;;  %6680 = vrot.lane.b32.xlu0 %v19115_v26, %s18355_s22 }
 0x11b   :  { %3699 = vmatprep.subr.mxu0 %v3546_v22  ;;  %17713 = vmatpush3.msra.mxu1 %v3545_v23  ;;  %v17207_v22 = vld [vmem:[%s20909_s2 + $0x80] sm:$0xff] }
 0x11c   :  { %3700 = vmatpush1.msra.mxu0 %v3547_v24  ;;  %17714 = vmatprep.mubr.msk.f32.mxu1 %vm18344_vm3, %v18333_v2  ;;  %v4147_v27 = vpop.permute.xlu1 %4146  ;;  %v4145_v28 = vpop.permute.xlu0 %4144 }
 0x11d   :  { %17185 = vmatmul.mubr.msk.f32.vlgmr.msra.gmra.mrb[2].mxu0 %vm104_vm1, %v17182_v13  ;;  %17715 = vmatmul.mubr.msk.f32.vlgmr.msra.gmra.mrb[24].mxu1 %vm104_vm1, %v17182_v13  ;;  %v4161_v33 = vsel %vm20943_vm14, %v4145_v28, %v4147_v27 }
 0x11e   :  { %3852 = vmatprep.subr.mxu0 %v19115_v26  ;;  %6684 = vrot.lane.b32.xlu1 %v19068_v12, %s18355_s22 }
 0x11f   :  { %6678 = vrot.lane.b32.xlu0 %v19129_v29, %s18355_s22  ;;  %3853 = vmatpush1.msra.mxu0 %v19129_v29 }
 0x120   :  { %3923 = vmatprep.subr.mxu1 %v19068_v12  ;;  %3916 = vmatprep.mubr.f32.mxu0 %v18333_v2  ;;  %v4149_v31 = vpop.permute.xlu1 %4148  ;;  %v4143_v32 = vpop.permute.xlu0 %4142 }
 0x121   :  { %3924 = vmatpush1.msra.mxu1 %v19108_v25  ;;  %3987 = vmatprep.mubr.f32.mxu1 %v18333_v2  ;;  %v4162_v36 = vsel %vm20943_vm14, %v4143_v32, %v4145_v28  ;;  %v4160_v41 = vsel %vm20943_vm14, %v4147_v27, %v4149_v31 }
 0x122   :  { %3994 = vmatprep.subr.mxu0 %v19092_v19  ;;  %17188 = vmatmul.mubr.msk.f32.vlgmr.msra.gmra.mrb[0].mxu0 %vm104_vm1, %v17187_v30 }
 0x123   :  { %17189 = vmatmul.mubr.msk.f32.vlgmr.msra.gmra.mrb[0].mxu1 %vm104_vm1, %v17187_v30  ;;  %3995 = vmatpush1.msra.mxu0 %v19061_v3 }
 0x124   :  { %4169 = vmatprep.subr.mxu0 %v4161_v33  ;;  %6688 = vrot.lane.b32.xlu1 %v19092_v19, %s18355_s22  ;;  %v4153_v34 = vpop.permute.xlu1 %4152  ;;  %v4151_v35 = vpop.permute.xlu0 %4150 }
 0x125   :  { %6686 = vrot.lane.b32.xlu0 %v19061_v3, %s18355_s22  ;;  %17717 = vmatprep.subr.mxu1 %v18333_v2  ;;  %v4159_v37 = vsel %vm20943_vm14, %v4149_v31, %v4151_v35  ;;  %v4158_v46 = vsel %vm20943_vm14, %v4151_v35, %v4153_v34  ;;  %v17212_v35 = vld [vmem:[%s20909_s2 + $0x88] sm:$0xff] }
 0x126   :  { %4058 = vmatprep.mubr.f32.mxu0 %v18333_v2  ;;  %17718 = vmatpush3.msra.mxu1 %v19085_v18 }
 0x127   :  { %17719 = vmatprep.mubr.msk.f32.mxu1 %vm18344_vm3, %v18333_v2  ;;  %17190 = vmatmul.mubr.msk.f32.vlgmr.msra.gmra.mrb[2].mxu0 %vm104_vm1, %v17187_v30 }
 0x128   :  { %17720 = vmatmul.mubr.msk.f32.vlgmr.msra.gmra.mrb[26].mxu1 %vm104_vm1, %v17187_v30  ;;  %4170 = vmatpush1.msra.mxu0 %v4162_v36  ;;  %v4462_v38 = vpop.permute.xlu1 %4461  ;;  %v4155_v39 = vpop.permute.xlu0 %4154 }
 0x129   :  { %6997 = vrot.lane.b32.xlu1 %v19115_v26, %s18356_s23  ;;  %6690 = vrot.lane.b32.xlu0 %v19085_v18, %s18355_s22  ;;  %v4157_v42 = vsel %vm20943_vm14, %v4153_v34, %v4155_v39  ;;  %v4163_v43 = vsel %vm20943_vm14, %v4155_v39, %v4143_v32  ;;  %vm20945_vm14 = vcmp.lt.s32.totalorder %v18589_v11, 110 }
 0x12a   :  { %4240 = vmatprep.subr.mxu1 %v4159_v37  ;;  %4304 = vmatprep.mubr.f32.mxu1 %v18333_v2 }
 0x12b   :  { %4241 = vmatpush1.msra.mxu1 %v4160_v41  ;;  %4233 = vmatprep.mubr.f32.mxu0 %v18333_v2 }
 0x12c   :  { %17194 = vmatmul.mubr.msk.f32.vlgmr.msra.gmra.mrb[0].mxu1 %vm104_vm1, %v17192_v40  ;;  %17722 = vmatprep.subr.mxu1 %v18333_v2  ;;  %v4460_v44 = vpop.permute.xlu1 %4459  ;;  %v4464_v45 = vpop.permute.xlu0 %4463 }
 0x12d   :  { %6995 = vrot.lane.b32.xlu1 %v19129_v29, %s18356_s23  ;;  %6999 = vrot.lane.b32.xlu0 %v19108_v25, %s18356_s23  ;;  %v4478_v47 = vsel %vm20944_vm15, %v4462_v38, %v4464_v45  ;;  %v4479_v50 = vsel %vm20944_vm15, %v4460_v44, %v4462_v38 }
 0x12e   :  { %4311 = vmatprep.subr.mxu0 %v4157_v42  ;;  %17723 = vmatpush3.msra.mxu1 %v4163_v43 }
 0x12f   :  { %17193 = vmatmul.mubr.msk.f32.vlgmr.msra.gmra.mrb[0].mxu0 %vm104_vm1, %v17192_v40  ;;  %17724 = vmatprep.mubr.msk.f32.mxu1 %vm18344_vm3, %v18333_v2 }
 0x130   :  { %4312 = vmatpush1.msra.mxu0 %v4158_v46  ;;  %17725 = vmatmul.mubr.msk.f32.vlgmr.msra.gmra.mrb[28].mxu1 %vm104_vm1, %v17192_v40  ;;  %v4468_v48 = vpop.permute.xlu1 %4467  ;;  %v4466_v49 = vpop.permute.xlu0 %4465 }
 0x131   :  { %7003 = vrot.lane.b32.xlu1 %v19061_v3, %s18356_s23  ;;  %7001 = vrot.lane.b32.xlu0 %v19068_v12, %s18356_s23  ;;  %v4476_v51 = vsel %vm20944_vm15, %v4466_v49, %v4468_v48  ;;  %v4477_v52 = vsel %vm20944_vm15, %v4464_v45, %v4466_v49 }
 0x132   :  { %4375 = vmatprep.mubr.f32.mxu0 %v18333_v2  ;;  %4486 = vmatprep.subr.mxu0 %v4478_v47 }
 0x133   :  { %17195 = vmatmul.mubr.msk.f32.vlgmr.msra.gmra.mrb[2].mxu0 %vm104_vm1, %v17192_v40  ;;  %4557 = vmatprep.subr.mxu1 %v4476_v51 }
 0x134   :  { %4487 = vmatpush1.msra.mxu0 %v4479_v50  ;;  %4558 = vmatpush1.msra.mxu1 %v4477_v52  ;;  %v4472_v53 = vpop.permute.xlu1 %4471  ;;  %v4470_v55 = vpop.permute.xlu0 %4469 }
 0x135   :  { %7007 = vrot.lane.b32.xlu1 %v19085_v18, %s18356_s23  ;;  %7005 = vrot.lane.b32.xlu0 %v19092_v19, %s18356_s23  ;;  %v4474_v56 = vsel %vm20944_vm15, %v4470_v55, %v4472_v53  ;;  %v4480_v57 = vsel %vm20944_vm15, %v4472_v53, %v4460_v44  ;;  %v4475_v58 = vsel %vm20944_vm15, %v4468_v48, %v4470_v55  ;;  %vm20946_vm15 = vcmp.lt.s32.totalorder %v18589_v11, 109  ;;  %v17217_v53 = vld [vmem:[%s20909_s2 + $0x90] sm:$0xff] }
 0x136   :  { %4621 = vmatprep.mubr.f32.mxu1 %v18333_v2  ;;  %17727 = vmatprep.subr.mxu1 %v18333_v2 }
 0x137   :  { %17199 = vmatmul.mubr.msk.f32.vlgmr.msra.gmra.mrb[0].mxu1 %vm104_vm1, %v17197_v54  ;;  %4550 = vmatprep.mubr.f32.mxu0 %v18333_v2 }
 0x138   :  { %4628 = vmatprep.subr.mxu0 %v4474_v56  ;;  %17728 = vmatpush3.msra.mxu1 %v4480_v57  ;;  %v4781_v6 = vpop.permute.xlu1 %4780  ;;  %v4779_v59 = vpop.permute.xlu0 %4778 }
 0x139   :  { %7316 = vrot.lane.b32.xlu1 %v19108_v25, %s20952_s26  ;;  %7314 = vrot.lane.b32.xlu0 %v19115_v26, %s20952_s26  ;;  %v4795_v60 = vsel %vm20945_vm14, %v4779_v59, %v4781_v6 }
 0x13a   :  { %17198 = vmatmul.mubr.msk.f32.vlgmr.msra.gmra.mrb[0].mxu0 %vm104_vm1, %v17197_v54  ;;  %17729 = vmatprep.mubr.msk.f32.mxu1 %vm18344_vm3, %v18333_v2 }
 0x13b   :  { %4629 = vmatpush1.msra.mxu0 %v4475_v58  ;;  %17730 = vmatmul.mubr.msk.f32.vlgmr.msra.gmra.mrb[30].mxu1 %vm104_vm1, %v17197_v54 }
 0x13c   :  { %4803 = vmatprep.subr.mxu0 %v4795_v60  ;;  %v4783_v5 = vpop.permute.xlu1 %4782  ;;  %v4777_v7 = vpop.permute.xlu0 %4776  ;;  %4692 = vmatprep.mubr.f32.mxu0 %v18333_v2 }
 0x13d   :  { %7318 = vrot.lane.b32.xlu1 %v19068_v12, %s20952_s26  ;;  %7312 = vrot.lane.b32.xlu0 %v19129_v29, %s20952_s26  ;;  %v4796_v61 = vsel %vm20945_vm14, %v4777_v7, %v4779_v59  ;;  %v4794_v9 = vsel %vm20945_vm14, %v4781_v6, %v4783_v5 }
 0x13e   :  { %17200 = vmatmul.mubr.msk.f32.vlgmr.msra.gmra.mrb[2].mxu0 %vm104_vm1, %v17197_v54  ;;  %4938 = vmatprep.mubr.f32.mxu1 %v18333_v2 }
 0x13f   :  { %4804 = vmatpush1.msra.mxu0 %v4796_v61  ;;  %4867 = vmatprep.mubr.f32.mxu0 %v18333_v2 }
 0x140   :  { %v4787_v62 = vpop.permute.xlu1 %4786  ;;  %v4785_v4 = vpop.permute.xlu0 %4784 }
 0x141   :  { %7322 = vrot.lane.b32.xlu1 %v19092_v19, %s20952_s26  ;;  %7320 = vrot.lane.b32.xlu0 %v19061_v3, %s20952_s26  ;;  %v4793_v0 = vsel %vm20945_vm14, %v4783_v5, %v4785_v4  ;;  %v4792_v15 = vsel %vm20945_vm14, %v4785_v4, %v4787_v62 }
 0x142   :  { %4874 = vmatprep.subr.mxu1 %v4793_v0  ;;  %17203 = vmatmul.mubr.msk.f32.vlgmr.msra.gmra.mrb[0].mxu0 %vm104_vm1, %v17202_v63 }
 0x143   :  { %4875 = vmatpush1.msra.mxu1 %v4794_v9  ;;  %5009 = vmatprep.mubr.f32.mxu0 %v18333_v2 }
 0x144   :  { %v5096_v10 = vpop.permute.xlu1 %5095  ;;  %17204 = vmatmul.mubr.msk.f32.vlgmr.msra.gmra.mrb[0].mxu1 %vm104_vm1, %v17202_v63  ;;  %v4789_v1 = vpop.permute.xlu0 %4788  ;;  %17732 = vmatprep.subr.mxu1 %v18333_v2 }
 0x145   :  { %7631 = vrot.lane.b32.xlu1 %v19115_v26, %s20950_s27  ;;  %7324 = vrot.lane.b32.xlu0 %v19085_v18, %s20952_s26  ;;  %v4791_v13 = vsel %vm20945_vm14, %v4787_v62, %v4789_v1  ;;  %v4797_v14 = vsel %vm20945_vm14, %v4789_v1, %v4777_v7  ;;  %vm20947_vm14 = vcmp.lt.s32.totalorder %v18589_v11, 108 }
 0x146   :  { %4945 = vmatprep.subr.mxu0 %v4791_v13  ;;  %17733 = vmatpush3.msra.mxu1 %v4797_v14 }
 0x147   :  { %4946 = vmatpush1.msra.mxu0 %v4792_v15  ;;  %17734 = vmatprep.mubr.msk.f32.mxu1 %vm18344_vm3, %v18333_v2 }
 0x148   :  { %v5094_v16 = vpop.permute.xlu1 %5093  ;;  %17735 = vmatmul.mubr.msk.f32.vlgmr.msra.gmra.mrb[32].mxu1 %vm104_vm1, %v17202_v63  ;;  %v5098_v17 = vpop.permute.xlu0 %5097  ;;  %17205 = vmatmul.mubr.msk.f32.vlgmr.msra.gmra.mrb[2].mxu0 %vm104_vm1, %v17202_v63 }
 0x149   :  { %7629 = vrot.lane.b32.xlu1 %v19129_v29, %s20950_s27  ;;  %7633 = vrot.lane.b32.xlu0 %v19108_v25, %s20950_s27  ;;  %v5112_v20 = vsel %vm20946_vm15, %v5096_v10, %v5098_v17  ;;  %v5113_v21 = vsel %vm20946_vm15, %v5094_v16, %v5096_v10  ;;  %v17222_v10 = vld [vmem:[%s20909_s2 + $0x98] sm:$0xff] }
 0x14a   :  { %5120 = vmatprep.subr.mxu0 %v5112_v20  ;;  %5255 = vmatprep.mubr.f32.mxu1 %v18333_v2 }
 0x14b   :  { %5121 = vmatpush1.msra.mxu0 %v5113_v21  ;;  %5184 = vmatprep.mubr.f32.mxu0 %v18333_v2 }
 0x14c   :  { %v5102_v23 = vpop.permute.xlu1 %5101  ;;  %v5100_v24 = vpop.permute.xlu0 %5099  ;;  %17208 = vmatmul.mubr.msk.f32.vlgmr.msra.gmra.mrb[0].mxu0 %vm104_vm1, %v17207_v22 }
 0x14d   :  { %7637 = vrot.lane.b32.xlu1 %v19061_v3, %s20950_s27  ;;  %7635 = vrot.lane.b32.xlu0 %v19068_v12, %s20950_s27  ;;  %v5110_v25 = vsel %vm20946_vm15, %v5100_v24, %v5102_v23  ;;  %v5111_v26 = vsel %vm20946_vm15, %v5098_v17, %v5100_v24 }
 0x14e   :  { %5191 = vmatprep.subr.mxu1 %v5110_v25  ;;  %5326 = vmatprep.mubr.f32.mxu0 %v18333_v2 }
 0x14f   :  { %5192 = vmatpush1.msra.mxu1 %v5111_v26 }
 0x150   :  { %v5106_v27 = vpop.permute.xlu1 %5105  ;;  %17209 = vmatmul.mubr.msk.f32.vlgmr.msra.gmra.mrb[0].mxu1 %vm104_vm1, %v17207_v22  ;;  %v5104_v28 = vpop.permute.xlu0 %5103  ;;  %17737 = vmatprep.subr.mxu1 %v18333_v2 }
 0x151   :  { %7641 = vrot.lane.b32.xlu1 %v19085_v18, %s20950_s27  ;;  %7639 = vrot.lane.b32.xlu0 %v19092_v19, %s20950_s27  ;;  %v5108_v3 = vsel %vm20946_vm15, %v5104_v28, %v5106_v27  ;;  %v5114_v12 = vsel %vm20946_vm15, %v5106_v27, %v5094_v16  ;;  %v5109_v29 = vsel %vm20946_vm15, %v5102_v23, %v5104_v28  ;;  %vm20948_vm15 = vcmp.lt.s32.totalorder %v18589_v11, 107  ;;  %s20961_s27 = smov 127  }
 0x152   :  { %5262 = vmatprep.subr.mxu0 %v5108_v3  ;;  %17738 = vmatpush3.msra.mxu1 %v5114_v12 }
 0x153   :  { %5263 = vmatpush1.msra.mxu0 %v5109_v29  ;;  %17739 = vmatprep.mubr.msk.f32.mxu1 %vm18344_vm3, %v18333_v2 }
 0x154   :  { %v5415_v18 = vpop.permute.xlu1 %5414  ;;  %17740 = vmatmul.mubr.msk.f32.vlgmr.msra.gmra.mrb[34].mxu1 %vm104_vm1, %v17207_v22  ;;  %v5413_v19 = vpop.permute.xlu0 %5412  ;;  %17210 = vmatmul.mubr.msk.f32.vlgmr.msra.gmra.mrb[2].mxu0 %vm104_vm1, %v17207_v22 }
 0x155   :  { %v5429_v30 = vsel %vm20947_vm14, %v5413_v19, %v5415_v18  ;;  %5572 = vmatprep.mubr.f32.mxu1 %v18333_v2  ;;  %5501 = vmatprep.mubr.f32.mxu0 %v18333_v2 }
 0x156   :  { %5437 = vmatprep.subr.mxu0 %v5429_v30 }
 0x158   :  { %v5417_v31 = vpop.permute.xlu1 %5416  ;;  %v5411_v32 = vpop.permute.xlu0 %5410 }
 0x159   :  { %v5430_v33 = vsel %vm20947_vm14, %v5411_v32, %v5413_v19  ;;  %v387_v34 = vpop.f32.mrb[2].mxu1  ;;  %v5428_v40 = vsel %vm20947_vm14, %v5415_v18, %v5417_v31  ;;  %v17227_v18 = vld [vmem:[%s20909_s2 + $0xa0] sm:$0xff] }
 0x15a   :  { %5438 = vmatpush1.msra.mxu0 %v5430_v33  ;;  %v17661_v36 = vpop.f32.mrb[3].mxu1 }
 0x15b   :  { %17213 = vmatmul.mubr.msk.f32.vlgmr.msra.gmra.mrb[0].mxu0 %vm104_vm1, %v17212_v35 }
 0x15c   :  { %v5421_v37 = vpop.permute.xlu1 %5420  ;;  %v5419_v38 = vpop.permute.xlu0 %5418  ;;  %5643 = vmatprep.mubr.f32.mxu0 %v18333_v2 }
 0x15d   :  { %v5427_v39 = vsel %vm20947_vm14, %v5417_v31, %v5419_v38  ;;  %v5426_v45 = vsel %vm20947_vm14, %v5419_v38, %v5421_v37 }
 0x15e   :  { %5508 = vmatprep.subr.mxu1 %v5427_v39 }
 0x15f   :  { %5509 = vmatpush1.msra.mxu1 %v5428_v40 }
 0x160   :  { %v5730_v41 = vpop.permute.xlu1 %5729  ;;  %17214 = vmatmul.mubr.msk.f32.vlgmr.msra.gmra.mrb[0].mxu1 %vm104_vm1, %v17212_v35  ;;  %v5423_v42 = vpop.permute.xlu0 %5422  ;;  %17742 = vmatprep.subr.mxu1 %v18333_v2 }
 0x161   :  { %v5425_v43 = vsel %vm20947_vm14, %v5421_v37, %v5423_v42  ;;  %v5431_v44 = vsel %vm20947_vm14, %v5423_v42, %v5411_v32  ;;  %17744 = vmatprep.mubr.msk.f32.mxu1 %vm18344_vm3, %v18333_v2  ;;  %vm20949_vm14 = vcmp.lt.s32.totalorder %v18589_v11, 106 }
 0x162   :  { %5579 = vmatprep.subr.mxu0 %v5425_v43  ;;  %17743 = vmatpush3.msra.mxu1 %v5431_v44  ;;  %v18359_v43 = vmov 0   ;;  %v7946_v44 = vld [vmem:[%s20910_s3] sm:$0xff]  ;;  %s20982_s3 = smov 87  }
 0x163   :  { %5580 = vmatpush1.msra.mxu0 %v5426_v45  ;;  %18227 = vset.pattern.permute.xlu0 %v18359_v43 }
 0x164   :  { %v5728_v46 = vpop.permute.xlu1 %5727  ;;  %17745 = vmatmul.mubr.msk.f32.vlgmr.msra.gmra.mrb[36].mxu1 %vm104_vm1, %v17212_v35  ;;  %v5732_v47 = vpop.permute.xlu0 %5731  ;;  %17215 = vmatmul.mubr.msk.f32.vlgmr.msra.gmra.mrb[2].mxu0 %vm104_vm1, %v17212_v35 }
 0x165   :  { %v5746_v48 = vsel %vm20948_vm15, %v5730_v41, %v5732_v47  ;;  %v5747_v49 = vsel %vm20948_vm15, %v5728_v46, %v5730_v41  ;;  %5889 = vmatprep.mubr.f32.mxu1 %v18333_v2  ;;  %5818 = vmatprep.mubr.f32.mxu0 %v18333_v2  ;;  %v673_v50 = vpop.f32.mrb[4].mxu1 }
 0x166   :  { %5754 = vmatprep.subr.mxu0 %v5746_v48  ;;  %v674_v51 = vadd.f32 %v673_v50, %v387_v34  ;;  %v17666_v52 = vpop.f32.mrb[5].mxu1  ;;  %18228 = vset.pattern.permute.xlu1 %v18359_v43 }
 0x167   :  { %5755 = vmatpush1.msra.mxu0 %v5747_v49  ;;  %7949 = vperm.xlu0 %18227, %v7946_v44   ;;  %v17232_v49 = vld [vmem:[%s20909_s2 + $0xa8] sm:$0xff] }
 0x168   :  { %v5736_v54 = vpop.permute.xlu1 %5735  ;;  %v5734_v55 = vpop.permute.xlu0 %5733  ;;  %17218 = vmatmul.mubr.msk.f32.vlgmr.msra.gmra.mrb[0].mxu0 %vm104_vm1, %v17217_v53 }
 0x169   :  { %v5744_v56 = vsel %vm20948_vm15, %v5734_v55, %v5736_v54  ;;  %v5745_v57 = vsel %vm20948_vm15, %v5732_v47, %v5734_v55  ;;  %5960 = vmatprep.mubr.f32.mxu0 %v18333_v2 }
 0x16a   :  { %5825 = vmatprep.subr.mxu1 %v5744_v56 }
 0x16b   :  { %5826 = vmatpush1.msra.mxu1 %v5745_v57 }
 0x16c   :  { %v5740_v58 = vpop.permute.xlu1 %5739  ;;  %17219 = vmatmul.mubr.msk.f32.vlgmr.msra.gmra.mrb[0].mxu1 %vm104_vm1, %v17217_v53  ;;  %v5738_v6 = vpop.permute.xlu0 %5737  ;;  %17747 = vmatprep.subr.mxu1 %v18333_v2 }
 0x16d   :  { %v5742_v59 = vsel %vm20948_vm15, %v5738_v6, %v5740_v58  ;;  %v5748_v60 = vsel %vm20948_vm15, %v5740_v58, %v5728_v46  ;;  %v5743_v5 = vsel %vm20948_vm15, %v5736_v54, %v5738_v6  ;;  %17749 = vmatprep.mubr.msk.f32.mxu1 %vm18344_vm3, %v18333_v2  ;;  %vm20954_vm15 = vcmp.lt.s32.totalorder %v18589_v11, 90 }
 0x16e   :  { %5896 = vmatprep.subr.mxu0 %v5742_v59  ;;  %17748 = vmatpush3.msra.mxu1 %v5748_v60 }
 0x16f   :  { %5897 = vmatpush1.msra.mxu0 %v5743_v5 }
 0x170   :  { %v6049_v7 = vpop.permute.xlu1 %6048  ;;  %17750 = vmatmul.mubr.msk.f32.vlgmr.msra.gmra.mrb[38].mxu1 %vm104_vm1, %v17217_v53  ;;  %v6047_v61 = vpop.permute.xlu0 %6046  ;;  %17220 = vmatmul.mubr.msk.f32.vlgmr.msra.gmra.mrb[2].mxu0 %vm104_vm1, %v17217_v53 }
 0x171   :  { %v6063_v62 = vsel %vm20949_vm14, %v6047_v61, %v6049_v7  ;;  %6206 = vmatprep.mubr.f32.mxu1 %v18333_v2  ;;  %6135 = vmatprep.mubr.f32.mxu0 %v18333_v2 }
 0x172   :  { %6071 = vmatprep.subr.mxu0 %v6063_v62 }
 0x174   :  { %v6051_v4 = vpop.permute.xlu1 %6050  ;;  %v6045_v0 = vpop.permute.xlu0 %6044 }
 0x175   :  { %v6064_v63 = vsel %vm20949_vm14, %v6045_v0, %v6047_v61  ;;  %v983_v9 = vpop.f32.mrb[6].mxu1  ;;  %v6062_v17 = vsel %vm20949_vm14, %v6049_v7, %v6051_v4 }
 0x176   :  { %6072 = vmatpush1.msra.mxu0 %v6064_v63  ;;  %v993_v1 = vadd.f32 %v983_v9, %v674_v51  ;;  %v17671_v13 = vpop.f32.mrb[7].mxu1 }
 0x177   :  { %17223 = vmatmul.mubr.msk.f32.vlgmr.msra.gmra.mrb[0].mxu0 %vm104_vm1, %v17222_v10 }
 0x178   :  { %v6055_v14 = vpop.permute.xlu1 %6054  ;;  %v6053_v15 = vpop.permute.xlu0 %6052  ;;  %6277 = vmatprep.mubr.f32.mxu0 %v18333_v2 }
 0x179   :  { %v6061_v16 = vsel %vm20949_vm14, %v6051_v4, %v6053_v15  ;;  %v6060_v24 = vsel %vm20949_vm14, %v6053_v15, %v6055_v14  ;;  %v17237_v4 = vld [vmem:[%s20909_s2 + $0xb0] sm:$0xff] }
 0x17a   :  { %6142 = vmatprep.subr.mxu1 %v6061_v16 }
 0x17b   :  { %6143 = vmatpush1.msra.mxu1 %v6062_v17 }
 0x17c   :  { %v6364_v20 = vpop.permute.xlu1 %6363  ;;  %17224 = vmatmul.mubr.msk.f32.vlgmr.msra.gmra.mrb[0].mxu1 %vm104_vm1, %v17222_v10  ;;  %v6057_v21 = vpop.permute.xlu0 %6056  ;;  %17752 = vmatprep.subr.mxu1 %v18333_v2 }
 0x17d   :  { %v6059_v22 = vsel %vm20949_vm14, %v6055_v14, %v6057_v21  ;;  %v6065_v23 = vsel %vm20949_vm14, %v6057_v21, %v6045_v0  ;;  %17754 = vmatprep.mubr.msk.f32.mxu1 %vm18344_vm3, %v18333_v2  ;;  %vm20955_vm14 = vcmp.lt.s32.totalorder %v18589_v11, 89 }
 0x17e   :  { %6213 = vmatprep.subr.mxu0 %v6059_v22  ;;  %17753 = vmatpush3.msra.mxu1 %v6065_v23 }
 0x17f   :  { %6214 = vmatpush1.msra.mxu0 %v6060_v24 }
 0x180   :  { %v6362_v25 = vpop.permute.xlu1 %6361  ;;  %17755 = vmatmul.mubr.msk.f32.vlgmr.msra.gmra.mrb[40].mxu1 %vm104_vm1, %v17222_v10  ;;  %v6366_v26 = vpop.permute.xlu0 %6365  ;;  %17225 = vmatmul.mubr.msk.f32.vlgmr.msra.gmra.mrb[2].mxu0 %vm104_vm1, %v17222_v10 }
 0x181   :  { %v6380_v27 = vsel %vm20954_vm15, %v6364_v20, %v6366_v26  ;;  %v6381_v28 = vsel %vm20954_vm15, %v6362_v25, %v6364_v20  ;;  %6523 = vmatprep.mubr.f32.mxu1 %v18333_v2  ;;  %6452 = vmatprep.mubr.f32.mxu0 %v18333_v2  ;;  %v1300_v3 = vpop.f32.mrb[8].mxu1 }
 0x182   :  { %6388 = vmatprep.subr.mxu0 %v6380_v27  ;;  %v1310_v12 = vadd.f32 %v1300_v3, %v993_v1  ;;  %v17676_v29 = vpop.f32.mrb[9].mxu1  ;;  %v17242_v27 = vld [vmem:[%s20909_s2 + $0xb8] sm:$0xff] }
 0x183   :  { %6389 = vmatpush1.msra.mxu0 %v6381_v28 }
 0x184   :  { %v6370_v19 = vpop.permute.xlu1 %6369  ;;  %v6368_v30 = vpop.permute.xlu0 %6367  ;;  %17228 = vmatmul.mubr.msk.f32.vlgmr.msra.gmra.mrb[0].mxu0 %vm104_vm1, %v17227_v18 }
 0x185   :  { %v6378_v31 = vsel %vm20954_vm15, %v6368_v30, %v6370_v19  ;;  %v6379_v32 = vsel %vm20954_vm15, %v6366_v26, %v6368_v30  ;;  %6594 = vmatprep.mubr.f32.mxu0 %v18333_v2 }
 0x186   :  { %6459 = vmatprep.subr.mxu1 %v6378_v31 }
 0x187   :  { %6460 = vmatpush1.msra.mxu1 %v6379_v32 }
 0x188   :  { %v6374_v33 = vpop.permute.xlu1 %6373  ;;  %17229 = vmatmul.mubr.msk.f32.vlgmr.msra.gmra.mrb[0].mxu1 %vm104_vm1, %v17227_v18  ;;  %v6372_v34 = vpop.permute.xlu0 %6371  ;;  %17757 = vmatprep.subr.mxu1 %v18333_v2 }
 0x189   :  { %v6376_v35 = vsel %vm20954_vm15, %v6372_v34, %v6374_v33  ;;  %v6382_v36 = vsel %vm20954_vm15, %v6374_v33, %v6362_v25  ;;  %v6377_v37 = vsel %vm20954_vm15, %v6370_v19, %v6372_v34  ;;  %17759 = vmatprep.mubr.msk.f32.mxu1 %vm18344_vm3, %v18333_v2  ;;  %vm20956_vm15 = vcmp.lt.s32.totalorder %v18589_v11, 88 }
 0x18a   :  { %6530 = vmatprep.subr.mxu0 %v6376_v35  ;;  %17758 = vmatpush3.msra.mxu1 %v6382_v36 }
 0x18b   :  { %6531 = vmatpush1.msra.mxu0 %v6377_v37 }
 0x18c   :  { %v6683_v38 = vpop.permute.xlu1 %6682  ;;  %17760 = vmatmul.mubr.msk.f32.vlgmr.msra.gmra.mrb[42].mxu1 %vm104_vm1, %v17227_v18  ;;  %v6681_v39 = vpop.permute.xlu0 %6680  ;;  %17230 = vmatmul.mubr.msk.f32.vlgmr.msra.gmra.mrb[2].mxu0 %vm104_vm1, %v17227_v18 }
 0x18d   :  { %v6697_v40 = vsel %vm20955_vm14, %v6681_v39, %v6683_v38  ;;  %6840 = vmatprep.mubr.f32.mxu1 %v18333_v2  ;;  %6769 = vmatprep.mubr.f32.mxu0 %v18333_v2 }
 0x18e   :  { %6705 = vmatprep.subr.mxu0 %v6697_v40 }
 0x190   :  { %v6685_v41 = vpop.permute.xlu1 %6684  ;;  %v1617_v42 = vpop.f32.mrb[10].mxu1 }
 0x191   :  { %v6679_v45 = vpop.permute.xlu0 %6678  ;;  %v1627_v46 = vadd.f32 %v1617_v42, %v1310_v12  ;;  %v17681_v47 = vpop.f32.mrb[11].mxu1  ;;  %v6696_v53 = vsel %vm20955_vm14, %v6683_v38, %v6685_v41 }
 0x192   :  { %v6698_v48 = vsel %vm20955_vm14, %v6679_v45, %v6681_v39 }
 0x193   :  { %6706 = vmatpush1.msra.mxu0 %v6698_v48 }
 0x194   :  { %17233 = vmatmul.mubr.msk.f32.vlgmr.msra.gmra.mrb[0].mxu0 %vm104_vm1, %v17232_v49 }
 0x195   :  { %6911 = vmatprep.mubr.f32.mxu0 %v18333_v2 }
 0x196   :  { %v6689_v50 = vpop.permute.xlu1 %6688 }
 0x197   :  { %v6687_v51 = vpop.permute.xlu0 %6686 }
 0x198   :  { %v6695_v52 = vsel %vm20955_vm14, %v6685_v41, %v6687_v51  ;;  %v6694_v6 = vsel %vm20955_vm14, %v6687_v51, %v6689_v50  ;;  %v17247_v41 = vld [vmem:[%s20909_s2 + $0xc0] sm:$0xff]  ;;  %s20963_s2 = smov 110  }
 0x199   :  { %6776 = vmatprep.subr.mxu1 %v6695_v52 }
 0x19a   :  { %6777 = vmatpush1.msra.mxu1 %v6696_v53 }
 0x19b   :  { %v6998_v54 = vpop.permute.xlu1 %6997  ;;  %17234 = vmatmul.mubr.msk.f32.vlgmr.msra.gmra.mrb[0].mxu1 %vm104_vm1, %v17232_v49  ;;  %v6691_v55 = vpop.permute.xlu0 %6690  ;;  %17762 = vmatprep.subr.mxu1 %v18333_v2 }
 0x19c   :  { %v6693_v56 = vsel %vm20955_vm14, %v6689_v50, %v6691_v55  ;;  %v6699_v57 = vsel %vm20955_vm14, %v6691_v55, %v6679_v45  ;;  %17764 = vmatprep.mubr.msk.f32.mxu1 %vm18344_vm3, %v18333_v2  ;;  %v1934_v58 = vpop.f32.mrb[12].mxu1  ;;  %vm7326_vm14 = vcmp.lt.s32.totalorder %v18589_v11, 87 }
 0x19d   :  { %6847 = vmatprep.subr.mxu0 %v6693_v56  ;;  %17763 = vmatpush3.msra.mxu1 %v6699_v57  ;;  %v1944_v59 = vadd.f32 %v1934_v58, %v1627_v46  ;;  %v17686_v60 = vpop.f32.mrb[13].mxu1 }
 0x19e   :  { %6848 = vmatpush1.msra.mxu0 %v6694_v6 }
 0x19f   :  { %v6996_v5 = vpop.permute.xlu1 %6995  ;;  %17765 = vmatmul.mubr.msk.f32.vlgmr.msra.gmra.mrb[44].mxu1 %vm104_vm1, %v17232_v49  ;;  %v7000_v7 = vpop.permute.xlu0 %6999  ;;  %17235 = vmatmul.mubr.msk.f32.vlgmr.msra.gmra.mrb[2].mxu0 %vm104_vm1, %v17232_v49 }
 0x1a0   :  { %v7014_v61 = vsel %vm20956_vm15, %v6998_v54, %v7000_v7  ;;  %v7015_v62 = vsel %vm20956_vm15, %v6996_v5, %v6998_v54  ;;  %7157 = vmatprep.mubr.f32.mxu1 %v18333_v2  ;;  %7086 = vmatprep.mubr.f32.mxu0 %v18333_v2 }
 0x1a1   :  { %7022 = vmatprep.subr.mxu0 %v7014_v61 }
 0x1a2   :  { %7023 = vmatpush1.msra.mxu0 %v7015_v62 }
 0x1a3   :  { %v7004_v0 = vpop.permute.xlu1 %7003  ;;  %v7002_v63 = vpop.permute.xlu0 %7001  ;;  %17238 = vmatmul.mubr.msk.f32.vlgmr.msra.gmra.mrb[0].mxu0 %vm104_vm1, %v17237_v4 }
 0x1a4   :  { %v7012_v9 = vsel %vm20956_vm15, %v7002_v63, %v7004_v0  ;;  %v7013_v10 = vsel %vm20956_vm15, %v7000_v7, %v7002_v63  ;;  %7228 = vmatprep.mubr.f32.mxu0 %v18333_v2 }
 0x1a5   :  { %7093 = vmatprep.subr.mxu1 %v7012_v9 }
 0x1a6   :  { %7094 = vmatpush1.msra.mxu1 %v7013_v10 }
 0x1a7   :  { %v7008_v1 = vpop.permute.xlu1 %7007  ;;  %17239 = vmatmul.mubr.msk.f32.vlgmr.msra.gmra.mrb[0].mxu1 %vm104_vm1, %v17237_v4  ;;  %v7006_v13 = vpop.permute.xlu0 %7005  ;;  %17767 = vmatprep.subr.mxu1 %v18333_v2 }
 0x1a8   :  { %v7010_v14 = vsel %vm20956_vm15, %v7006_v13, %v7008_v1  ;;  %v7016_v15 = vsel %vm20956_vm15, %v7008_v1, %v6996_v5  ;;  %v7011_v16 = vsel %vm20956_vm15, %v7004_v0, %v7006_v13  ;;  %17769 = vmatprep.mubr.msk.f32.mxu1 %vm18344_vm3, %v18333_v2  ;;  %vm20957_vm15 = vcmp.lt.s32.totalorder %v18589_v11, 86 }
 0x1a9   :  { %7164 = vmatprep.subr.mxu0 %v7010_v14  ;;  %17768 = vmatpush3.msra.mxu1 %v7016_v15 }
 0x1aa   :  { %7165 = vmatpush1.msra.mxu0 %v7011_v16 }
 0x1ab   :  { %v7317_v17 = vpop.permute.xlu1 %7316  ;;  %17770 = vmatmul.mubr.msk.f32.vlgmr.msra.gmra.mrb[46].mxu1 %vm104_vm1, %v17237_v4  ;;  %v7315_v20 = vpop.permute.xlu0 %7314  ;;  %17240 = vmatmul.mubr.msk.f32.vlgmr.msra.gmra.mrb[2].mxu0 %vm104_vm1, %v17237_v4 }
 0x1ac   :  { %v7331_v21 = vsel %vm7326_vm14, %v7315_v20, %v7317_v17  ;;  %7403 = vmatprep.mubr.f32.mxu0 %v18333_v2  ;;  %7474 = vmatprep.mubr.f32.mxu1 %v18333_v2  ;;  %v2251_v22 = vpop.f32.mrb[14].mxu1 }
 0x1ad   :  { %7339 = vmatprep.subr.mxu0 %v7331_v21  ;;  %v2261_v23 = vadd.f32 %v2251_v22, %v1944_v59  ;;  %v17691_v24 = vpop.f32.mrb[15].mxu1 }
 0x1af   :  { %v7319_v25 = vpop.permute.xlu1 %7318  ;;  %v7313_v26 = vpop.permute.xlu0 %7312 }
 0x1b0   :  { %v7332_v28 = vsel %vm7326_vm14, %v7313_v26, %v7315_v20  ;;  %v7330_v18 = vsel %vm7326_vm14, %v7317_v17, %v7319_v25 }
 0x1b1   :  { %7340 = vmatpush1.msra.mxu0 %v7332_v28 }
 0x1b2   :  { %17243 = vmatmul.mubr.msk.f32.vlgmr.msra.gmra.mrb[0].mxu0 %vm104_vm1, %v17242_v27 }
 0x1b3   :  { %v7323_v3 = vpop.permute.xlu1 %7322  ;;  %v7321_v12 = vpop.permute.xlu0 %7320  ;;  %7545 = vmatprep.mubr.f32.mxu0 %v18333_v2 }
 0x1b4   :  { %v7329_v29 = vsel %vm7326_vm14, %v7319_v25, %v7321_v12  ;;  %v7328_v34 = vsel %vm7326_vm14, %v7321_v12, %v7323_v3 }
 0x1b5   :  { %7410 = vmatprep.subr.mxu1 %v7329_v29 }
 0x1b6   :  { %7411 = vmatpush1.msra.mxu1 %v7330_v18 }
 0x1b7   :  { %v7632_v19 = vpop.permute.xlu1 %7631  ;;  %17244 = vmatmul.mubr.msk.f32.vlgmr.msra.gmra.mrb[0].mxu1 %vm104_vm1, %v17242_v27  ;;  %v7325_v30 = vpop.permute.xlu0 %7324  ;;  %17772 = vmatprep.subr.mxu1 %v18333_v2 }
 0x1b8   :  { %v7327_v31 = vsel %vm7326_vm14, %v7323_v3, %v7325_v30  ;;  %v7333_v32 = vsel %vm7326_vm14, %v7325_v30, %v7313_v26  ;;  %17774 = vmatprep.mubr.msk.f32.mxu1 %vm18344_vm3, %v18333_v2  ;;  %v2568_v33 = vpop.f32.mrb[16].mxu1 }
 0x1b9   :  { %7481 = vmatprep.subr.mxu0 %v7327_v31  ;;  %17773 = vmatpush3.msra.mxu1 %v7333_v32  ;;  %v2578_v35 = vadd.f32 %v2568_v33, %v2261_v23  ;;  %v17696_v36 = vpop.f32.mrb[17].mxu1 }
 0x1ba   :  { %7482 = vmatpush1.msra.mxu0 %v7328_v34 }
 0x1bb   :  { %v7630_v37 = vpop.permute.xlu1 %7629  ;;  %17245 = vmatmul.mubr.msk.f32.vlgmr.msra.gmra.mrb[2].mxu0 %vm104_vm1, %v17242_v27  ;;  %17775 = vmatmul.mubr.msk.f32.vlgmr.msra.gmra.mrb[48].mxu1 %vm104_vm1, %v17242_v27  ;;  %v7634_v38 = vpop.permute.xlu0 %7633 }
 0x1bc   :  { %v7648_v39 = vsel %vm20957_vm15, %v7632_v19, %v7634_v38  ;;  %v7649_v40 = vsel %vm20957_vm15, %v7630_v37, %v7632_v19  ;;  %7720 = vmatprep.mubr.f32.mxu0 %v18333_v2  ;;  %7791 = vmatprep.mubr.f32.mxu1 %v18333_v2 }
 0x1bd   :  { %7656 = vmatprep.subr.mxu0 %v7648_v39 }
 0x1be   :  { %7657 = vmatpush1.msra.mxu0 %v7649_v40 }
 0x1bf   :  { %v7638_v42 = vpop.permute.xlu1 %7637  ;;  %17248 = vmatmul.mubr.msk.f32.vlgmr.msra.gmra.mrb[0].mxu0 %vm104_vm1, %v17247_v41  ;;  %v7636_v43 = vpop.permute.xlu0 %7635 }
 0x1c0   :  { %v7646_v44 = vsel %vm20957_vm15, %v7636_v43, %v7638_v42  ;;  %v7647_v45 = vsel %vm20957_vm15, %v7634_v38, %v7636_v43  ;;  %7862 = vmatprep.mubr.f32.mxu0 %v18333_v2  ;;  %v47_v38 = vld [vmem:[%s20911_s1] sm:$0xff] }
 0x1c1   :  { %7727 = vmatprep.subr.mxu1 %v7646_v44 }
 0x1c2   :  { %7728 = vmatpush1.msra.mxu1 %v7647_v45 }
 0x1c3   :  { %v7642_v46 = vpop.permute.xlu1 %7641  ;;  %17249 = vmatmul.mubr.msk.f32.vlgmr.msra.gmra.mrb[0].mxu1 %vm104_vm1, %v17247_v41  ;;  %v7640_v47 = vpop.permute.xlu0 %7639  ;;  %17777 = vmatprep.subr.mxu1 %v18333_v2 }
 0x1c4   :  { %v7644_v48 = vsel %vm20957_vm15, %v7640_v47, %v7642_v46  ;;  %v7650_v49 = vsel %vm20957_vm15, %v7642_v46, %v7630_v37  ;;  %v7645_v50 = vsel %vm20957_vm15, %v7638_v42, %v7640_v47  ;;  %17779 = vmatprep.mubr.msk.f32.mxu1 %vm18344_vm3, %v18333_v2  ;;  %vm8427_vm15 = vcmask 1043456  }
 0x1c5   :  { %7798 = vmatprep.subr.mxu0 %v7644_v48  ;;  %17778 = vmatpush3.msra.mxu1 %v7650_v49 }
 0x1c6   :  { %7799 = vmatpush1.msra.mxu0 %v7645_v50 }
 0x1c7   :  { %17250 = vmatmul.mubr.msk.f32.vlgmr.msra.gmra.mrb[2].mxu0 %vm104_vm1, %v17247_v41  ;;  %17780 = vmatmul.mubr.msk.f32.vlgmr.msra.gmra.mrb[50].mxu1 %vm104_vm1, %v17247_v41 }
 0x1c8   :  { %v2885_v51 = vpop.f32.mrb[18].mxu1  ;;  %8199 = vmatprep.mubr.f32.mxu0 %v18333_v2  ;;  %8270 = vmatprep.mubr.f32.mxu1 %v18333_v2 }
 0x1c9   :  { %v2895_v52 = vadd.f32 %v2885_v51, %v2578_v35  ;;  %v17701_v53 = vpop.f32.mrb[19].mxu1  ;;  %v7963_v35 = vshrl.u32 %v69_v8, 7 }
 0x1cb   :  { %v7964_v36 = vsub.s32 0, %v7963_v35  ;;  %v7968_v39 = vsub.s32 1, %v7963_v35  ;;  %v7972_v44 = vsub.s32 2, %v7963_v35  ;;  %v7976_v47 = vsub.s32 3, %v7963_v35 }
 0x1cd   :  { %v19545_v43 = vrot.slane %v47_v38, %v7964_v36  ;;  %v19547_v46 = vrot.slane %v47_v38, %v7968_v39  ;;  %v19550_v51 = vrot.slane %v47_v38, %v7972_v44 }
 0x1d4   :  { %v3202_v54 = vpop.f32.mrb[20].mxu1 }
 0x1d5   :  { %v3212_v55 = vadd.f32 %v3202_v54, %v2895_v52  ;;  %v17706_v56 = vpop.f32.mrb[21].mxu1  ;;  %v7980_v52 = vsub.s32 4, %v7963_v35 }
 0x1d6   :  { %v7984_v56 = vsub.s32 5, %v7963_v35 }
 0x1e4   :  { %v3519_v57 = vpop.f32.mrb[22].mxu1 }
 0x1e5   :  { %v3529_v58 = vadd.f32 %v3519_v57, %v3212_v55  ;;  %v17711_v6 = vpop.f32.mrb[23].mxu1  ;;  %v19553_v55 = vrot.slane %v47_v38, %v7976_v47 }
 0x1e6   :  { %v7950_v42 = vpop.permute.xlu0 %7949 }
 0x1f0   :  { %v3836_v59 = vpop.f32.mrb[24].mxu1 }
 0x1f1   :  { %v3846_v60 = vadd.f32 %v3836_v59, %v3529_v58  ;;  %v17716_v5 = vpop.f32.mrb[25].mxu1 }
 0x1f2   :  { %v19556_v5 = vrot.slane %v47_v38, %v7980_v52 }
 0x1fb   :  { %v4131_v7 = vpop.f32.mrb[26].mxu1 }
 0x1fc   :  { %v4141_v61 = vadd.f32 %v4131_v7, %v3846_v60  ;;  %v17721_v62 = vpop.f32.mrb[27].mxu1  ;;  %v7988_v7 = vsub.s32 6, %v7963_v35 }
 0x203   :  { %v4448_v4 = vpop.f32.mrb[28].mxu1 }
 0x204   :  { %v4458_v0 = vadd.f32 %v4448_v4, %v4141_v61  ;;  %v17726_v63 = vpop.f32.mrb[29].mxu1 }
 0x20e   :  { %v4765_v9 = vpop.f32.mrb[30].mxu1 }
 0x20f   :  { %v4775_v10 = vadd.f32 %v4765_v9, %v4458_v0  ;;  %v17731_v1 = vpop.f32.mrb[31].mxu1  ;;  %v19559_v0 = vrot.slane %v47_v38, %v7984_v56  ;;  %v7960_v56 = vld [vmem:[%s20914_s5] sm:$0xff]  ;;  %s20987_s5 = smov 86  }
 0x21b   :  { %v5082_v13 = vpop.f32.mrb[32].mxu1 }
 0x21c   :  { %v5092_v14 = vadd.f32 %v5082_v13, %v4775_v10  ;;  %v17736_v15 = vpop.f32.mrb[33].mxu1 }
 0x227   :  { %v5399_v16 = vpop.f32.mrb[34].mxu1 }
 0x228   :  { %v5409_v17 = vadd.f32 %v5399_v16, %v5092_v14  ;;  %v17741_v20 = vpop.f32.mrb[35].mxu1 }
 0x229   :  { %v19562_v20 = vrot.slane %v47_v38, %v7988_v7 }
 0x237   :  { %v5716_v21 = vpop.f32.mrb[36].mxu1 }
 0x238   :  { %v5726_v22 = vadd.f32 %v5716_v21, %v5409_v17  ;;  %v17746_v23 = vpop.f32.mrb[37].mxu1 }
 0x243   :  { %v6033_v24 = vpop.f32.mrb[38].mxu1 }
 0x244   :  { %v6043_v25 = vadd.f32 %v6033_v24, %v5726_v22  ;;  %v17751_v26 = vpop.f32.mrb[39].mxu1 }
 0x245   :  { %v7959_v26 = vld [vmem:[%s20912_s4] sm:$0xff]  ;;  %s20962_s4 = smov 126  }
 0x253   :  { %v6350_v27 = vpop.f32.mrb[40].mxu1 }
 0x254   :  { %v6360_v28 = vadd.f32 %v6350_v27, %v6043_v25  ;;  %v17756_v3 = vpop.f32.mrb[41].mxu1  ;;  %v8126_v27 = vld [vmem:[%s20913_s7] sm:$0xf] }
 0x25f   :  { %v6667_v12 = vpop.f32.mrb[42].mxu1 }
 0x260   :  { %v6677_v29 = vadd.f32 %v6667_v12, %v6360_v28  ;;  %v17761_v18 = vpop.f32.mrb[43].mxu1 }
 0x272   :  { %v6984_v19 = vpop.f32.mrb[44].mxu1 }
 0x273   :  { %v6994_v30 = vadd.f32 %v6984_v19, %v6677_v29  ;;  %v17766_v31 = vpop.f32.mrb[45].mxu1 }
 0x27e   :  { %v7301_v32 = vpop.f32.mrb[46].mxu1 }
 0x27f   :  { %v7311_v33 = vadd.f32 %v7301_v32, %v6994_v30  ;;  %v17771_v34 = vpop.f32.mrb[47].mxu1 }
 0x28e   :  { %v7618_v37 = vpop.f32.mrb[48].mxu1 }
 0x28f   :  { %v7628_v40 = vadd.f32 %v7618_v37, %v7311_v33  ;;  %v17776_v41 = vpop.f32.mrb[49].mxu1 }
 0x292   :  { %v7722_v45 = vpop.f32.mrb[0].mxu0 }
 0x293   :  { %v7724_v48 = vpop.f32.mrb[1].mxu0  ;;  %v7952_v49 = vadd.f32 %v7950_v42, %v7722_v45 }
 0x294   :  { %v7953_v8 = vadd.f32 %v7950_v42, %v7724_v48 }
 0x295   :  { %v7997_v50 = vmul.f32 %v19545_v43, %v7952_v49 }
 0x296   :  { %v7998_v53 = vmul.f32 %v19547_v46, %v7953_v8  ;;  %v7793_v54 = vpop.f32.mrb[0].mxu1 }
 0x297   :  { %v7954_v57 = vadd.f32 %v7950_v42, %v7793_v54  ;;  %v7795_v58 = vpop.f32.mrb[1].mxu1 }
 0x298   :  { %v8004_v6 = vadd.f32 %v7998_v53, %v7997_v50  ;;  %v7955_v59 = vadd.f32 %v7950_v42, %v7795_v58 }
 0x299   :  { %v7999_v60 = vmul.f32 %v19550_v51, %v7954_v57  ;;  %v8418_v57 = vld [vmem:[%s20915_s8] sm:$0xf] }
 0x29a   :  { %v8000_v61 = vmul.f32 %v19553_v55, %v7955_v59  ;;  %v7864_v62 = vpop.f32.mrb[2].mxu0  ;;  %v7935_v4 = vpop.f32.mrb[50].mxu1 }
 0x29b   :  { %v8005_v63 = vadd.f32 %v8004_v6, %v7999_v60  ;;  %v7956_v9 = vadd.f32 %v7950_v42, %v7864_v62  ;;  %v7945_v10 = vadd.f32 %v7935_v4, %v7628_v40  ;;  %v7866_v1 = vpop.f32.mrb[3].mxu0  ;;  %v17781_v13 = vpop.f32.mrb[51].mxu1 }
 0x29c   :  { %v7957_v14 = vadd.f32 %v7950_v42, %v7866_v1 }
 0x29d   :  { %v8006_v15 = vadd.f32 %v8005_v63, %v8000_v61  ;;  %v8001_v16 = vmul.f32 %v19556_v5, %v7956_v9  ;;  %v7958_v17 = vadd.f32 %v7950_v42, %v7945_v10 }
 0x29e   :  { %v8002_v21 = vmul.f32 %v19559_v0, %v7957_v14 }
 0x29f   :  { %v8007_v22 = vadd.f32 %v8006_v15, %v8001_v16  ;;  %v8003_v23 = vmul.f32 %v19562_v20, %v7958_v17 }
 0x2a1   :  { %v8008_v24 = vadd.f32 %v8007_v22, %v8002_v21 }
 0x2a3   :  { %v8009_v25 = vadd.f32 %v8008_v24, %v8003_v23 }
 0x2a5   :  { %8010 = vadd.xlane.f32.xlu1 %v8009_v25 }
 0x2b6   :  { %8054 = vperm.xlu1 %18228, %v7959_v26  }
 0x2ba   :  { %8129 = vperm.xlu1 %18228, %v8126_v27  }
 0x332   :  { %v8011_v28 = vpop.xlane.xlu1 %8010 }
 0x333   :  { %v8012_v3 = vmul.f32 0.001953125, %v8011_v28 }
 0x335   :  { %v8013_v12 = vsub.f32 %v7997_v50, %v8012_v3  ;;  %v8014_v29 = vsub.f32 %v7998_v53, %v8012_v3  ;;  %v8015_v18 = vsub.f32 %v7999_v60, %v8012_v3  ;;  %v8016_v19 = vsub.f32 %v8000_v61, %v8012_v3 }
 0x336   :  { %v8017_v30 = vsub.f32 %v8001_v16, %v8012_v3  ;;  %v8018_v34 = vsub.f32 %v8002_v21, %v8012_v3  ;;  %v8019_v38 = vsub.f32 %v8003_v23, %v8012_v3  ;;  %v8055_v63 = vpop.permute.xlu1 %8054 }
 0x337   :  { %v8020_v31 = vmul.f32 %v8013_v12, %v19545_v43  ;;  %v8021_v32 = vmul.f32 %v8014_v29, %v19547_v46  ;;  %v8022_v33 = vmul.f32 %v8015_v18, %v19550_v51  ;;  %v8023_v35 = vmul.f32 %v8016_v19, %v19553_v55 }
 0x338   :  { %v8024_v39 = vmul.f32 %v8017_v30, %v19556_v5  ;;  %v8025_v42 = vmul.f32 %v8018_v34, %v19559_v0  ;;  %v8026_v47 = vmul.f32 %v8019_v38, %v19562_v20 }
 0x339   :  { %v8027_v36 = vmul.f32 %v8020_v31, %v8020_v31  ;;  %v8028_v37 = vmul.f32 %v8021_v32, %v8021_v32  ;;  %v8029_v40 = vmul.f32 %v8022_v33, %v8022_v33  ;;  %v8030_v44 = vmul.f32 %v8023_v35, %v8023_v35 }
 0x33a   :  { %v8031_v48 = vmul.f32 %v8024_v39, %v8024_v39  ;;  %v8032_v8 = vmul.f32 %v8025_v42, %v8025_v42  ;;  %v8033_v52 = vmul.f32 %v8026_v47, %v8026_v47 }
 0x33b   :  { %v8034_v41 = vadd.f32 %v8028_v37, %v8027_v36 }
 0x33d   :  { %v8035_v45 = vadd.f32 %v8034_v41, %v8029_v40 }
 0x33f   :  { %v8036_v49 = vadd.f32 %v8035_v45, %v8030_v44 }
 0x341   :  { %v8037_v50 = vadd.f32 %v8036_v49, %v8031_v48 }
 0x343   :  { %v8038_v53 = vadd.f32 %v8037_v50, %v8032_v8 }
 0x345   :  { %v8039_v54 = vadd.f32 %v8038_v53, %v8033_v52 }
 0x347   :  { %8040 = vadd.xlane.f32.xlu0 %v8039_v54 }
 0x35d   :  { %8066 = vperm.xlu0 %18227, %v7960_v56  }
 0x361   :  { %8492 = vperm.xlu0 %18227, %v8418_v57  }
 0x3d4   :  { %v8041_v58 = vpop.xlane.xlu0 %8040 }
 0x3d5   :  { %v8042_v6 = vmul.f32 0.001953125, %v8041_v58 }
 0x3d7   :  { %v8043_v59 = vadd.f32 1e-05, %v8042_v6 }
 0x3d9   :  { %18229 = vrsqrt.f32 %v8043_v59 }
 0x3dc   :  { %v8067_v17 = vpop.permute.xlu0 %8066 }
 0x3e3   :  { %v18230_v60 = vpop.eup %18229 }
 0x3e4   :  { %v8046_v7 = vmul.f32 %v18230_v60, %v8014_v29  ;;  %v8048_v61 = vmul.f32 %v18230_v60, %v8016_v19  ;;  %v8045_v62 = vmul.f32 %v18230_v60, %v8013_v12  ;;  %v8047_v4 = vmul.f32 %v18230_v60, %v8015_v18 }
 0x3e5   :  { %v8050_v9 = vmul.f32 %v18230_v60, %v8018_v34  ;;  %v8049_v10 = vmul.f32 %v18230_v60, %v8017_v30  ;;  %v8051_v1 = vmul.f32 %v18230_v60, %v8019_v38 }
 0x3e6   :  { %v8058_v13 = vmul.f32 %v8055_v63, %v8046_v7  ;;  %v8060_v14 = vmul.f32 %v8055_v63, %v8048_v61  ;;  %v8057_v15 = vmul.f32 %v8055_v63, %v8045_v62  ;;  %v8059_v16 = vmul.f32 %v8055_v63, %v8047_v4  ;;  %v8125_v4 = vld [vmem:[%s20916_s6] sm:$0xf]  ;;  %s20964_s6 = smov 109  }
 0x3e7   :  { %v8062_v21 = vmul.f32 %v8055_v63, %v8050_v9  ;;  %v8061_v22 = vmul.f32 %v8055_v63, %v8049_v10  ;;  %v8063_v23 = vmul.f32 %v8055_v63, %v8051_v1 }
 0x3e8   :  { %v8070_v24 = vadd.f32 %v8067_v17, %v8058_v13  ;;  %v8072_v25 = vadd.f32 %v8067_v17, %v8060_v14  ;;  %v8069_v26 = vadd.f32 %v8067_v17, %v8057_v15  ;;  %v8071_v27 = vadd.f32 %v8067_v17, %v8059_v16  ;;  %v8130_v16 = vpop.permute.xlu1 %8129 }
 0x3e9   :  { %v8074_v28 = vadd.f32 %v8067_v17, %v8062_v21  ;;  %v19585_v3 = vadd.f32 %v8067_v17, %v8061_v22  ;;  %v19587_v12 = vadd.f32 %v8067_v17, %v8063_v23 }
 0x3ea   :  { %v8077_v29 = vsub.f32 0.0, %v8070_v24  ;;  %v8079_v18 = vsub.f32 0.0, %v8072_v25  ;;  %v8076_v19 = vsub.f32 0.0, %v8069_v26  ;;  %v8078_v30 = vsub.f32 0.0, %v8071_v27 }
 0x3eb   :  { %v8081_v31 = vsub.f32 0.0, %v8074_v28  ;;  %v8080_v32 = vsub.f32 0.0, %v19585_v3  ;;  %v8082_v33 = vsub.f32 0.0, %v19587_v12 }
 0x3ec   :  { %v8085_v34 = vmul.f32 1.442695, %v8077_v29  ;;  %v8089_v35 = vmul.f32 1.442695, %v8079_v18  ;;  %v8083_v36 = vmul.f32 1.442695, %v8076_v19 }
 0x3ed   :  { %v8087_v37 = vmul.f32 1.442695, %v8078_v30  ;;  %v8093_v38 = vmul.f32 1.442695, %v8081_v31  ;;  %v8091_v39 = vmul.f32 1.442695, %v8080_v32 }
 0x3ee   :  { %18231 = vpow2.f32 %v8085_v34  ;;  %v8095_v40 = vmul.f32 1.442695, %v8082_v33 }
 0x3ef   :  { %18233 = vpow2.f32 %v8089_v35 }
 0x3f0   :  { %18235 = vpow2.f32 %v8083_v36 }
 0x3f1   :  { %18237 = vpow2.f32 %v8087_v37 }
 0x3f2   :  { %18239 = vpow2.f32 %v8093_v38 }
 0x3f3   :  { %18241 = vpow2.f32 %v8091_v39 }
 0x3f4   :  { %18243 = vpow2.f32 %v8095_v40 }
 0x3f8   :  { %v18232_v41 = vpop.eup %18231 }
 0x3f9   :  { %v18234_v42 = vpop.eup %18233  ;;  %v8098_v44 = vadd.f32 1.0, %v18232_v41 }
 0x3fa   :  { %v18236_v45 = vpop.eup %18235  ;;  %v8100_v47 = vadd.f32 1.0, %v18234_v42 }
 0x3fb   :  { %v18238_v48 = vpop.eup %18237  ;;  %18245 = vrcp.f32 %v8098_v44  ;;  %v8097_v49 = vadd.f32 1.0, %v18236_v45 }
 0x3fc   :  { %v18240_v8 = vpop.eup %18239  ;;  %18247 = vrcp.f32 %v8100_v47  ;;  %v8099_v50 = vadd.f32 1.0, %v18238_v48 }
 0x3fd   :  { %v18242_v52 = vpop.eup %18241  ;;  %18249 = vrcp.f32 %v8097_v49  ;;  %v8102_v53 = vadd.f32 1.0, %v18240_v8 }
 0x3fe   :  { %v18244_v54 = vpop.eup %18243  ;;  %18251 = vrcp.f32 %v8099_v50  ;;  %v8101_v56 = vadd.f32 1.0, %v18242_v52 }
 0x3ff   :  { %18253 = vrcp.f32 %v8102_v53  ;;  %v8103_v57 = vadd.f32 1.0, %v18244_v54  ;;  %v8419_v53 = vld [vmem:[%s20917_s9] sm:$0xf] }
 0x400   :  { %18255 = vrcp.f32 %v8101_v56 }
 0x401   :  { %18257 = vrcp.f32 %v8103_v57 }
 0x405   :  { %v18246_v58 = vpop.eup %18245 }
 0x406   :  { %v18248_v6 = vpop.eup %18247  ;;  %v8119_v59 = vmul.f32 %v18246_v58, %v8070_v24 }
 0x407   :  { %v18250_v60 = vpop.eup %18249  ;;  %v8121_v7 = vmul.f32 %v18248_v6, %v8072_v25 }
 0x408   :  { %v18252_v61 = vpop.eup %18251  ;;  %8135 = vmatprep.subr.mxu0 %v8119_v59  ;;  %v8118_v62 = vmul.f32 %v18250_v60, %v8069_v26 }
 0x409   :  { %v18254_v63 = vpop.eup %18253  ;;  %8206 = vmatprep.subr.mxu1 %v8121_v7  ;;  %v8120_v9 = vmul.f32 %v18252_v61, %v8071_v27 }
 0x40a   :  { %v18256_v10 = vpop.eup %18255  ;;  %8136 = vmatpush1.msra.mxu0 %v8118_v62  ;;  %v8123_v1 = vmul.f32 %v18254_v63, %v8074_v28 }
 0x40b   :  { %v18258_v13 = vpop.eup %18257  ;;  %8207 = vmatpush1.msra.mxu1 %v8120_v9  ;;  %17252 = vmatmul.mubr.msk.f32.vlgmr.msra.gmra.mrb[4].mxu0 %vm104_vm1, %v8125_v4  ;;  %v8122_v14 = vmul.f32 %v18256_v10, %v19585_v3 }
 0x40c   :  { %17253 = vmatmul.mubr.msk.f32.vlgmr.msra.gmra.mrb[52].mxu1 %vm104_vm1, %v8125_v4  ;;  %8277 = vmatprep.subr.mxu0 %v8123_v1  ;;  %v8124_v15 = vmul.f32 %v18258_v13, %v19587_v12 }
 0x40d   :  { %17782 = vmatprep.subr.mxu1 %v18333_v2  ;;  %8278 = vmatpush1.msra.mxu0 %v8122_v14 }
 0x40e   :  { %17783 = vmatpush3.msra.mxu1 %v8124_v15  ;;  %8341 = vmatprep.mubr.f32.mxu0 %v18333_v2 }
 0x40f   :  { %17784 = vmatprep.mubr.msk.f32.mxu1 %vm18344_vm3, %v18333_v2  ;;  %17254 = vmatmul.mubr.msk.f32.vlgmr.msra.gmra.mrb[6].mxu0 %vm104_vm1, %v8125_v4 }
 0x410   :  { %17785 = vmatmul.mubr.msk.f32.vlgmr.msra.gmra.mrb[54].mxu1 %vm104_vm1, %v8125_v4  ;;  %8704 = vmatprep.mubr.f32.mxu0 %v18333_v2  ;;  %vm8615_vm1 = vcmask 31744  }
 0x411   :  { %8775 = vmatprep.mubr.f32.mxu1 %v18333_v2 }
 0x4de   :  { %v8201_v17 = vpop.f32.mrb[4].mxu0 }
 0x4df   :  { %v8202_v21 = vadd.f32 %v8201_v17, %v8130_v16  ;;  %v8272_v22 = vpop.f32.mrb[52].mxu1  ;;  %v8203_v23 = vpop.f32.mrb[5].mxu0 }
 0x4e0   :  { %v8273_v24 = vadd.f32 %v8272_v22, %v8130_v16  ;;  %v8204_v25 = vadd.f32 %v8203_v23, %v8130_v16  ;;  %v8274_v26 = vpop.f32.mrb[53].mxu1 }
 0x4e1   :  { %v8420_v27 = vmul.f32 %v8202_v21, %v19545_v43  ;;  %v8275_v28 = vadd.f32 %v8274_v26, %v8130_v16 }
 0x4e2   :  { %v8422_v3 = vmul.f32 %v8273_v24, %v19550_v51  ;;  %v8421_v12 = vmul.f32 %v8204_v25, %v19547_v46  ;;  %v8343_v29 = vpop.f32.mrb[6].mxu0 }
 0x4e3   :  { %v8428_v18 = vsel %vm8427_vm15, %v8420_v27, 0.0  ;;  %v8344_v19 = vadd.f32 %v8343_v29, %v8130_v16  ;;  %v8414_v30 = vpop.f32.mrb[54].mxu1  ;;  %v8345_v31 = vpop.f32.mrb[7].mxu0  ;;  %v8423_v33 = vmul.f32 %v8275_v28, %v19553_v55 }
 0x4e4   :  { %v8429_v32 = vsel %vm8427_vm15, %v8421_v12, 0.0  ;;  %v8346_v34 = vadd.f32 %v8345_v31, %v8130_v16  ;;  %v17786_v35 = vpop.f32.mrb[55].mxu1  ;;  %v8431_v37 = vsel %vm8427_vm15, %v8422_v3, 0.0  ;;  %v8415_v39 = vadd.f32 %v8414_v30, %v8130_v16 }
 0x4e5   :  { %v8430_v36 = vadd.f32 %v8429_v32, %v8428_v18  ;;  %v8424_v38 = vmul.f32 %v8344_v19, %v19556_v5  ;;  %v8433_v41 = vsel %vm8427_vm15, %v8423_v33, 0.0 }
 0x4e6   :  { %v8425_v42 = vmul.f32 %v8346_v34, %v19559_v0  ;;  %v8426_v47 = vmul.f32 %v8415_v39, %v19562_v20 }
 0x4e7   :  { %v8432_v40 = vadd.f32 %v8431_v37, %v8430_v36  ;;  %v8435_v45 = vsel %vm8427_vm15, %v8424_v38, 0.0 }
 0x4e8   :  { %v8437_v49 = vsel %vm8427_vm15, %v8425_v42, 0.0  ;;  %v8439_v50 = vsel %vm8427_vm15, %v8426_v47, 0.0 }
 0x4e9   :  { %v8434_v44 = vadd.f32 %v8433_v41, %v8432_v40 }
 0x4eb   :  { %v8436_v48 = vadd.f32 %v8435_v45, %v8434_v44 }
 0x4ed   :  { %v8438_v8 = vadd.f32 %v8437_v49, %v8436_v48 }
 0x4ef   :  { %v8440_v52 = vadd.f32 %v8439_v50, %v8438_v8 }
 0x4f1   :  { %8441 = vadd.xlane.f32.xlu1 %v8440_v52 }
 0x502   :  { %8504 = vperm.xlu1 %18228, %v8419_v53  }
 0x57e   :  { %v8442_v54 = vpop.xlane.xlu1 %8441 }
 0x57f   :  { %v8443_v56 = vmul.f32 0.001953125, %v8442_v54 }
 0x581   :  { %v8444_v57 = vsub.f32 %v8420_v27, %v8443_v56  ;;  %v8445_v58 = vsub.f32 %v8421_v12, %v8443_v56  ;;  %v8446_v6 = vsub.f32 %v8422_v3, %v8443_v56  ;;  %v8447_v59 = vsub.f32 %v8423_v33, %v8443_v56  ;;  %v8493_v33 = vpop.permute.xlu0 %8492 }
 0x582   :  { %v8448_v60 = vsub.f32 %v8424_v38, %v8443_v56  ;;  %v8449_v7 = vsub.f32 %v8425_v42, %v8443_v56  ;;  %v8450_v9 = vsub.f32 %v8426_v47, %v8443_v56  ;;  %v8505_v50 = vpop.permute.xlu1 %8504 }
 0x583   :  { %v8451_v61 = vmul.f32 %v8444_v57, %v19545_v43  ;;  %v8452_v62 = vmul.f32 %v8445_v58, %v19547_v46  ;;  %v8453_v4 = vmul.f32 %v8446_v6, %v19550_v51  ;;  %v8454_v63 = vmul.f32 %v8447_v59, %v19553_v55 }
 0x584   :  { %v8455_v10 = vmul.f32 %v8448_v60, %v19556_v5  ;;  %v8456_v15 = vmul.f32 %v8449_v7, %v19559_v0  ;;  %v8457_v23 = vmul.f32 %v8450_v9, %v19562_v20 }
 0x585   :  { %v8458_v1 = vmul.f32 %v8451_v61, %v8451_v61  ;;  %v8459_v13 = vmul.f32 %v8452_v62, %v8452_v62  ;;  %v8460_v14 = vmul.f32 %v8453_v4, %v8453_v4  ;;  %v8461_v16 = vmul.f32 %v8454_v63, %v8454_v63 }
 0x586   :  { %v8462_v24 = vmul.f32 %v8455_v10, %v8455_v10  ;;  %v8463_v27 = vmul.f32 %v8456_v15, %v8456_v15  ;;  %v8464_v12 = vmul.f32 %v8457_v23, %v8457_v23 }
 0x587   :  { %v8465_v17 = vsel %vm8427_vm15, %v8458_v1, 0.0  ;;  %v8466_v21 = vsel %vm8427_vm15, %v8459_v13, 0.0  ;;  %v8468_v25 = vsel %vm8427_vm15, %v8460_v14, 0.0  ;;  %v8470_v28 = vsel %vm8427_vm15, %v8461_v16, 0.0 }
 0x588   :  { %v8467_v22 = vadd.f32 %v8466_v21, %v8465_v17  ;;  %v8472_v29 = vsel %vm8427_vm15, %v8462_v24, 0.0  ;;  %v8474_v19 = vsel %vm8427_vm15, %v8463_v27, 0.0  ;;  %v8476_v31 = vsel %vm8427_vm15, %v8464_v12, 0.0 }
 0x58a   :  { %v8469_v26 = vadd.f32 %v8468_v25, %v8467_v22 }
 0x58c   :  { %v8471_v3 = vadd.f32 %v8470_v28, %v8469_v26 }
 0x58e   :  { %v8473_v18 = vadd.f32 %v8472_v29, %v8471_v3 }
 0x590   :  { %v8475_v30 = vadd.f32 %v8474_v19, %v8473_v18 }
 0x592   :  { %v8477_v32 = vadd.f32 %v8476_v31, %v8475_v30 }
 0x594   :  { %8478 = vadd.xlane.f32.xlu0 %v8477_v32 }
 0x621   :  { %v8479_v34 = vpop.xlane.xlu0 %8478 }
 0x622   :  { %v8480_v35 = vmul.f32 0.001953125, %v8479_v34 }
 0x624   :  { %v8481_v36 = vadd.f32 1e-05, %v8480_v35 }
 0x626   :  { %18259 = vrsqrt.f32 %v8481_v36 }
 0x630   :  { %v18260_v37 = vpop.eup %18259 }
 0x631   :  { %v8483_v38 = vmul.f32 %v18260_v37, %v8444_v57  ;;  %v8484_v39 = vmul.f32 %v18260_v37, %v8445_v58  ;;  %v8485_v40 = vmul.f32 %v18260_v37, %v8446_v6  ;;  %v8486_v41 = vmul.f32 %v18260_v37, %v8447_v59 }
 0x632   :  { %v8487_v42 = vmul.f32 %v18260_v37, %v8448_v60  ;;  %v8488_v44 = vmul.f32 %v18260_v37, %v8449_v7  ;;  %v8489_v45 = vmul.f32 %v18260_v37, %v8450_v9 }
 0x633   :  { %v8495_v47 = vmul.f32 %v8493_v33, %v8483_v38  ;;  %v8496_v48 = vmul.f32 %v8493_v33, %v8484_v39  ;;  %v8497_v49 = vmul.f32 %v8493_v33, %v8485_v40  ;;  %v8498_v8 = vmul.f32 %v8493_v33, %v8486_v41 }
 0x634   :  { %v8499_v52 = vmul.f32 %v8493_v33, %v8487_v42  ;;  %v8500_v53 = vmul.f32 %v8493_v33, %v8488_v44  ;;  %v8501_v54 = vmul.f32 %v8493_v33, %v8489_v45 }
 0x635   :  { %v8507_v56 = vadd.f32 %v8505_v50, %v8495_v47  ;;  %v8508_v61 = vadd.f32 %v8505_v50, %v8496_v48  ;;  %v8509_v62 = vadd.f32 %v8505_v50, %v8497_v49  ;;  %v8510_v4 = vadd.f32 %v8505_v50, %v8498_v8 }
 0x636   :  { %v8511_v63 = vadd.f32 %v8505_v50, %v8499_v52  ;;  %v19637_v57 = vadd.f32 %v8505_v50, %v8500_v53  ;;  %v8513_v58 = vadd.f32 %v8505_v50, %v8501_v54 }
 0x637   :  { %v8514_v6 = vsub.f32 0.0, %v8507_v56  ;;  %v8515_v59 = vsub.f32 0.0, %v8508_v61  ;;  %v8516_v60 = vsub.f32 0.0, %v8509_v62  ;;  %v8517_v7 = vsub.f32 0.0, %v8510_v4 }
 0x638   :  { %v8518_v9 = vsub.f32 0.0, %v8511_v63  ;;  %v8519_v10 = vsub.f32 0.0, %v19637_v57  ;;  %v8520_v1 = vsub.f32 0.0, %v8513_v58 }
 0x639   :  { %v8521_v13 = vmul.f32 1.442695, %v8514_v6  ;;  %v8523_v14 = vmul.f32 1.442695, %v8515_v59  ;;  %v8525_v15 = vmul.f32 1.442695, %v8516_v60 }
 0x63a   :  { %v8527_v16 = vmul.f32 1.442695, %v8517_v7  ;;  %v8529_v17 = vmul.f32 1.442695, %v8518_v9  ;;  %v8531_v21 = vmul.f32 1.442695, %v8519_v10 }
 0x63b   :  { %18261 = vpow2.f32 %v8521_v13  ;;  %v8533_v22 = vmul.f32 1.442695, %v8520_v1 }
 0x63c   :  { %18263 = vpow2.f32 %v8523_v14 }
 0x63d   :  { %18265 = vpow2.f32 %v8525_v15 }
 0x63e   :  { %18267 = vpow2.f32 %v8527_v16 }
 0x63f   :  { %18269 = vpow2.f32 %v8529_v17 }
 0x640   :  { %18271 = vpow2.f32 %v8531_v21 }
 0x641   :  { %18273 = vpow2.f32 %v8533_v22 }
 0x645   :  { %v18262_v23 = vpop.eup %18261 }
 0x646   :  { %v18264_v24 = vpop.eup %18263  ;;  %v8535_v25 = vadd.f32 1.0, %v18262_v23  ;;  %v8591_v23 = vld [vmem:[%s20918_s10] sm:$0xff] }
 0x647   :  { %v18266_v26 = vpop.eup %18265  ;;  %v8536_v27 = vadd.f32 1.0, %v18264_v24 }
 0x648   :  { %v18268_v28 = vpop.eup %18267  ;;  %v8537_v3 = vadd.f32 1.0, %v18266_v26  ;;  %18275 = vrcp.f32 %v8535_v25 }
 0x649   :  { %v18270_v12 = vpop.eup %18269  ;;  %v8538_v29 = vadd.f32 1.0, %v18268_v28  ;;  %18277 = vrcp.f32 %v8536_v27 }
 0x64a   :  { %v18272_v18 = vpop.eup %18271  ;;  %v8539_v19 = vadd.f32 1.0, %v18270_v12  ;;  %18279 = vrcp.f32 %v8537_v3 }
 0x64b   :  { %v18274_v30 = vpop.eup %18273  ;;  %18281 = vrcp.f32 %v8538_v29  ;;  %v8540_v32 = vadd.f32 1.0, %v18272_v18 }
 0x64c   :  { %v8541_v31 = vadd.f32 1.0, %v18274_v30  ;;  %18283 = vrcp.f32 %v8539_v19 }
 0x64e   :  { %18285 = vrcp.f32 %v8541_v31 }
 0x64f   :  { %18287 = vrcp.f32 %v8540_v32 }
 0x652   :  { %v18276_v33 = vpop.eup %18275 }
 0x653   :  { %v18278_v34 = vpop.eup %18277  ;;  %v8556_v35 = vmul.f32 %v18276_v33, %v8507_v56 }
 0x654   :  { %v18280_v36 = vpop.eup %18279  ;;  %v8557_v37 = vmul.f32 %v18278_v34, %v8508_v61  ;;  %v17279_v34 = vld [vmem:[%s20918_s10 + $0x10] sm:$0xff] }
 0x655   :  { %v19641_v38 = vmul.f32 %v8556_v35, %v19545_v43  ;;  %v18282_v39 = vpop.eup %18281  ;;  %v8558_v40 = vmul.f32 %v18280_v36, %v8509_v62 }
 0x656   :  { %v19644_v41 = vmul.f32 %v8557_v37, %v19547_v46  ;;  %v18284_v42 = vpop.eup %18283  ;;  %v8559_v49 = vmul.f32 %v18282_v39, %v8510_v4 }
 0x657   :  { %8592 = vrot.lane.b32.xlu1 %v19641_v38, %s18334_s17  ;;  %v8560_v47 = vmul.f32 %v18284_v42, %v8511_v63  ;;  %v19651_v48 = vmul.f32 %v8558_v40, %v19550_v51 }
 0x658   :  { %v18286_v44 = vpop.eup %18285  ;;  %8594 = vrot.lane.b32.xlu0 %v19644_v41, %s18334_s17  ;;  %v19665_v54 = vmul.f32 %v8559_v49, %v19553_v55 }
 0x659   :  { %v8562_v45 = vmul.f32 %v18286_v44, %v8513_v58  ;;  %v18288_v50 = vpop.eup %18287  ;;  %v19661_v52 = vmul.f32 %v8560_v47, %v19556_v5  ;;  %v17256_v58 = vld [vmem:[%s20918_s10 + $0x8] sm:$0xff] }
 0x65a   :  { %v8561_v53 = vmul.f32 %v18288_v50, %v19637_v57 }
 0x65b   :  { %v19654_v8 = vmul.f32 %v8562_v45, %v19562_v20 }
 0x65c   :  { %8596 = vrot.lane.b32.xlu0 %v19651_v48, %s18334_s17  ;;  %v19672_v56 = vmul.f32 %v8561_v53, %v19559_v0 }
 0x65d   :  { %8604 = vrot.lane.b32.xlu1 %v19654_v8, %s18334_s17 }
 0x660   :  { %8600 = vrot.lane.b32.xlu0 %v19661_v52, %s18334_s17 }
 0x661   :  { %8598 = vrot.lane.b32.xlu1 %v19665_v54, %s18334_s17 }
 0x664   :  { %8570 = vrot.lane.b32.xlu0 %v19641_v38, %s18335_s28 }
 0x665   :  { %8602 = vrot.lane.b32.xlu1 %v19672_v56, %s18334_s17  ;;  %s20965_s17 = smov 108  }
 0x668   :  { %8582 = vrot.lane.b32.xlu0 %v19654_v8, %s18335_s28 }
 0x669   :  { %8572 = vrot.lane.b32.xlu1 %v19644_v41, %s18335_s28 }
 0x66c   :  { %8576 = vrot.lane.b32.xlu0 %v19665_v54, %s18335_s28 }
 0x66d   :  { %8574 = vrot.lane.b32.xlu1 %v19651_v48, %s18335_s28 }
 0x670   :  { %8580 = vrot.lane.b32.xlu0 %v19672_v56, %s18335_s28 }
 0x671   :  { %8578 = vrot.lane.b32.xlu1 %v19661_v52, %s18335_s28  ;;  %s20958_s28 = smov 18  }
 0x674   :  { %9232 = vrot.lane.b32.xlu0 %v19644_v41, %s18336_s29 }
 0x675   :  { %9230 = vrot.lane.b32.xlu1 %v19641_v38, %s18336_s29 }
 0x678   :  { %9234 = vrot.lane.b32.xlu0 %v19651_v48, %s18336_s29 }
 0x679   :  { %9242 = vrot.lane.b32.xlu1 %v19654_v8, %s18336_s29 }
 0x67c   :  { %9238 = vrot.lane.b32.xlu0 %v19661_v52, %s18336_s29 }
 0x67d   :  { %9236 = vrot.lane.b32.xlu1 %v19665_v54, %s18336_s29 }
 0x680   :  { %9567 = vrot.lane.b32.xlu0 %v19641_v38, %s18337_s30 }
 0x681   :  { %9240 = vrot.lane.b32.xlu1 %v19672_v56, %s18336_s29 }
 0x684   :  { %9579 = vrot.lane.b32.xlu0 %v19654_v8, %s18337_s30 }
 0x685   :  { %9569 = vrot.lane.b32.xlu1 %v19644_v41, %s18337_s30 }
 0x688   :  { %9573 = vrot.lane.b32.xlu0 %v19665_v54, %s18337_s30 }
 0x689   :  { %9571 = vrot.lane.b32.xlu1 %v19651_v48, %s18337_s30 }
 0x68c   :  { %9577 = vrot.lane.b32.xlu0 %v19672_v56, %s18337_s30 }
 0x68d   :  { %9575 = vrot.lane.b32.xlu1 %v19661_v52, %s18337_s30  ;;  %s20966_s30 = smov 107  }
 0x690   :  { %9906 = vrot.lane.b32.xlu0 %v19644_v41, %s18338_s15 }
 0x691   :  { %9904 = vrot.lane.b32.xlu1 %v19641_v38, %s18338_s15 }
 0x694   :  { %9908 = vrot.lane.b32.xlu0 %v19651_v48, %s18338_s15 }
 0x695   :  { %9916 = vrot.lane.b32.xlu1 %v19654_v8, %s18338_s15 }
 0x698   :  { %9912 = vrot.lane.b32.xlu0 %v19661_v52, %s18338_s15 }
 0x699   :  { %9910 = vrot.lane.b32.xlu1 %v19665_v54, %s18338_s15 }
 0x69c   :  { %10241 = vrot.lane.b32.xlu0 %v19641_v38, %s18339_s16 }
 0x69d   :  { %9914 = vrot.lane.b32.xlu1 %v19672_v56, %s18338_s15  ;;  %s20959_s15 = smov 2  }
 0x6a0   :  { %10253 = vrot.lane.b32.xlu0 %v19654_v8, %s18339_s16 }
 0x6a1   :  { %10243 = vrot.lane.b32.xlu1 %v19644_v41, %s18339_s16 }
 0x6a4   :  { %10247 = vrot.lane.b32.xlu0 %v19665_v54, %s18339_s16 }
 0x6a5   :  { %10245 = vrot.lane.b32.xlu1 %v19651_v48, %s18339_s16 }
 0x6a8   :  { %10251 = vrot.lane.b32.xlu0 %v19672_v56, %s18339_s16 }
 0x6a9   :  { %10249 = vrot.lane.b32.xlu1 %v19661_v52, %s18339_s16 }
 0x6ac   :  { %10580 = vrot.lane.b32.xlu0 %v19644_v41, %s18340_s18 }
 0x6ad   :  { %10578 = vrot.lane.b32.xlu1 %v19641_v38, %s18340_s18 }
 0x6b0   :  { %10582 = vrot.lane.b32.xlu0 %v19651_v48, %s18340_s18 }
 0x6b1   :  { %10590 = vrot.lane.b32.xlu1 %v19654_v8, %s18340_s18 }
 0x6b4   :  { %10586 = vrot.lane.b32.xlu0 %v19661_v52, %s18340_s18 }
 0x6b5   :  { %10584 = vrot.lane.b32.xlu1 %v19665_v54, %s18340_s18 }
 0x6b8   :  { %10915 = vrot.lane.b32.xlu0 %v19641_v38, %s18341_s19 }
 0x6b9   :  { %10588 = vrot.lane.b32.xlu1 %v19672_v56, %s18340_s18  ;;  %s20967_s18 = smov 106  }
 0x6bc   :  { %10927 = vrot.lane.b32.xlu0 %v19654_v8, %s18341_s19 }
 0x6bd   :  { %10917 = vrot.lane.b32.xlu1 %v19644_v41, %s18341_s19 }
 0x6c0   :  { %10921 = vrot.lane.b32.xlu0 %v19665_v54, %s18341_s19 }
 0x6c1   :  { %10919 = vrot.lane.b32.xlu1 %v19651_v48, %s18341_s19 }
 0x6c4   :  { %10925 = vrot.lane.b32.xlu0 %v19672_v56, %s18341_s19 }
 0x6c5   :  { %10923 = vrot.lane.b32.xlu1 %v19661_v52, %s18341_s19  ;;  %s20960_s19 = smov 1  }
 0x6c8   :  { %11254 = vrot.lane.b32.xlu0 %v19644_v41, %s18342_s20 }
 0x6c9   :  { %11252 = vrot.lane.b32.xlu1 %v19641_v38, %s18342_s20  ;;  %v8593_v61 = vpop.permute.xlu1 %8592 }
 0x6ca   :  { %v8595_v62 = vpop.permute.xlu0 %8594 }
 0x6cb   :  { %v8611_v4 = vsel %vm94_vm0, %v8593_v61, %v8595_v62 }
 0x6cc   :  { %11256 = vrot.lane.b32.xlu0 %v19651_v48, %s18342_s20  ;;  %17257 = vmatprep.subr.msk.mxu0 %vm8427_vm15, %v8611_v4  ;;  %v17291_v4 = vld [vmem:[%s20918_s10 + $0x18] sm:$0xff] }
 0x6cd   :  { %11264 = vrot.lane.b32.xlu1 %v19654_v8, %s18342_s20 }
 0x6ce   :  { %v8597_v63 = vpop.permute.xlu0 %8596 }
 0x6cf   :  { %v8605_v57 = vpop.permute.xlu1 %8604  ;;  %v8610_v9 = vsel %vm94_vm0, %v8595_v62, %v8597_v63 }
 0x6d0   :  { %v8612_v6 = vsel %vm94_vm0, %v8605_v57, %v8593_v61  ;;  %11260 = vrot.lane.b32.xlu0 %v19661_v52, %s18342_s20 }
 0x6d1   :  { %11258 = vrot.lane.b32.xlu1 %v19665_v54, %s18342_s20  ;;  %17258 = vmatpush1.msk.msra.mxu0 %vm8427_vm15, %v8612_v6 }
 0x6d2   :  { %v8601_v59 = vpop.permute.xlu0 %8600  ;;  %17259 = vmatmul.mubr.msk.f32.vlgmr.msra.gmra.mrb[8].mxu0 %vm8615_vm1, %v17256_v58 }
 0x6d3   :  { %v8599_v60 = vpop.permute.xlu1 %8598  ;;  %8846 = vmatprep.mubr.f32.mxu0 %v18333_v2 }
 0x6d4   :  { %11589 = vrot.lane.b32.xlu0 %v19641_v38, %s20958_s28  ;;  %v8609_v7 = vsel %vm94_vm0, %v8597_v63, %v8599_v60  ;;  %v8608_v15 = vsel %vm94_vm0, %v8599_v60, %v8601_v59 }
 0x6d5   :  { %11262 = vrot.lane.b32.xlu1 %v19672_v56, %s18342_s20  ;;  %17260 = vmatprep.subr.msk.mxu1 %vm8427_vm15, %v8609_v7 }
 0x6d6   :  { %17261 = vmatpush1.msk.msra.mxu1 %vm8427_vm15, %v8610_v9  ;;  %v8571_v10 = vpop.permute.xlu0 %8570 }
 0x6d7   :  { %v8603_v1 = vpop.permute.xlu1 %8602  ;;  %17787 = vmatprep.subr.mxu1 %v18333_v2  ;;  %17262 = vmatmul.mubr.msk.f32.vlgmr.msra.gmra.mrb[56].mxu1 %vm8615_vm1, %v17256_v58 }
 0x6d8   :  { %v8606_v13 = vsel %vm94_vm0, %v8603_v1, %v8605_v57  ;;  %11601 = vrot.lane.b32.xlu0 %v19654_v8, %s20958_s28  ;;  %v8607_v14 = vsel %vm94_vm0, %v8601_v59, %v8603_v1  ;;  %17789 = vmatprep.mubr.msk.f32.mxu1 %vm18344_vm3, %v18333_v2  ;;  %vm20968_vm0 = vcmp.lt.s32.totalorder %v18589_v11, 127 }
 0x6d9   :  { %11591 = vrot.lane.b32.xlu1 %v19644_v41, %s20958_s28  ;;  %17263 = vmatprep.subr.msk.mxu0 %vm8427_vm15, %v8607_v14 }
 0x6da   :  { %17788 = vmatpush3.msk.msra.mxu1 %vm8427_vm15, %v8606_v13  ;;  %17264 = vmatpush1.msk.msra.mxu0 %vm8427_vm15, %v8608_v15  ;;  %v8583_v16 = vpop.permute.xlu0 %8582 }
 0x6db   :  { %v8590_v17 = vsel %vm71_vm2, %v8583_v16, %v8571_v10  ;;  %v8573_v21 = vpop.permute.xlu1 %8572  ;;  %17265 = vmatmul.mubr.msk.f32.vlgmr.msra.gmra.mrb[10].mxu0 %vm8615_vm1, %v17256_v58  ;;  %17790 = vmatmul.mubr.msk.f32.vlgmr.msra.gmra.mrb[58].mxu1 %vm8615_vm1, %v17256_v58 }
 0x6dc   :  { %11595 = vrot.lane.b32.xlu0 %v19665_v54, %s20958_s28  ;;  %v8589_v22 = vsel %vm71_vm2, %v8571_v10, %v8573_v21  ;;  %9082 = vmatprep.mubr.f32.mxu1 %v18333_v2 }
 0x6dd   :  { %11593 = vrot.lane.b32.xlu1 %v19651_v48, %s20958_s28  ;;  %17268 = vmatprep.subr.msk.mxu0 %vm8427_vm15, %v8589_v22 }
 0x6de   :  { %17269 = vmatpush1.msk.msra.mxu0 %vm8427_vm15, %v8590_v17  ;;  %v8577_v24 = vpop.permute.xlu0 %8576  ;;  %9011 = vmatprep.mubr.f32.mxu0 %v18333_v2  ;;  %v17303_v17 = vld [vmem:[%s20918_s10 + $0x20] sm:$0xff] }
 0x6df   :  { %v8575_v25 = vpop.permute.xlu1 %8574  ;;  %17270 = vmatmul.mubr.msk.f32.vlgmr.msra.gmra.mrb[8].mxu0 %vm8615_vm1, %v8591_v23 }
 0x6e0   :  { %v8588_v26 = vsel %vm71_vm2, %v8573_v21, %v8575_v25  ;;  %11599 = vrot.lane.b32.xlu0 %v19672_v56, %s20958_s28  ;;  %v8587_v27 = vsel %vm71_vm2, %v8575_v25, %v8577_v24  ;;  %9153 = vmatprep.mubr.f32.mxu0 %v18333_v2 }
 0x6e1   :  { %11597 = vrot.lane.b32.xlu1 %v19661_v52, %s20958_s28  ;;  %17271 = vmatprep.subr.msk.mxu1 %vm8427_vm15, %v8587_v27 }
 0x6e2   :  { %17272 = vmatpush1.msk.msra.mxu1 %vm8427_vm15, %v8588_v26  ;;  %v8581_v28 = vpop.permute.xlu0 %8580 }
 0x6e3   :  { %v8584_v3 = vsel %vm71_vm2, %v8581_v28, %v8583_v16  ;;  %v8579_v12 = vpop.permute.xlu1 %8578  ;;  %17792 = vmatprep.subr.mxu1 %v18333_v2  ;;  %17273 = vmatmul.mubr.msk.f32.vlgmr.msra.gmra.mrb[56].mxu1 %vm8615_vm1, %v8591_v23 }
 0x6e4   :  { %v8586_v29 = vsel %vm71_vm2, %v8577_v24, %v8579_v12  ;;  %11928 = vrot.lane.b32.xlu0 %v19644_v41, %s20959_s15  ;;  %v8585_v18 = vsel %vm71_vm2, %v8579_v12, %v8581_v28  ;;  %17793 = vmatpush3.msk.msra.mxu1 %vm8427_vm15, %v8584_v3  ;;  %vm20969_vm2 = vmmov %vm20968_vm0 }
 0x6e5   :  { %11926 = vrot.lane.b32.xlu1 %v19641_v38, %s20959_s15  ;;  %17274 = vmatprep.subr.msk.mxu0 %vm8427_vm15, %v8585_v18 }
 0x6e6   :  { %17275 = vmatpush1.msk.msra.mxu0 %vm8427_vm15, %v8586_v29  ;;  %v9233_v19 = vpop.permute.xlu0 %9232  ;;  %17794 = vmatprep.mubr.msk.f32.mxu1 %vm18344_vm3, %v18333_v2 }
 0x6e7   :  { %v9231_v30 = vpop.permute.xlu1 %9230  ;;  %17276 = vmatmul.mubr.msk.f32.vlgmr.msra.gmra.mrb[10].mxu0 %vm8615_vm1, %v8591_v23  ;;  %17795 = vmatmul.mubr.msk.f32.vlgmr.msra.gmra.mrb[60].mxu1 %vm8615_vm1, %v8591_v23 }
 0x6e8   :  { %11930 = vrot.lane.b32.xlu0 %v19651_v48, %s20959_s15  ;;  %v9249_v31 = vsel %vm691_vm4, %v9231_v30, %v9233_v19  ;;  %9412 = vmatprep.mubr.f32.mxu1 %v18333_v2 }
 0x6e9   :  { %11938 = vrot.lane.b32.xlu1 %v19654_v8, %s20959_s15  ;;  %17280 = vmatprep.subr.msk.mxu0 %vm8427_vm15, %v9249_v31  ;;  %v17315_v31 = vld [vmem:[%s20918_s10 + $0x28] sm:$0xff] }
 0x6ea   :  { %v9235_v32 = vpop.permute.xlu0 %9234  ;;  %9341 = vmatprep.mubr.f32.mxu0 %v18333_v2 }
 0x6eb   :  { %v9243_v33 = vpop.permute.xlu1 %9242  ;;  %v9248_v40 = vsel %vm691_vm4, %v9233_v19, %v9235_v32 }
 0x6ec   :  { %v9250_v35 = vsel %vm691_vm4, %v9243_v33, %v9231_v30  ;;  %11934 = vrot.lane.b32.xlu0 %v19661_v52, %s20959_s15 }
 0x6ed   :  { %11932 = vrot.lane.b32.xlu1 %v19665_v54, %s20959_s15  ;;  %17281 = vmatpush1.msk.msra.mxu0 %vm8427_vm15, %v9250_v35 }
 0x6ee   :  { %v9239_v36 = vpop.permute.xlu0 %9238  ;;  %17282 = vmatmul.mubr.msk.f32.vlgmr.msra.gmra.mrb[8].mxu0 %vm8615_vm1, %v17279_v34 }
 0x6ef   :  { %v9237_v37 = vpop.permute.xlu1 %9236  ;;  %9483 = vmatprep.mubr.f32.mxu0 %v18333_v2 }
 0x6f0   :  { %12263 = vrot.lane.b32.xlu0 %v19641_v38, %s20960_s19  ;;  %v9247_v39 = vsel %vm691_vm4, %v9235_v32, %v9237_v37  ;;  %v9246_v49 = vsel %vm691_vm4, %v9237_v37, %v9239_v36 }
 0x6f1   :  { %11936 = vrot.lane.b32.xlu1 %v19672_v56, %s20959_s15  ;;  %17283 = vmatprep.subr.msk.mxu1 %vm8427_vm15, %v9247_v39 }
 0x6f2   :  { %17284 = vmatpush1.msk.msra.mxu1 %vm8427_vm15, %v9248_v40  ;;  %v9568_v42 = vpop.permute.xlu0 %9567 }
 0x6f3   :  { %v9241_v44 = vpop.permute.xlu1 %9240  ;;  %17797 = vmatprep.subr.mxu1 %v18333_v2  ;;  %17285 = vmatmul.mubr.msk.f32.vlgmr.msra.gmra.mrb[56].mxu1 %vm8615_vm1, %v17279_v34 }
 0x6f4   :  { %v9244_v45 = vsel %vm691_vm4, %v9241_v44, %v9243_v33  ;;  %12275 = vrot.lane.b32.xlu0 %v19654_v8, %s20960_s19  ;;  %v9245_v47 = vsel %vm691_vm4, %v9239_v36, %v9241_v44  ;;  %17799 = vmatprep.mubr.msk.f32.mxu1 %vm18344_vm3, %v18333_v2  ;;  %vm20970_vm4 = vmmov %vm20968_vm0 }
 0x6f5   :  { %12265 = vrot.lane.b32.xlu1 %v19644_v41, %s20960_s19  ;;  %17286 = vmatprep.subr.msk.mxu0 %vm8427_vm15, %v9245_v47 }
 0x6f6   :  { %17798 = vmatpush3.msk.msra.mxu1 %vm8427_vm15, %v9244_v45  ;;  %17287 = vmatpush1.msk.msra.mxu0 %vm8427_vm15, %v9246_v49  ;;  %v9580_v50 = vpop.permute.xlu0 %9579 }
 0x6f7   :  { %v9587_v53 = vsel %vm1008_vm5, %v9580_v50, %v9568_v42  ;;  %v9570_v61 = vpop.permute.xlu1 %9569  ;;  %17288 = vmatmul.mubr.msk.f32.vlgmr.msra.gmra.mrb[10].mxu0 %vm8615_vm1, %v17279_v34  ;;  %17800 = vmatmul.mubr.msk.f32.vlgmr.msra.gmra.mrb[62].mxu1 %vm8615_vm1, %v17279_v34 }
 0x6f8   :  { %12269 = vrot.lane.b32.xlu0 %v19665_v54, %s20960_s19  ;;  %v9586_v62 = vsel %vm1008_vm5, %v9568_v42, %v9570_v61  ;;  %9749 = vmatprep.mubr.f32.mxu1 %v18333_v2 }
 0x6f9   :  { %12267 = vrot.lane.b32.xlu1 %v19651_v48, %s20960_s19  ;;  %17292 = vmatprep.subr.msk.mxu0 %vm8427_vm15, %v9586_v62 }
 0x6fa   :  { %17293 = vmatpush1.msk.msra.mxu0 %vm8427_vm15, %v9587_v53  ;;  %v9574_v63 = vpop.permute.xlu0 %9573  ;;  %9678 = vmatprep.mubr.f32.mxu0 %v18333_v2  ;;  %v17327_v53 = vld [vmem:[%s20918_s10 + $0x30] sm:$0xff] }
 0x6fb   :  { %v9572_v57 = vpop.permute.xlu1 %9571  ;;  %17294 = vmatmul.mubr.msk.f32.vlgmr.msra.gmra.mrb[8].mxu0 %vm8615_vm1, %v17291_v4 }
 0x6fc   :  { %v9585_v58 = vsel %vm1008_vm5, %v9570_v61, %v9572_v57  ;;  %12273 = vrot.lane.b32.xlu0 %v19672_v56, %s20960_s19  ;;  %v9584_v6 = vsel %vm1008_vm5, %v9572_v57, %v9574_v63  ;;  %9820 = vmatprep.mubr.f32.mxu0 %v18333_v2 }
 0x6fd   :  { %12271 = vrot.lane.b32.xlu1 %v19661_v52, %s20960_s19  ;;  %17295 = vmatprep.subr.msk.mxu1 %vm8427_vm15, %v9584_v6 }
 0x6fe   :  { %17296 = vmatpush1.msk.msra.mxu1 %vm8427_vm15, %v9585_v58  ;;  %v9578_v59 = vpop.permute.xlu0 %9577 }
 0x6ff   :  { %v9581_v60 = vsel %vm1008_vm5, %v9578_v59, %v9580_v50  ;;  %v9576_v7 = vpop.permute.xlu1 %9575  ;;  %17802 = vmatprep.subr.mxu1 %v18333_v2  ;;  %17297 = vmatmul.mubr.msk.f32.vlgmr.msra.gmra.mrb[56].mxu1 %vm8615_vm1, %v17291_v4 }
 0x700   :  { %v9583_v9 = vsel %vm1008_vm5, %v9574_v63, %v9576_v7  ;;  %12920 = vrot.lane.b32.xlu0 %v19651_v48, %s20961_s27  ;;  %v9582_v10 = vsel %vm1008_vm5, %v9576_v7, %v9578_v59  ;;  %17803 = vmatpush3.msk.msra.mxu1 %vm8427_vm15, %v9581_v60  ;;  %vm20971_vm5 = vmmov %vm20968_vm0 }
 0x701   :  { %12918 = vrot.lane.b32.xlu1 %v19644_v41, %s20961_s27  ;;  %17298 = vmatprep.subr.msk.mxu0 %vm8427_vm15, %v9582_v10 }
 0x702   :  { %17299 = vmatpush1.msk.msra.mxu0 %vm8427_vm15, %v9583_v9  ;;  %v9907_v1 = vpop.permute.xlu0 %9906  ;;  %17804 = vmatprep.mubr.msk.f32.mxu1 %vm18344_vm3, %v18333_v2 }
 0x703   :  { %v9905_v13 = vpop.permute.xlu1 %9904  ;;  %17300 = vmatmul.mubr.msk.f32.vlgmr.msra.gmra.mrb[10].mxu0 %vm8615_vm1, %v17291_v4  ;;  %17805 = vmatmul.mubr.msk.f32.vlgmr.msra.gmra.mrb[64].mxu1 %vm8615_vm1, %v17291_v4 }
 0x704   :  { %12922 = vrot.lane.b32.xlu0 %v19665_v54, %s20961_s27  ;;  %v9923_v14 = vsel %vm1325_vm6, %v9905_v13, %v9907_v1  ;;  %10086 = vmatprep.mubr.f32.mxu1 %v18333_v2 }
 0x705   :  { %12916 = vrot.lane.b32.xlu1 %v19641_v38, %s20961_s27  ;;  %17304 = vmatprep.subr.msk.mxu0 %vm8427_vm15, %v9923_v14  ;;  %v17339_v14 = vld [vmem:[%s20918_s10 + $0x38] sm:$0xff] }
 0x706   :  { %v9909_v15 = vpop.permute.xlu0 %9908  ;;  %10015 = vmatprep.mubr.f32.mxu0 %v18333_v2 }
 0x707   :  { %v9917_v16 = vpop.permute.xlu1 %9916  ;;  %v9922_v25 = vsel %vm1325_vm6, %v9907_v1, %v9909_v15 }
 0x708   :  { %v9924_v21 = vsel %vm1325_vm6, %v9917_v16, %v9905_v13  ;;  %12926 = vrot.lane.b32.xlu0 %v19672_v56, %s20961_s27 }
 0x709   :  { %12924 = vrot.lane.b32.xlu1 %v19661_v52, %s20961_s27  ;;  %17305 = vmatpush1.msk.msra.mxu0 %vm8427_vm15, %v9924_v21 }
 0x70a   :  { %v9913_v22 = vpop.permute.xlu0 %9912  ;;  %17306 = vmatmul.mubr.msk.f32.vlgmr.msra.gmra.mrb[8].mxu0 %vm8615_vm1, %v17303_v17 }
 0x70b   :  { %v9911_v23 = vpop.permute.xlu1 %9910  ;;  %10157 = vmatprep.mubr.f32.mxu0 %v18333_v2 }
 0x70c   :  { %13255 = vrot.lane.b32.xlu0 %v19644_v41, %s20962_s4  ;;  %v9921_v24 = vsel %vm1325_vm6, %v9909_v15, %v9911_v23  ;;  %v9920_v12 = vsel %vm1325_vm6, %v9911_v23, %v9913_v22 }
 0x70d   :  { %12928 = vrot.lane.b32.xlu1 %v19654_v8, %s20961_s27  ;;  %17307 = vmatprep.subr.msk.mxu1 %vm8427_vm15, %v9921_v24 }
 0x70e   :  { %17308 = vmatpush1.msk.msra.mxu1 %vm8427_vm15, %v9922_v25  ;;  %v10242_v26 = vpop.permute.xlu0 %10241 }
 0x70f   :  { %v9915_v27 = vpop.permute.xlu1 %9914  ;;  %17807 = vmatprep.subr.mxu1 %v18333_v2  ;;  %17309 = vmatmul.mubr.msk.f32.vlgmr.msra.gmra.mrb[56].mxu1 %vm8615_vm1, %v17303_v17 }
 0x710   :  { %v9918_v28 = vsel %vm1325_vm6, %v9915_v27, %v9917_v16  ;;  %13253 = vrot.lane.b32.xlu0 %v19641_v38, %s20962_s4  ;;  %v9919_v3 = vsel %vm1325_vm6, %v9913_v22, %v9915_v27  ;;  %17809 = vmatprep.mubr.msk.f32.mxu1 %vm18344_vm3, %v18333_v2  ;;  %vm20972_vm6 = vmmov %vm20968_vm0 }
 0x711   :  { %13257 = vrot.lane.b32.xlu1 %v19651_v48, %s20962_s4  ;;  %17310 = vmatprep.subr.msk.mxu0 %vm8427_vm15, %v9919_v3 }
 0x712   :  { %17808 = vmatpush3.msk.msra.mxu1 %vm8427_vm15, %v9918_v28  ;;  %17311 = vmatpush1.msk.msra.mxu0 %vm8427_vm15, %v9920_v12  ;;  %v10254_v29 = vpop.permute.xlu0 %10253 }
 0x713   :  { %v10261_v18 = vsel %vm1642_vm7, %v10254_v29, %v10242_v26  ;;  %v10244_v19 = vpop.permute.xlu1 %10243  ;;  %17312 = vmatmul.mubr.msk.f32.vlgmr.msra.gmra.mrb[10].mxu0 %vm8615_vm1, %v17303_v17  ;;  %17810 = vmatmul.mubr.msk.f32.vlgmr.msra.gmra.mrb[66].mxu1 %vm8615_vm1, %v17303_v17 }
 0x714   :  { %13261 = vrot.lane.b32.xlu0 %v19661_v52, %s20962_s4  ;;  %v10260_v30 = vsel %vm1642_vm7, %v10242_v26, %v10244_v19  ;;  %10423 = vmatprep.mubr.f32.mxu1 %v18333_v2 }
 0x715   :  { %13259 = vrot.lane.b32.xlu1 %v19665_v54, %s20962_s4  ;;  %17316 = vmatprep.subr.msk.mxu0 %vm8427_vm15, %v10260_v30 }
 0x716   :  { %17317 = vmatpush1.msk.msra.mxu0 %vm8427_vm15, %v10261_v18  ;;  %v10248_v32 = vpop.permute.xlu0 %10247  ;;  %10352 = vmatprep.mubr.f32.mxu0 %v18333_v2  ;;  %v17351_v18 = vld [vmem:[%s20918_s10 + $0x40] sm:$0xff] }
 0x717   :  { %v10246_v33 = vpop.permute.xlu1 %10245  ;;  %17318 = vmatmul.mubr.msk.f32.vlgmr.msra.gmra.mrb[8].mxu0 %vm8615_vm1, %v17315_v31 }
 0x718   :  { %v10259_v34 = vsel %vm1642_vm7, %v10244_v19, %v10246_v33  ;;  %13265 = vrot.lane.b32.xlu0 %v19654_v8, %s20962_s4  ;;  %v10258_v35 = vsel %vm1642_vm7, %v10246_v33, %v10248_v32  ;;  %10494 = vmatprep.mubr.f32.mxu0 %v18333_v2 }
 0x719   :  { %13263 = vrot.lane.b32.xlu1 %v19672_v56, %s20962_s4  ;;  %17319 = vmatprep.subr.msk.mxu1 %vm8427_vm15, %v10258_v35 }
 0x71a   :  { %17320 = vmatpush1.msk.msra.mxu1 %vm8427_vm15, %v10259_v34  ;;  %v10252_v36 = vpop.permute.xlu0 %10251 }
 0x71b   :  { %v10255_v37 = vsel %vm1642_vm7, %v10252_v36, %v10254_v29  ;;  %v10250_v39 = vpop.permute.xlu1 %10249  ;;  %17812 = vmatprep.subr.mxu1 %v18333_v2  ;;  %17321 = vmatmul.mubr.msk.f32.vlgmr.msra.gmra.mrb[56].mxu1 %vm8615_vm1, %v17315_v31 }
 0x71c   :  { %v10257_v40 = vsel %vm1642_vm7, %v10248_v32, %v10250_v39  ;;  %13594 = vrot.lane.b32.xlu0 %v19651_v48, %s20963_s2  ;;  %v10256_v42 = vsel %vm1642_vm7, %v10250_v39, %v10252_v36  ;;  %17813 = vmatpush3.msk.msra.mxu1 %vm8427_vm15, %v10255_v37  ;;  %vm20973_vm7 = vmmov %vm20968_vm0 }
 0x71d   :  { %13592 = vrot.lane.b32.xlu1 %v19644_v41, %s20963_s2  ;;  %17322 = vmatprep.subr.msk.mxu0 %vm8427_vm15, %v10256_v42 }
 0x71e   :  { %17323 = vmatpush1.msk.msra.mxu0 %vm8427_vm15, %v10257_v40  ;;  %v10581_v44 = vpop.permute.xlu0 %10580  ;;  %17814 = vmatprep.mubr.msk.f32.mxu1 %vm18344_vm3, %v18333_v2 }
 0x71f   :  { %v10579_v45 = vpop.permute.xlu1 %10578  ;;  %17324 = vmatmul.mubr.msk.f32.vlgmr.msra.gmra.mrb[10].mxu0 %vm8615_vm1, %v17315_v31  ;;  %17815 = vmatmul.mubr.msk.f32.vlgmr.msra.gmra.mrb[68].mxu1 %vm8615_vm1, %v17315_v31 }
 0x720   :  { %13596 = vrot.lane.b32.xlu0 %v19665_v54, %s20963_s2  ;;  %v10597_v47 = vsel %vm1959_vm8, %v10579_v45, %v10581_v44  ;;  %10760 = vmatprep.mubr.f32.mxu1 %v18333_v2 }
 0x721   :  { %13590 = vrot.lane.b32.xlu1 %v19641_v38, %s20963_s2  ;;  %17328 = vmatprep.subr.msk.mxu0 %vm8427_vm15, %v10597_v47  ;;  %v17363_v47 = vld [vmem:[%s20918_s10 + $0x48] sm:$0xff] }
 0x722   :  { %v10583_v49 = vpop.permute.xlu0 %10582  ;;  %10689 = vmatprep.mubr.f32.mxu0 %v18333_v2 }
 0x723   :  { %v10591_v50 = vpop.permute.xlu1 %10590  ;;  %v10596_v57 = vsel %vm1959_vm8, %v10581_v44, %v10583_v49 }
 0x724   :  { %v10598_v61 = vsel %vm1959_vm8, %v10591_v50, %v10579_v45  ;;  %13600 = vrot.lane.b32.xlu0 %v19672_v56, %s20963_s2 }
 0x725   :  { %13598 = vrot.lane.b32.xlu1 %v19661_v52, %s20963_s2  ;;  %17329 = vmatpush1.msk.msra.mxu0 %vm8427_vm15, %v10598_v61 }
 0x726   :  { %v10587_v62 = vpop.permute.xlu0 %10586  ;;  %17330 = vmatmul.mubr.msk.f32.vlgmr.msra.gmra.mrb[8].mxu0 %vm8615_vm1, %v17327_v53 }
 0x727   :  { %v10585_v4 = vpop.permute.xlu1 %10584  ;;  %10831 = vmatprep.mubr.f32.mxu0 %v18333_v2 }
 0x728   :  { %13929 = vrot.lane.b32.xlu0 %v19644_v41, %s20964_s6  ;;  %v10595_v63 = vsel %vm1959_vm8, %v10583_v49, %v10585_v4  ;;  %v10594_v7 = vsel %vm1959_vm8, %v10585_v4, %v10587_v62 }
 0x729   :  { %13602 = vrot.lane.b32.xlu1 %v19654_v8, %s20963_s2  ;;  %17331 = vmatprep.subr.msk.mxu1 %vm8427_vm15, %v10595_v63 }
 0x72a   :  { %17332 = vmatpush1.msk.msra.mxu1 %vm8427_vm15, %v10596_v57  ;;  %v10916_v58 = vpop.permute.xlu0 %10915 }
 0x72b   :  { %v10589_v6 = vpop.permute.xlu1 %10588  ;;  %17817 = vmatprep.subr.mxu1 %v18333_v2  ;;  %17333 = vmatmul.mubr.msk.f32.vlgmr.msra.gmra.mrb[56].mxu1 %vm8615_vm1, %v17327_v53 }
 0x72c   :  { %v10592_v59 = vsel %vm1959_vm8, %v10589_v6, %v10591_v50  ;;  %13927 = vrot.lane.b32.xlu0 %v19641_v38, %s20964_s6  ;;  %v10593_v60 = vsel %vm1959_vm8, %v10587_v62, %v10589_v6  ;;  %17819 = vmatprep.mubr.msk.f32.mxu1 %vm18344_vm3, %v18333_v2  ;;  %vm20974_vm8 = vmmov %vm20968_vm0 }
 0x72d   :  { %13931 = vrot.lane.b32.xlu1 %v19651_v48, %s20964_s6  ;;  %17334 = vmatprep.subr.msk.mxu0 %vm8427_vm15, %v10593_v60 }
 0x72e   :  { %17818 = vmatpush3.msk.msra.mxu1 %vm8427_vm15, %v10592_v59  ;;  %17335 = vmatpush1.msk.msra.mxu0 %vm8427_vm15, %v10594_v7  ;;  %v10928_v9 = vpop.permute.xlu0 %10927 }
 0x72f   :  { %v10935_v10 = vsel %vm2276_vm9, %v10928_v9, %v10916_v58  ;;  %v10918_v1 = vpop.permute.xlu1 %10917  ;;  %17336 = vmatmul.mubr.msk.f32.vlgmr.msra.gmra.mrb[10].mxu0 %vm8615_vm1, %v17327_v53  ;;  %17820 = vmatmul.mubr.msk.f32.vlgmr.msra.gmra.mrb[70].mxu1 %vm8615_vm1, %v17327_v53 }
 0x730   :  { %13935 = vrot.lane.b32.xlu0 %v19661_v52, %s20964_s6  ;;  %v10934_v13 = vsel %vm2276_vm9, %v10916_v58, %v10918_v1  ;;  %11097 = vmatprep.mubr.f32.mxu1 %v18333_v2 }
 0x731   :  { %13933 = vrot.lane.b32.xlu1 %v19665_v54, %s20964_s6  ;;  %17340 = vmatprep.subr.msk.mxu0 %vm8427_vm15, %v10934_v13 }
 0x732   :  { %17341 = vmatpush1.msk.msra.mxu0 %vm8427_vm15, %v10935_v10  ;;  %v10922_v15 = vpop.permute.xlu0 %10921  ;;  %11026 = vmatprep.mubr.f32.mxu0 %v18333_v2  ;;  %v17375_v10 = vld [vmem:[%s20918_s10 + $0x50] sm:$0xff] }
 0x733   :  { %v10920_v16 = vpop.permute.xlu1 %10919  ;;  %17342 = vmatmul.mubr.msk.f32.vlgmr.msra.gmra.mrb[8].mxu0 %vm8615_vm1, %v17339_v14 }
 0x734   :  { %v10933_v17 = vsel %vm2276_vm9, %v10918_v1, %v10920_v16  ;;  %13939 = vrot.lane.b32.xlu0 %v19654_v8, %s20964_s6  ;;  %v10932_v21 = vsel %vm2276_vm9, %v10920_v16, %v10922_v15  ;;  %11168 = vmatprep.mubr.f32.mxu0 %v18333_v2 }
 0x735   :  { %13937 = vrot.lane.b32.xlu1 %v19672_v56, %s20964_s6  ;;  %17343 = vmatprep.subr.msk.mxu1 %vm8427_vm15, %v10932_v21 }
 0x736   :  { %17344 = vmatpush1.msk.msra.mxu1 %vm8427_vm15, %v10933_v17  ;;  %v10926_v22 = vpop.permute.xlu0 %10925 }
 0x737   :  { %v10929_v23 = vsel %vm2276_vm9, %v10926_v22, %v10928_v9  ;;  %v10924_v24 = vpop.permute.xlu1 %10923  ;;  %17822 = vmatprep.subr.mxu1 %v18333_v2  ;;  %17345 = vmatmul.mubr.msk.f32.vlgmr.msra.gmra.mrb[56].mxu1 %vm8615_vm1, %v17339_v14 }
 0x738   :  { %v10931_v25 = vsel %vm2276_vm9, %v10922_v15, %v10924_v24  ;;  %14268 = vrot.lane.b32.xlu0 %v19651_v48, %s20965_s17  ;;  %v10930_v26 = vsel %vm2276_vm9, %v10924_v24, %v10926_v22  ;;  %17823 = vmatpush3.msk.msra.mxu1 %vm8427_vm15, %v10929_v23  ;;  %vm20975_vm9 = vcmp.lt.s32.totalorder %v18589_v11, 126 }
 0x739   :  { %14266 = vrot.lane.b32.xlu1 %v19644_v41, %s20965_s17  ;;  %17346 = vmatprep.subr.msk.mxu0 %vm8427_vm15, %v10930_v26 }
 0x73a   :  { %17347 = vmatpush1.msk.msra.mxu0 %vm8427_vm15, %v10931_v25  ;;  %v11255_v27 = vpop.permute.xlu0 %11254  ;;  %17824 = vmatprep.mubr.msk.f32.mxu1 %vm18344_vm3, %v18333_v2 }
 0x73b   :  { %v11253_v28 = vpop.permute.xlu1 %11252  ;;  %17348 = vmatmul.mubr.msk.f32.vlgmr.msra.gmra.mrb[10].mxu0 %vm8615_vm1, %v17339_v14  ;;  %17825 = vmatmul.mubr.msk.f32.vlgmr.msra.gmra.mrb[72].mxu1 %vm8615_vm1, %v17339_v14 }
 0x73c   :  { %14270 = vrot.lane.b32.xlu0 %v19665_v54, %s20965_s17  ;;  %v11271_v3 = vsel %vm2593_vm10, %v11253_v28, %v11255_v27  ;;  %11434 = vmatprep.mubr.f32.mxu1 %v18333_v2 }
 0x73d   :  { %14264 = vrot.lane.b32.xlu1 %v19641_v38, %s20965_s17  ;;  %17352 = vmatprep.subr.msk.mxu0 %vm8427_vm15, %v11271_v3  ;;  %v17387_v3 = vld [vmem:[%s20918_s10 + $0x58] sm:$0xff] }
 0x73e   :  { %v11257_v12 = vpop.permute.xlu0 %11256  ;;  %11363 = vmatprep.mubr.f32.mxu0 %v18333_v2 }
 0x73f   :  { %v11265_v29 = vpop.permute.xlu1 %11264  ;;  %v11270_v33 = vsel %vm2593_vm10, %v11255_v27, %v11257_v12 }
 0x740   :  { %v11272_v19 = vsel %vm2593_vm10, %v11265_v29, %v11253_v28  ;;  %14274 = vrot.lane.b32.xlu0 %v19672_v56, %s20965_s17 }
 0x741   :  { %14272 = vrot.lane.b32.xlu1 %v19661_v52, %s20965_s17  ;;  %17353 = vmatpush1.msk.msra.mxu0 %vm8427_vm15, %v11272_v19 }
 0x742   :  { %v11261_v30 = vpop.permute.xlu0 %11260  ;;  %17354 = vmatmul.mubr.msk.f32.vlgmr.msra.gmra.mrb[8].mxu0 %vm8615_vm1, %v17351_v18 }
 0x743   :  { %v11259_v31 = vpop.permute.xlu1 %11258  ;;  %11505 = vmatprep.mubr.f32.mxu0 %v18333_v2 }
 0x744   :  { %14603 = vrot.lane.b32.xlu0 %v19644_v41, %s20966_s30  ;;  %v11269_v32 = vsel %vm2593_vm10, %v11257_v12, %v11259_v31  ;;  %v11268_v39 = vsel %vm2593_vm10, %v11259_v31, %v11261_v30 }
 0x745   :  { %14276 = vrot.lane.b32.xlu1 %v19654_v8, %s20965_s17  ;;  %17355 = vmatprep.subr.msk.mxu1 %vm8427_vm15, %v11269_v32 }
 0x746   :  { %17356 = vmatpush1.msk.msra.mxu1 %vm8427_vm15, %v11270_v33  ;;  %v11590_v34 = vpop.permute.xlu0 %11589 }
 0x747   :  { %v11263_v35 = vpop.permute.xlu1 %11262  ;;  %17827 = vmatprep.subr.mxu1 %v18333_v2  ;;  %17357 = vmatmul.mubr.msk.f32.vlgmr.msra.gmra.mrb[56].mxu1 %vm8615_vm1, %v17351_v18 }
 0x748   :  { %v11266_v36 = vsel %vm2593_vm10, %v11263_v35, %v11265_v29  ;;  %14601 = vrot.lane.b32.xlu0 %v19641_v38, %s20966_s30  ;;  %v11267_v37 = vsel %vm2593_vm10, %v11261_v30, %v11263_v35  ;;  %17829 = vmatprep.mubr.msk.f32.mxu1 %vm18344_vm3, %v18333_v2  ;;  %vm20976_vm10 = vmmov %vm20975_vm9 }
 0x749   :  { %14605 = vrot.lane.b32.xlu1 %v19651_v48, %s20966_s30  ;;  %17358 = vmatprep.subr.msk.mxu0 %vm8427_vm15, %v11267_v37 }
 0x74a   :  { %17828 = vmatpush3.msk.msra.mxu1 %vm8427_vm15, %v11266_v36  ;;  %17359 = vmatpush1.msk.msra.mxu0 %vm8427_vm15, %v11268_v39  ;;  %v11602_v40 = vpop.permute.xlu0 %11601  ;;  %v17399_v39 = vld [vmem:[%s20918_s10 + $0x60] sm:$0xff] }
 0x74b   :  { %v11609_v42 = vsel %vm2910_vm11, %v11602_v40, %v11590_v34  ;;  %v11592_v44 = vpop.permute.xlu1 %11591  ;;  %17360 = vmatmul.mubr.msk.f32.vlgmr.msra.gmra.mrb[10].mxu0 %vm8615_vm1, %v17351_v18  ;;  %17830 = vmatmul.mubr.msk.f32.vlgmr.msra.gmra.mrb[74].mxu1 %vm8615_vm1, %v17351_v18 }
 0x74c   :  { %14609 = vrot.lane.b32.xlu0 %v19661_v52, %s20966_s30  ;;  %v11608_v45 = vsel %vm2910_vm11, %v11590_v34, %v11592_v44  ;;  %11771 = vmatprep.mubr.f32.mxu1 %v18333_v2 }
 0x74d   :  { %14607 = vrot.lane.b32.xlu1 %v19665_v54, %s20966_s30  ;;  %17364 = vmatprep.subr.msk.mxu0 %vm8427_vm15, %v11608_v45 }
 0x74e   :  { %17365 = vmatpush1.msk.msra.mxu0 %vm8427_vm15, %v11609_v42  ;;  %v11596_v49 = vpop.permute.xlu0 %11595  ;;  %11700 = vmatprep.mubr.f32.mxu0 %v18333_v2 }
 0x74f   :  { %v11594_v50 = vpop.permute.xlu1 %11593  ;;  %17366 = vmatmul.mubr.msk.f32.vlgmr.msra.gmra.mrb[8].mxu0 %vm8615_vm1, %v17363_v47 }
 0x750   :  { %v11607_v53 = vsel %vm2910_vm11, %v11592_v44, %v11594_v50  ;;  %14613 = vrot.lane.b32.xlu0 %v19654_v8, %s20966_s30  ;;  %v11606_v61 = vsel %vm2910_vm11, %v11594_v50, %v11596_v49  ;;  %11842 = vmatprep.mubr.f32.mxu0 %v18333_v2 }
 0x751   :  { %14611 = vrot.lane.b32.xlu1 %v19672_v56, %s20966_s30  ;;  %17367 = vmatprep.subr.msk.mxu1 %vm8427_vm15, %v11606_v61  ;;  %v17411_v61 = vld [vmem:[%s20918_s10 + $0x68] sm:$0xff] }
 0x752   :  { %17368 = vmatpush1.msk.msra.mxu1 %vm8427_vm15, %v11607_v53  ;;  %v11600_v62 = vpop.permute.xlu0 %11599 }
 0x753   :  { %v11603_v4 = vsel %vm2910_vm11, %v11600_v62, %v11602_v40  ;;  %v11598_v63 = vpop.permute.xlu1 %11597  ;;  %17832 = vmatprep.subr.mxu1 %v18333_v2  ;;  %17369 = vmatmul.mubr.msk.f32.vlgmr.msra.gmra.mrb[56].mxu1 %vm8615_vm1, %v17363_v47 }
 0x754   :  { %v11605_v57 = vsel %vm2910_vm11, %v11596_v49, %v11598_v63  ;;  %14942 = vrot.lane.b32.xlu0 %v19651_v48, %s20967_s18  ;;  %v11604_v58 = vsel %vm2910_vm11, %v11598_v63, %v11600_v62  ;;  %17833 = vmatpush3.msk.msra.mxu1 %vm8427_vm15, %v11603_v4  ;;  %vm20977_vm11 = vmmov %vm20975_vm9 }
 0x755   :  { %14940 = vrot.lane.b32.xlu1 %v19644_v41, %s20967_s18  ;;  %17370 = vmatprep.subr.msk.mxu0 %vm8427_vm15, %v11604_v58 }
 0x756   :  { %17371 = vmatpush1.msk.msra.mxu0 %vm8427_vm15, %v11605_v57  ;;  %v11929_v6 = vpop.permute.xlu0 %11928  ;;  %17834 = vmatprep.mubr.msk.f32.mxu1 %vm18344_vm3, %v18333_v2 }
 0x757   :  { %v11927_v59 = vpop.permute.xlu1 %11926  ;;  %17372 = vmatmul.mubr.msk.f32.vlgmr.msra.gmra.mrb[10].mxu0 %vm8615_vm1, %v17363_v47  ;;  %17835 = vmatmul.mubr.msk.f32.vlgmr.msra.gmra.mrb[76].mxu1 %vm8615_vm1, %v17363_v47 }
 0x758   :  { %14944 = vrot.lane.b32.xlu0 %v19665_v54, %s20967_s18  ;;  %v11945_v60 = vsel %vm3227_vm12, %v11927_v59, %v11929_v6  ;;  %12108 = vmatprep.mubr.f32.mxu1 %v18333_v2 }
 0x759   :  { %14938 = vrot.lane.b32.xlu1 %v19641_v38, %s20967_s18  ;;  %17376 = vmatprep.subr.msk.mxu0 %vm8427_vm15, %v11945_v60 }
 0x75a   :  { %v11931_v7 = vpop.permute.xlu0 %11930  ;;  %12037 = vmatprep.mubr.f32.mxu0 %v18333_v2 }
 0x75b   :  { %v11939_v9 = vpop.permute.xlu1 %11938  ;;  %v11944_v16 = vsel %vm3227_vm12, %v11929_v6, %v11931_v7 }
 0x75c   :  { %v11946_v1 = vsel %vm3227_vm12, %v11939_v9, %v11927_v59  ;;  %14948 = vrot.lane.b32.xlu0 %v19672_v56, %s20967_s18 }
 0x75d   :  { %14946 = vrot.lane.b32.xlu1 %v19661_v52, %s20967_s18  ;;  %17377 = vmatpush1.msk.msra.mxu0 %vm8427_vm15, %v11946_v1 }
 0x75e   :  { %v11935_v13 = vpop.permute.xlu0 %11934  ;;  %17378 = vmatmul.mubr.msk.f32.vlgmr.msra.gmra.mrb[8].mxu0 %vm8615_vm1, %v17375_v10 }
 0x75f   :  { %v11933_v14 = vpop.permute.xlu1 %11932  ;;  %12179 = vmatprep.mubr.f32.mxu0 %v18333_v2 }
 0x760   :  { %15277 = vrot.lane.b32.xlu0 %v19644_v41, %s18354_s25  ;;  %v11943_v15 = vsel %vm3227_vm12, %v11931_v7, %v11933_v14  ;;  %v11942_v24 = vsel %vm3227_vm12, %v11933_v14, %v11935_v13 }
 0x761   :  { %14950 = vrot.lane.b32.xlu1 %v19654_v8, %s20967_s18  ;;  %17379 = vmatprep.subr.msk.mxu1 %vm8427_vm15, %v11943_v15 }
 0x762   :  { %17380 = vmatpush1.msk.msra.mxu1 %vm8427_vm15, %v11944_v16  ;;  %v12264_v17 = vpop.permute.xlu0 %12263 }
 0x763   :  { %v11937_v21 = vpop.permute.xlu1 %11936  ;;  %17837 = vmatprep.subr.mxu1 %v18333_v2  ;;  %17381 = vmatmul.mubr.msk.f32.vlgmr.msra.gmra.mrb[56].mxu1 %vm8615_vm1, %v17375_v10 }
 0x764   :  { %v11940_v22 = vsel %vm3227_vm12, %v11937_v21, %v11939_v9  ;;  %v11941_v23 = vsel %vm3227_vm12, %v11935_v13, %v11937_v21  ;;  %15275 = vrot.lane.b32.xlu0 %v19641_v38, %s18354_s25  ;;  %17839 = vmatprep.mubr.msk.f32.mxu1 %vm18344_vm3, %v18333_v2  ;;  %vm20978_vm12 = vmmov %vm20975_vm9  ;;  %v17423_v13 = vld [vmem:[%s20918_s10 + $0x70] sm:$0xff] }
 0x765   :  { %15279 = vrot.lane.b32.xlu1 %v19651_v48, %s18354_s25  ;;  %17382 = vmatprep.subr.msk.mxu0 %vm8427_vm15, %v11941_v23 }
 0x766   :  { %17838 = vmatpush3.msk.msra.mxu1 %vm8427_vm15, %v11940_v22  ;;  %17383 = vmatpush1.msk.msra.mxu0 %vm8427_vm15, %v11942_v24  ;;  %v12276_v25 = vpop.permute.xlu0 %12275 }
 0x767   :  { %v12283_v26 = vsel %vm3544_vm13, %v12276_v25, %v12264_v17  ;;  %v12266_v27 = vpop.permute.xlu1 %12265  ;;  %17384 = vmatmul.mubr.msk.f32.vlgmr.msra.gmra.mrb[10].mxu0 %vm8615_vm1, %v17375_v10  ;;  %17840 = vmatmul.mubr.msk.f32.vlgmr.msra.gmra.mrb[78].mxu1 %vm8615_vm1, %v17375_v10 }
 0x768   :  { %v12282_v28 = vsel %vm3544_vm13, %v12264_v17, %v12266_v27  ;;  %15283 = vrot.lane.b32.xlu0 %v19661_v52, %s18354_s25  ;;  %12374 = vmatprep.mubr.f32.mxu0 %v18333_v2 }
 0x769   :  { %15281 = vrot.lane.b32.xlu1 %v19665_v54, %s18354_s25  ;;  %17388 = vmatprep.subr.msk.mxu0 %vm8427_vm15, %v12282_v28 }
 0x76a   :  { %17389 = vmatpush1.msk.msra.mxu0 %vm8427_vm15, %v12283_v26  ;;  %v12270_v12 = vpop.permute.xlu0 %12269  ;;  %12445 = vmatprep.mubr.f32.mxu1 %v18333_v2 }
 0x76b   :  { %v12268_v29 = vpop.permute.xlu1 %12267  ;;  %17390 = vmatmul.mubr.msk.f32.vlgmr.msra.gmra.mrb[8].mxu0 %vm8615_vm1, %v17387_v3 }
 0x76c   :  { %v12280_v18 = vsel %vm3544_vm13, %v12268_v29, %v12270_v12  ;;  %v12281_v19 = vsel %vm3544_vm13, %v12266_v27, %v12268_v29  ;;  %15287 = vrot.lane.b32.xlu0 %v19654_v8, %s18354_s25  ;;  %12516 = vmatprep.mubr.f32.mxu0 %v18333_v2 }
 0x76d   :  { %15285 = vrot.lane.b32.xlu1 %v19672_v56, %s18354_s25  ;;  %17391 = vmatprep.subr.msk.mxu1 %vm8427_vm15, %v12280_v18 }
 0x76e   :  { %17392 = vmatpush1.msk.msra.mxu1 %vm8427_vm15, %v12281_v19  ;;  %v12274_v30 = vpop.permute.xlu0 %12273 }
 0x76f   :  { %v12277_v31 = vsel %vm3544_vm13, %v12274_v30, %v12276_v25  ;;  %17393 = vmatmul.mubr.msk.f32.vlgmr.msra.gmra.mrb[56].mxu1 %vm8615_vm1, %v17387_v3  ;;  %v12272_v32 = vpop.permute.xlu1 %12271  ;;  %17842 = vmatprep.subr.mxu1 %v18333_v2 }
 0x770   :  { %v12278_v33 = vsel %vm3544_vm13, %v12272_v32, %v12274_v30  ;;  %v12279_v34 = vsel %vm3544_vm13, %v12270_v12, %v12272_v32  ;;  %15616 = vrot.lane.b32.xlu0 %v19651_v48, %s18355_s22  ;;  %17843 = vmatpush3.msk.msra.mxu1 %vm8427_vm15, %v12277_v31  ;;  %vm20979_vm13 = vmmov %vm20975_vm9 }
 0x771   :  { %15614 = vrot.lane.b32.xlu1 %v19644_v41, %s18355_s22  ;;  %17394 = vmatprep.subr.msk.mxu0 %vm8427_vm15, %v12278_v33 }
 0x772   :  { %17395 = vmatpush1.msk.msra.mxu0 %vm8427_vm15, %v12279_v34  ;;  %17844 = vmatprep.mubr.msk.f32.mxu1 %vm18344_vm3, %v18333_v2  ;;  %v12921_v35 = vpop.permute.xlu0 %12920 }
 0x773   :  { %17403 = vmatprep.subr.msk.mxu1 %vm8427_vm15, %v19665_v54  ;;  %17396 = vmatmul.mubr.msk.f32.vlgmr.msra.gmra.mrb[10].mxu0 %vm8615_vm1, %v17387_v3  ;;  %v12919_v36 = vpop.permute.xlu1 %12918 }
 0x774   :  { %17845 = vmatmul.mubr.msk.f32.vlgmr.msra.gmra.mrb[80].mxu1 %vm8615_vm1, %v17387_v3  ;;  %17400 = vmatprep.subr.msk.mxu0 %vm8427_vm15, %v19644_v41  ;;  %v12934_v42 = vsel %vm20968_vm0, %v12919_v36, %v12921_v35  ;;  %vm20980_vm0 = vmmov %vm20975_vm9  ;;  %v17435_v3 = vld [vmem:[%s20918_s10 + $0x78] sm:$0xff] }
 0x775   :  { %17404 = vmatpush1.msk.msra.mxu1 %vm8427_vm15, %v19651_v48  ;;  %17401 = vmatpush1.msk.msra.mxu0 %vm8427_vm15, %v19641_v38 }
 0x776   :  { %15618 = vrot.lane.b32.xlu0 %v19665_v54, %s18355_s22  ;;  %15612 = vrot.lane.b32.xlu1 %v19641_v38, %s18355_s22  ;;  %v12923_v37 = vpop.permute.xlu0 %12922 }
 0x777   :  { %17406 = vmatprep.subr.msk.mxu0 %vm8427_vm15, %v19672_v56  ;;  %12690 = vmatprep.mubr.f32.mxu0 %v18333_v2  ;;  %v12917_v40 = vpop.permute.xlu1 %12916  ;;  %v12933_v53 = vsel %vm20971_vm5, %v12921_v35, %v12923_v37 }
 0x778   :  { %12761 = vmatprep.mubr.f32.mxu1 %v18333_v2  ;;  %17847 = vmatprep.subr.mxu1 %v18333_v2  ;;  %v12935_v49 = vsel %vm20970_vm4, %v12917_v40, %v12919_v36  ;;  %vm20983_vm4 = vcmp.lt.s32.totalorder %v18589_v11, 110 }
 0x779   :  { %17402 = vmatmul.mubr.msk.f32.vlgmr.msra.gmra.mrb[8].mxu0 %vm8615_vm1, %v17399_v39  ;;  %17405 = vmatmul.mubr.msk.f32.vlgmr.msra.gmra.mrb[56].mxu1 %vm8615_vm1, %v17399_v39  ;;  %vm20984_vm5 = vmmov %vm20983_vm4 }
 0x77a   :  { %17407 = vmatpush1.msk.msra.mxu0 %vm8427_vm15, %v19661_v52  ;;  %17848 = vmatpush3.msk.msra.mxu1 %vm8427_vm15, %v19654_v8  ;;  %v12927_v44 = vpop.permute.xlu0 %12926 }
 0x77b   :  { %17412 = vmatprep.subr.msk.mxu0 %vm8427_vm15, %v12934_v42  ;;  %15622 = vrot.lane.b32.xlu0 %v19672_v56, %s18355_s22  ;;  %v12925_v45 = vpop.permute.xlu1 %12924 }
 0x77c   :  { %15620 = vrot.lane.b32.xlu1 %v19661_v52, %s18355_s22  ;;  %12832 = vmatprep.mubr.f32.mxu0 %v18333_v2  ;;  %v12932_v47 = vsel %vm20969_vm2, %v12923_v37, %v12925_v45  ;;  %v12931_v6 = vsel %vm20974_vm8, %v12925_v45, %v12927_v44  ;;  %vm20981_vm2 = vmmov %vm20980_vm0 }
 0x77d   :  { %17849 = vmatprep.mubr.msk.f32.mxu1 %vm18344_vm3, %v18333_v2  ;;  %17408 = vmatmul.mubr.msk.f32.vlgmr.msra.gmra.mrb[10].mxu0 %vm8615_vm1, %v17399_v39  ;;  %vm20988_vm8 = vmmov %vm20983_vm4 }
 0x77e   :  { %17850 = vmatmul.mubr.msk.f32.vlgmr.msra.gmra.mrb[82].mxu1 %vm8615_vm1, %v17399_v39  ;;  %17413 = vmatpush1.msk.msra.mxu0 %vm8427_vm15, %v12935_v49  ;;  %v13256_v50 = vpop.permute.xlu0 %13255 }
 0x77f   :  { %15951 = vrot.lane.b32.xlu0 %v19644_v41, %s18356_s23  ;;  %17415 = vmatprep.subr.msk.mxu1 %vm8427_vm15, %v12932_v47  ;;  %v12929_v62 = vpop.permute.xlu1 %12928 }
 0x780   :  { %15624 = vrot.lane.b32.xlu1 %v19654_v8, %s18355_s22  ;;  %17416 = vmatpush1.msk.msra.mxu1 %vm8427_vm15, %v12933_v53  ;;  %v12930_v4 = vsel %vm20972_vm6, %v12927_v44, %v12929_v62  ;;  %v12936_v63 = vsel %vm20973_vm7, %v12929_v62, %v12917_v40  ;;  %vm20985_vm6 = vmmov %vm20983_vm4 }
 0x781   :  { %13098 = vmatprep.mubr.f32.mxu1 %v18333_v2  ;;  %17852 = vmatprep.subr.mxu1 %v18333_v2  ;;  %vm20986_vm7 = vmmov %vm20983_vm4 }
 0x782   :  { %17417 = vmatmul.mubr.msk.f32.vlgmr.msra.gmra.mrb[56].mxu1 %vm8615_vm1, %v17411_v61  ;;  %13027 = vmatprep.mubr.f32.mxu0 %v18333_v2  ;;  %v13254_v57 = vpop.permute.xlu0 %13253 }
 0x783   :  { %15949 = vrot.lane.b32.xlu0 %v19641_v38, %s18356_s23  ;;  %17418 = vmatprep.subr.msk.mxu0 %vm8427_vm15, %v12930_v4  ;;  %v13258_v58 = vpop.permute.xlu1 %13257  ;;  %v13272_v7 = vsel %vm20976_vm10, %v13254_v57, %v13256_v50  ;;  %vm20990_vm10 = vmmov %vm20983_vm4 }
 0x784   :  { %15953 = vrot.lane.b32.xlu1 %v19651_v48, %s18356_s23  ;;  %17853 = vmatpush3.msk.msra.mxu1 %vm8427_vm15, %v12936_v63  ;;  %v13271_v59 = vsel %vm20975_vm9, %v13256_v50, %v13258_v58  ;;  %vm20989_vm9 = vmmov %vm20983_vm4  ;;  %v17459_v63 = vld [vmem:[%s20918_s10 + $0x88] sm:$0xff] }
 0x785   :  { %17414 = vmatmul.mubr.msk.f32.vlgmr.msra.gmra.mrb[8].mxu0 %vm8615_vm1, %v17411_v61  ;;  %17854 = vmatprep.mubr.msk.f32.mxu1 %vm18344_vm3, %v18333_v2 }
 0x786   :  { %17419 = vmatpush1.msk.msra.mxu0 %vm8427_vm15, %v12931_v6  ;;  %17855 = vmatmul.mubr.msk.f32.vlgmr.msra.gmra.mrb[84].mxu1 %vm8615_vm1, %v17411_v61  ;;  %v13262_v60 = vpop.permute.xlu0 %13261 }
 0x787   :  { %15957 = vrot.lane.b32.xlu0 %v19661_v52, %s18356_s23  ;;  %13169 = vmatprep.mubr.f32.mxu0 %v18333_v2  ;;  %v13260_v9 = vpop.permute.xlu1 %13259 }
 0x788   :  { %15955 = vrot.lane.b32.xlu1 %v19665_v54, %s18356_s23  ;;  %17424 = vmatprep.subr.msk.mxu0 %vm8427_vm15, %v13271_v59  ;;  %v13269_v10 = vsel %vm20977_vm11, %v13260_v9, %v13262_v60  ;;  %v13270_v1 = vsel %vm20978_vm12, %v13258_v58, %v13260_v9  ;;  %vm20991_vm11 = vcmp.lt.s32.totalorder %v18589_v11, 109 }
 0x789   :  { %17420 = vmatmul.mubr.msk.f32.vlgmr.msra.gmra.mrb[10].mxu0 %vm8615_vm1, %v17411_v61  ;;  %17427 = vmatprep.subr.msk.mxu1 %vm8427_vm15, %v13269_v10  ;;  %vm20992_vm12 = vmmov %vm20991_vm11 }
 0x78a   :  { %17425 = vmatpush1.msk.msra.mxu0 %vm8427_vm15, %v13272_v7  ;;  %17428 = vmatpush1.msk.msra.mxu1 %vm8427_vm15, %v13270_v1  ;;  %v13266_v14 = vpop.permute.xlu0 %13265 }
 0x78b   :  { %15961 = vrot.lane.b32.xlu0 %v19654_v8, %s18356_s23  ;;  %13435 = vmatprep.mubr.f32.mxu1 %v18333_v2  ;;  %v13273_v15 = vsel %vm20979_vm13, %v13266_v14, %v13254_v57  ;;  %v13264_v16 = vpop.permute.xlu1 %13263  ;;  %vm20993_vm13 = vmmov %vm20991_vm11 }
 0x78c   :  { %15959 = vrot.lane.b32.xlu1 %v19672_v56, %s18356_s23  ;;  %17429 = vmatmul.mubr.msk.f32.vlgmr.msra.gmra.mrb[56].mxu1 %vm8615_vm1, %v17423_v13  ;;  %v13267_v17 = vsel %vm20980_vm0, %v13264_v16, %v13266_v14  ;;  %v13268_v21 = vsel %vm20981_vm2, %v13262_v60, %v13264_v16  ;;  %vm20994_vm0 = vmmov %vm20991_vm11 }
 0x78d   :  { %17857 = vmatprep.subr.mxu1 %v18333_v2  ;;  %13364 = vmatprep.mubr.f32.mxu0 %v18333_v2  ;;  %vm20995_vm2 = vmmov %vm20994_vm0 }
 0x78e   :  { %17430 = vmatprep.subr.msk.mxu0 %vm8427_vm15, %v13267_v17  ;;  %17858 = vmatpush3.msk.msra.mxu1 %vm8427_vm15, %v13273_v15  ;;  %v13595_v22 = vpop.permute.xlu0 %13594 }
 0x78f   :  { %16290 = vrot.lane.b32.xlu0 %v19651_v48, %s20982_s3  ;;  %17426 = vmatmul.mubr.msk.f32.vlgmr.msra.gmra.mrb[8].mxu0 %vm8615_vm1, %v17423_v13  ;;  %v13593_v23 = vpop.permute.xlu1 %13592 }
 0x790   :  { %16288 = vrot.lane.b32.xlu1 %v19644_v41, %s20982_s3  ;;  %17431 = vmatpush1.msk.msra.mxu0 %vm8427_vm15, %v13268_v21  ;;  %v13608_v24 = vsel %vm20983_vm4, %v13593_v23, %v13595_v22  ;;  %vm20996_vm4 = vmmov %vm20994_vm0 }
 0x791   :  { %17859 = vmatprep.mubr.msk.f32.mxu1 %vm18344_vm3, %v18333_v2  ;;  %17436 = vmatprep.subr.msk.mxu0 %vm8427_vm15, %v13608_v24  ;;  %v17471_v24 = vld [vmem:[%s20918_s10 + $0x90] sm:$0xff] }
 0x792   :  { %17860 = vmatmul.mubr.msk.f32.vlgmr.msra.gmra.mrb[86].mxu1 %vm8615_vm1, %v17423_v13  ;;  %v13597_v25 = vpop.permute.xlu0 %13596  ;;  %13506 = vmatprep.mubr.f32.mxu0 %v18333_v2 }
 0x793   :  { %16292 = vrot.lane.b32.xlu0 %v19665_v54, %s20982_s3  ;;  %v13591_v26 = vpop.permute.xlu1 %13590  ;;  %17432 = vmatmul.mubr.msk.f32.vlgmr.msra.gmra.mrb[10].mxu0 %vm8615_vm1, %v17423_v13  ;;  %v13607_v18 = vsel %vm20986_vm7, %v13595_v22, %v13597_v25 }
 0x794   :  { %16286 = vrot.lane.b32.xlu1 %v19641_v38, %s20982_s3  ;;  %v13609_v27 = vsel %vm20984_vm5, %v13591_v26, %v13593_v23  ;;  %13772 = vmatprep.mubr.f32.mxu1 %v18333_v2  ;;  %vm20997_vm5 = vmmov %vm20994_vm0 }
 0x795   :  { %17437 = vmatpush1.msk.msra.mxu0 %vm8427_vm15, %v13609_v27  ;;  %13701 = vmatprep.mubr.f32.mxu0 %v18333_v2 }
 0x796   :  { %v13601_v28 = vpop.permute.xlu0 %13600 }
 0x797   :  { %16296 = vrot.lane.b32.xlu0 %v19672_v56, %s20982_s3  ;;  %v13599_v12 = vpop.permute.xlu1 %13598  ;;  %17438 = vmatmul.mubr.msk.f32.vlgmr.msra.gmra.mrb[8].mxu0 %vm8615_vm1, %v17435_v3 }
 0x798   :  { %16294 = vrot.lane.b32.xlu1 %v19661_v52, %s20982_s3  ;;  %v13606_v29 = vsel %vm20985_vm6, %v13597_v25, %v13599_v12  ;;  %13843 = vmatprep.mubr.f32.mxu0 %v18333_v2  ;;  %v13605_v33 = vsel %vm20990_vm10, %v13599_v12, %v13601_v28  ;;  %vm20998_vm6 = vcmp.lt.s32.totalorder %v18589_v11, 108 }
 0x799   :  { %17439 = vmatprep.subr.msk.mxu1 %vm8427_vm15, %v13606_v29  ;;  %vm20999_vm7 = vmmov %vm20998_vm6 }
 0x79a   :  { %17440 = vmatpush1.msk.msra.mxu1 %vm8427_vm15, %v13607_v18  ;;  %v13930_v19 = vpop.permute.xlu0 %13929  ;;  %vm21002_vm10 = vmmov %vm20998_vm6 }
 0x79b   :  { %16625 = vrot.lane.b32.xlu0 %v19644_v41, %s20987_s5  ;;  %17441 = vmatmul.mubr.msk.f32.vlgmr.msra.gmra.mrb[56].mxu1 %vm8615_vm1, %v17435_v3  ;;  %v13603_v30 = vpop.permute.xlu1 %13602 }
 0x79c   :  { %16298 = vrot.lane.b32.xlu1 %v19654_v8, %s20982_s3  ;;  %v13604_v31 = vsel %vm20988_vm8, %v13601_v28, %v13603_v30  ;;  %v13610_v32 = vsel %vm20989_vm9, %v13603_v30, %v13591_v26  ;;  %17862 = vmatprep.subr.mxu1 %v18333_v2  ;;  %vm21000_vm8 = vmmov %vm20998_vm6 }
 0x79d   :  { %17442 = vmatprep.subr.msk.mxu0 %vm8427_vm15, %v13604_v31  ;;  %17863 = vmatpush3.msk.msra.mxu1 %vm8427_vm15, %v13610_v32  ;;  %vm21001_vm9 = vmmov %vm20998_vm6 }
 0x79e   :  { %17443 = vmatpush1.msk.msra.mxu0 %vm8427_vm15, %v13605_v33  ;;  %17864 = vmatprep.mubr.msk.f32.mxu1 %vm18344_vm3, %v18333_v2  ;;  %v13928_v41 = vpop.permute.xlu0 %13927 }
 0x79f   :  { %16623 = vrot.lane.b32.xlu0 %v19641_v38, %s20987_s5  ;;  %v13946_v34 = vsel %vm20991_vm11, %v13928_v41, %v13930_v19  ;;  %17865 = vmatmul.mubr.msk.f32.vlgmr.msra.gmra.mrb[88].mxu1 %vm8615_vm1, %v17435_v3  ;;  %v13932_v35 = vpop.permute.xlu1 %13931  ;;  %vm21003_vm11 = vmmov %vm20998_vm6 }
 0x7a0   :  { %16627 = vrot.lane.b32.xlu1 %v19651_v48, %s20987_s5  ;;  %v13945_v36 = vsel %vm20992_vm12, %v13930_v19, %v13932_v35  ;;  %17444 = vmatmul.mubr.msk.f32.vlgmr.msra.gmra.mrb[10].mxu0 %vm8615_vm1, %v17435_v3  ;;  %v17447_v48 = vld [vmem:[%s20918_s10 + $0x80] sm:$0xff]  ;;  %vm21004_vm12 = vmmov %vm20998_vm6 }
 0x7a1   :  { %17448 = vmatprep.subr.msk.mxu0 %vm8427_vm15, %v13945_v36  ;;  %14109 = vmatprep.mubr.f32.mxu1 %v18333_v2 }
 0x7a2   :  { %17449 = vmatpush1.msk.msra.mxu0 %vm8427_vm15, %v13946_v34  ;;  %v13936_v38 = vpop.permute.xlu0 %13935  ;;  %14038 = vmatprep.mubr.f32.mxu0 %v18333_v2 }
 0x7a3   :  { %16631 = vrot.lane.b32.xlu0 %v19661_v52, %s20987_s5  ;;  %v13934_v37 = vpop.permute.xlu1 %13933 }
 0x7a4   :  { %16629 = vrot.lane.b32.xlu1 %v19665_v54, %s20987_s5  ;;  %v13943_v39 = vsel %vm20993_vm13, %v13934_v37, %v13936_v38  ;;  %v13944_v40 = vsel %vm20994_vm0, %v13932_v35, %v13934_v37  ;;  %17450 = vmatmul.mubr.msk.f32.vlgmr.msra.gmra.mrb[8].mxu0 %vm8615_vm1, %v17447_v48  ;;  %vm21005_vm13 = vcmp.lt.s32.totalorder %v18589_v11, 107 }
 0x7a5   :  { %17451 = vmatprep.subr.msk.mxu1 %vm8427_vm15, %v13943_v39  ;;  %14180 = vmatprep.mubr.f32.mxu0 %v18333_v2  ;;  %vm21006_vm0 = vmmov %vm21005_vm13 }
 0x7a6   :  { %17452 = vmatpush1.msk.msra.mxu1 %vm8427_vm15, %v13944_v40  ;;  %v13940_v52 = vpop.permute.xlu0 %13939 }
 0x7a7   :  { %16635 = vrot.lane.b32.xlu0 %v19654_v8, %s20987_s5  ;;  %v13947_v54 = vsel %vm20995_vm2, %v13940_v52, %v13928_v41  ;;  %17453 = vmatmul.mubr.msk.f32.vlgmr.msra.gmra.mrb[56].mxu1 %vm8615_vm1, %v17447_v48  ;;  %v13938_v42 = vpop.permute.xlu1 %13937  ;;  %v16960_v8 = vld [vmem:[%s20919_s11] sm:$0xff]  ;;  %vm21007_vm2 = vmmov %vm21006_vm0 }
 0x7a8   :  { %16633 = vrot.lane.b32.xlu1 %v19672_v56, %s20987_s5  ;;  %v13941_v44 = vsel %vm20996_vm4, %v13938_v42, %v13940_v52  ;;  %v13942_v45 = vsel %vm20997_vm5, %v13936_v38, %v13938_v42  ;;  %17867 = vmatprep.subr.mxu1 %v18333_v2  ;;  %vm21008_vm4 = vmmov %vm21006_vm0  ;;  %v17483_v38 = vld [vmem:[%s20918_s10 + $0x98] sm:$0xff] }
 0x7a9   :  { %17454 = vmatprep.subr.msk.mxu0 %vm8427_vm15, %v13941_v44  ;;  %17868 = vmatpush3.msk.msra.mxu1 %vm8427_vm15, %v13947_v54  ;;  %vm21009_vm5 = vmmov %vm21006_vm0 }
 0x7aa   :  { %17455 = vmatpush1.msk.msra.mxu0 %vm8427_vm15, %v13942_v45  ;;  %17869 = vmatprep.mubr.msk.f32.mxu1 %vm18344_vm3, %v18333_v2  ;;  %v14269_v56 = vpop.permute.xlu0 %14268 }
 0x7ab   :  { %17870 = vmatmul.mubr.msk.f32.vlgmr.msra.gmra.mrb[90].mxu1 %vm8615_vm1, %v17447_v48  ;;  %v14267_v47 = vpop.permute.xlu1 %14266  ;;  %17456 = vmatmul.mubr.msk.f32.vlgmr.msra.gmra.mrb[10].mxu0 %vm8615_vm1, %v17447_v48 }
 0x7ac   :  { %16963 = vperm.xlu1 %18228, %v16960_v8   ;;  %v14282_v49 = vsel %vm20998_vm6, %v14267_v47, %v14269_v56  ;;  %14446 = vmatprep.mubr.f32.mxu1 %v18333_v2  ;;  %vm21010_vm6 = vmmov %vm21006_vm0 }
 0x7ad   :  { %17460 = vmatprep.subr.msk.mxu0 %vm8427_vm15, %v14282_v49  ;;  %14375 = vmatprep.mubr.f32.mxu0 %v18333_v2 }
 0x7ae   :  { %v14271_v50 = vpop.permute.xlu0 %14270  ;;  %v8919_v53 = vpop.f32.mrb[58].mxu1 }
 0x7af   :  { %v14265_v61 = vpop.permute.xlu1 %14264  ;;  %v17791_v62 = vpop.f32.mrb[59].mxu1  ;;  %v14281_v59 = vsel %vm21001_vm9, %v14269_v56, %v14271_v50 }
 0x7b0   :  { %v14283_v4 = vsel %vm20999_vm7, %v14265_v61, %v14267_v47  ;;  %vm21011_vm7 = vmmov %vm21006_vm0 }
 0x7b1   :  { %17461 = vmatpush1.msk.msra.mxu0 %vm8427_vm15, %v14283_v4  ;;  %v17495_v4 = vld [vmem:[%s20918_s10 + $0xa0] sm:$0xff] }
 0x7b2   :  { %v14275_v57 = vpop.permute.xlu0 %14274  ;;  %17462 = vmatmul.mubr.msk.f32.vlgmr.msra.gmra.mrb[8].mxu0 %vm8615_vm1, %v17459_v63 }
 0x7b3   :  { %v14273_v58 = vpop.permute.xlu1 %14272  ;;  %14517 = vmatprep.mubr.f32.mxu0 %v18333_v2 }
 0x7b4   :  { %v14280_v6 = vsel %vm21000_vm8, %v14271_v50, %v14273_v58  ;;  %v14279_v1 = vsel %vm21004_vm12, %v14273_v58, %v14275_v57  ;;  %vm21012_vm8 = vcmp.lt.s32.totalorder %v18589_v11, 106 }
 0x7b5   :  { %17463 = vmatprep.subr.msk.mxu1 %vm8427_vm15, %v14280_v6  ;;  %vm21013_vm9 = vmmov %vm21012_vm8 }
 0x7b6   :  { %17464 = vmatpush1.msk.msra.mxu1 %vm8427_vm15, %v14281_v59  ;;  %v14604_v60 = vpop.permute.xlu0 %14603  ;;  %vm21016_vm12 = vmmov %vm21012_vm8 }
 0x7b7   :  { %17465 = vmatmul.mubr.msk.f32.vlgmr.msra.gmra.mrb[56].mxu1 %vm8615_vm1, %v17459_v63  ;;  %v14277_v7 = vpop.permute.xlu1 %14276  ;;  %17872 = vmatprep.subr.mxu1 %v18333_v2 }
 0x7b8   :  { %v14278_v9 = vsel %vm21002_vm10, %v14275_v57, %v14277_v7  ;;  %v14284_v10 = vsel %vm21003_vm11, %v14277_v7, %v14265_v61  ;;  %17874 = vmatprep.mubr.msk.f32.mxu1 %vm18344_vm3, %v18333_v2  ;;  %vm21014_vm10 = vmmov %vm21012_vm8 }
 0x7b9   :  { %17466 = vmatprep.subr.msk.mxu0 %vm8427_vm15, %v14278_v9  ;;  %17873 = vmatpush3.msk.msra.mxu1 %vm8427_vm15, %v14284_v10  ;;  %vm21015_vm11 = vmmov %vm21012_vm8 }
 0x7ba   :  { %17467 = vmatpush1.msk.msra.mxu0 %vm8427_vm15, %v14279_v1  ;;  %v14602_v13 = vpop.permute.xlu0 %14601  ;;  %v9226_v14 = vpop.f32.mrb[60].mxu1 }
 0x7bb   :  { %v14620_v15 = vsel %vm21005_vm13, %v14602_v13, %v14604_v60  ;;  %17875 = vmatmul.mubr.msk.f32.vlgmr.msra.gmra.mrb[92].mxu1 %vm8615_vm1, %v17459_v63  ;;  %v14606_v16 = vpop.permute.xlu1 %14605  ;;  %17468 = vmatmul.mubr.msk.f32.vlgmr.msra.gmra.mrb[10].mxu0 %vm8615_vm1, %v17459_v63  ;;  %v9227_v17 = vadd.f32 %v9226_v14, %v8919_v53  ;;  %v17796_v21 = vpop.f32.mrb[61].mxu1  ;;  %vm21017_vm13 = vmmov %vm21012_vm8 }
 0x7bc   :  { %v14619_v22 = vsel %vm21006_vm0, %v14604_v60, %v14606_v16  ;;  %14783 = vmatprep.mubr.f32.mxu1 %v18333_v2  ;;  %14712 = vmatprep.mubr.f32.mxu0 %v18333_v2  ;;  %vm21018_vm0 = vmmov %vm21012_vm8 }
 0x7bd   :  { %17472 = vmatprep.subr.msk.mxu0 %vm8427_vm15, %v14619_v22 }
 0x7be   :  { %17473 = vmatpush1.msk.msra.mxu0 %vm8427_vm15, %v14620_v15  ;;  %v14610_v23 = vpop.permute.xlu0 %14609 }
 0x7bf   :  { %v14608_v25 = vpop.permute.xlu1 %14607  ;;  %17474 = vmatmul.mubr.msk.f32.vlgmr.msra.gmra.mrb[8].mxu0 %vm8615_vm1, %v17471_v24 }
 0x7c0   :  { %v14617_v26 = vsel %vm21007_vm2, %v14608_v25, %v14610_v23  ;;  %v14618_v27 = vsel %vm21008_vm4, %v14606_v16, %v14608_v25  ;;  %14854 = vmatprep.mubr.f32.mxu0 %v18333_v2  ;;  %vm21019_vm2 = vcmp.lt.s32.totalorder %v18589_v11, 90 }
 0x7c1   :  { %17475 = vmatprep.subr.msk.mxu1 %vm8427_vm15, %v14617_v26  ;;  %vm21020_vm4 = vmmov %vm21019_vm2 }
 0x7c2   :  { %17476 = vmatpush1.msk.msra.mxu1 %vm8427_vm15, %v14618_v27  ;;  %v14614_v28 = vpop.permute.xlu0 %14613 }
 0x7c3   :  { %v14621_v3 = vsel %vm21009_vm5, %v14614_v28, %v14602_v13  ;;  %17477 = vmatmul.mubr.msk.f32.vlgmr.msra.gmra.mrb[56].mxu1 %vm8615_vm1, %v17471_v24  ;;  %v14612_v12 = vpop.permute.xlu1 %14611  ;;  %17877 = vmatprep.subr.mxu1 %v18333_v2  ;;  %vm21021_vm5 = vmmov %vm21019_vm2 }
 0x7c4   :  { %v14615_v29 = vsel %vm21010_vm6, %v14612_v12, %v14614_v28  ;;  %v14616_v18 = vsel %vm21011_vm7, %v14610_v23, %v14612_v12  ;;  %17878 = vmatpush3.msk.msra.mxu1 %vm8427_vm15, %v14621_v3  ;;  %17879 = vmatprep.mubr.msk.f32.mxu1 %vm18344_vm3, %v18333_v2  ;;  %vm21022_vm6 = vmmov %vm21019_vm2  ;;  %v17507_v23 = vld [vmem:[%s20918_s10 + $0xa8] sm:$0xff] }
 0x7c5   :  { %17478 = vmatprep.subr.msk.mxu0 %vm8427_vm15, %v14615_v29  ;;  %vm21023_vm7 = vmmov %vm21019_vm2 }
 0x7c6   :  { %17479 = vmatpush1.msk.msra.mxu0 %vm8427_vm15, %v14616_v18  ;;  %v14943_v19 = vpop.permute.xlu0 %14942 }
 0x7c7   :  { %17880 = vmatmul.mubr.msk.f32.vlgmr.msra.gmra.mrb[94].mxu1 %vm8615_vm1, %v17471_v24  ;;  %v14941_v30 = vpop.permute.xlu1 %14940  ;;  %17480 = vmatmul.mubr.msk.f32.vlgmr.msra.gmra.mrb[10].mxu0 %vm8615_vm1, %v17471_v24 }
 0x7c8   :  { %v14956_v31 = vsel %vm21012_vm8, %v14941_v30, %v14943_v19  ;;  %15120 = vmatprep.mubr.f32.mxu1 %v18333_v2  ;;  %15049 = vmatprep.mubr.f32.mxu0 %v18333_v2  ;;  %vm21024_vm8 = vmmov %vm21019_vm2 }
 0x7c9   :  { %17484 = vmatprep.subr.msk.mxu0 %vm8427_vm15, %v14956_v31 }
 0x7ca   :  { %v14945_v32 = vpop.permute.xlu0 %14944  ;;  %v9556_v33 = vpop.f32.mrb[62].mxu1 }
 0x7cb   :  { %v14939_v41 = vpop.permute.xlu1 %14938  ;;  %v9566_v34 = vadd.f32 %v9556_v33, %v9227_v17  ;;  %v17801_v35 = vpop.f32.mrb[63].mxu1  ;;  %v14955_v40 = vsel %vm21015_vm11, %v14943_v19, %v14945_v32 }
 0x7cc   :  { %v14957_v36 = vsel %vm21013_vm9, %v14939_v41, %v14941_v30  ;;  %vm21025_vm9 = vmmov %vm21019_vm2 }
 0x7cd   :  { %17485 = vmatpush1.msk.msra.mxu0 %vm8427_vm15, %v14957_v36  ;;  %v17519_v36 = vld [vmem:[%s20918_s10 + $0xb0] sm:$0xff] }
 0x7ce   :  { %v14949_v37 = vpop.permute.xlu0 %14948  ;;  %17486 = vmatmul.mubr.msk.f32.vlgmr.msra.gmra.mrb[8].mxu0 %vm8615_vm1, %v17483_v38 }
 0x7cf   :  { %v14947_v48 = vpop.permute.xlu1 %14946  ;;  %15191 = vmatprep.mubr.f32.mxu0 %v18333_v2 }
 0x7d0   :  { %v14954_v39 = vsel %vm21014_vm10, %v14945_v32, %v14947_v48  ;;  %v14953_v45 = vsel %vm21018_vm0, %v14947_v48, %v14949_v37  ;;  %vm21026_vm10 = vcmp.lt.s32.totalorder %v18589_v11, 89 }
 0x7d1   :  { %17487 = vmatprep.subr.msk.mxu1 %vm8427_vm15, %v14954_v39  ;;  %vm21027_vm11 = vmmov %vm21026_vm10 }
 0x7d2   :  { %17488 = vmatpush1.msk.msra.mxu1 %vm8427_vm15, %v14955_v40  ;;  %v15278_v52 = vpop.permute.xlu0 %15277  ;;  %vm21030_vm0 = vmmov %vm21026_vm10 }
 0x7d3   :  { %17489 = vmatmul.mubr.msk.f32.vlgmr.msra.gmra.mrb[56].mxu1 %vm8615_vm1, %v17483_v38  ;;  %v14951_v54 = vpop.permute.xlu1 %14950  ;;  %17882 = vmatprep.subr.mxu1 %v18333_v2 }
 0x7d4   :  { %v14952_v42 = vsel %vm21016_vm12, %v14949_v37, %v14951_v54  ;;  %v14958_v44 = vsel %vm21017_vm13, %v14951_v54, %v14939_v41  ;;  %17884 = vmatprep.mubr.msk.f32.mxu1 %vm18344_vm3, %v18333_v2  ;;  %vm21028_vm12 = vmmov %vm21026_vm10 }
 0x7d5   :  { %17490 = vmatprep.subr.msk.mxu0 %vm8427_vm15, %v14952_v42  ;;  %17883 = vmatpush3.msk.msra.mxu1 %vm8427_vm15, %v14958_v44  ;;  %vm21029_vm13 = vmmov %vm21026_vm10 }
 0x7d6   :  { %17491 = vmatpush1.msk.msra.mxu0 %vm8427_vm15, %v14953_v45  ;;  %v15276_v8 = vpop.permute.xlu0 %15275  ;;  %v9893_v56 = vpop.f32.mrb[64].mxu1 }
 0x7d7   :  { %v15294_v47 = vsel %vm21019_vm2, %v15276_v8, %v15278_v52  ;;  %17885 = vmatmul.mubr.msk.f32.vlgmr.msra.gmra.mrb[96].mxu1 %vm8615_vm1, %v17483_v38  ;;  %v15280_v49 = vpop.permute.xlu1 %15279  ;;  %17492 = vmatmul.mubr.msk.f32.vlgmr.msra.gmra.mrb[10].mxu0 %vm8615_vm1, %v17483_v38  ;;  %v9903_v50 = vadd.f32 %v9893_v56, %v9566_v34  ;;  %v17806_v53 = vpop.f32.mrb[65].mxu1  ;;  %vm21031_vm2 = vmmov %vm21030_vm0 }
 0x7d8   :  { %v15293_v61 = vsel %vm21020_vm4, %v15278_v52, %v15280_v49  ;;  %15457 = vmatprep.mubr.f32.mxu1 %v18333_v2  ;;  %15386 = vmatprep.mubr.f32.mxu0 %v18333_v2  ;;  %vm21032_vm4 = vmmov %vm21030_vm0 }
 0x7d9   :  { %17496 = vmatprep.subr.msk.mxu0 %vm8427_vm15, %v15293_v61  ;;  %v17531_v61 = vld [vmem:[%s20918_s10 + $0xb8] sm:$0xff] }
 0x7da   :  { %17497 = vmatpush1.msk.msra.mxu0 %vm8427_vm15, %v15294_v47  ;;  %v15284_v62 = vpop.permute.xlu0 %15283 }
 0x7db   :  { %v15282_v63 = vpop.permute.xlu1 %15281  ;;  %17498 = vmatmul.mubr.msk.f32.vlgmr.msra.gmra.mrb[8].mxu0 %vm8615_vm1, %v17495_v4 }
 0x7dc   :  { %v15291_v57 = vsel %vm21021_vm5, %v15282_v63, %v15284_v62  ;;  %v15292_v58 = vsel %vm21022_vm6, %v15280_v49, %v15282_v63  ;;  %15528 = vmatprep.mubr.f32.mxu0 %v18333_v2  ;;  %vm21033_vm5 = vcmp.lt.s32.totalorder %v18589_v11, 88 }
 0x7dd   :  { %17499 = vmatprep.subr.msk.mxu1 %vm8427_vm15, %v15291_v57  ;;  %vm21034_vm6 = vmmov %vm21033_vm5 }
 0x7de   :  { %17500 = vmatpush1.msk.msra.mxu1 %vm8427_vm15, %v15292_v58  ;;  %v15288_v6 = vpop.permute.xlu0 %15287 }
 0x7df   :  { %v15295_v59 = vsel %vm21023_vm7, %v15288_v6, %v15276_v8  ;;  %17501 = vmatmul.mubr.msk.f32.vlgmr.msra.gmra.mrb[56].mxu1 %vm8615_vm1, %v17495_v4  ;;  %v15286_v60 = vpop.permute.xlu1 %15285  ;;  %17887 = vmatprep.subr.mxu1 %v18333_v2  ;;  %vm21035_vm7 = vmmov %vm21033_vm5 }
 0x7e0   :  { %v15289_v7 = vsel %vm21024_vm8, %v15286_v60, %v15288_v6  ;;  %v15290_v9 = vsel %vm21025_vm9, %v15284_v62, %v15286_v60  ;;  %17888 = vmatpush3.msk.msra.mxu1 %vm8427_vm15, %v15295_v59  ;;  %17889 = vmatprep.mubr.msk.f32.mxu1 %vm18344_vm3, %v18333_v2  ;;  %vm21036_vm8 = vmmov %vm21033_vm5 }
 0x7e1   :  { %17502 = vmatprep.subr.msk.mxu0 %vm8427_vm15, %v15289_v7  ;;  %vm21037_vm9 = vmmov %vm21033_vm5 }
 0x7e2   :  { %17503 = vmatpush1.msk.msra.mxu0 %vm8427_vm15, %v15290_v9  ;;  %v15617_v10 = vpop.permute.xlu0 %15616 }
 0x7e3   :  { %17890 = vmatmul.mubr.msk.f32.vlgmr.msra.gmra.mrb[98].mxu1 %vm8615_vm1, %v17495_v4  ;;  %v15615_v1 = vpop.permute.xlu1 %15614  ;;  %17504 = vmatmul.mubr.msk.f32.vlgmr.msra.gmra.mrb[10].mxu0 %vm8615_vm1, %v17495_v4 }
 0x7e4   :  { %v15630_v13 = vsel %vm21026_vm10, %v15615_v1, %v15617_v10  ;;  %15794 = vmatprep.mubr.f32.mxu1 %v18333_v2  ;;  %15723 = vmatprep.mubr.f32.mxu0 %v18333_v2  ;;  %vm21038_vm10 = vmmov %vm21033_vm5 }
 0x7e5   :  { %17508 = vmatprep.subr.msk.mxu0 %vm8427_vm15, %v15630_v13 }
 0x7e6   :  { %v10230_v14 = vpop.f32.mrb[66].mxu1 }
 0x7e7   :  { %v10240_v15 = vadd.f32 %v10230_v14, %v9903_v50  ;;  %v17811_v16 = vpop.f32.mrb[67].mxu1 }
 0x7e8   :  { %v15619_v17 = vpop.permute.xlu0 %15618  ;;  %v15613_v21 = vpop.permute.xlu1 %15612 }
 0x7e9   :  { %v15631_v22 = vsel %vm21027_vm11, %v15613_v21, %v15615_v1  ;;  %v15629_v27 = vsel %vm21029_vm13, %v15617_v10, %v15619_v17  ;;  %vm21039_vm11 = vmmov %vm21033_vm5 }
 0x7ea   :  { %17509 = vmatpush1.msk.msra.mxu0 %vm8427_vm15, %v15631_v22 }
 0x7eb   :  { %17510 = vmatmul.mubr.msk.f32.vlgmr.msra.gmra.mrb[8].mxu0 %vm8615_vm1, %v17507_v23 }
 0x7ec   :  { %15865 = vmatprep.mubr.f32.mxu0 %v18333_v2 }
 0x7ed   :  { %v15623_v24 = vpop.permute.xlu0 %15622 }
 0x7ee   :  { %v15621_v25 = vpop.permute.xlu1 %15620 }
 0x7ef   :  { %v15628_v26 = vsel %vm21028_vm12, %v15619_v17, %v15621_v25  ;;  %v15627_v31 = vsel %vm21032_vm4, %v15621_v25, %v15623_v24  ;;  %vm21040_vm12 = vcmp.lt.s32.totalorder %v18589_v11, 86 }
 0x7f0   :  { %17511 = vmatprep.subr.msk.mxu1 %vm8427_vm15, %v15628_v26  ;;  %vm21041_vm13 = vmmov %vm21040_vm12 }
 0x7f1   :  { %17512 = vmatpush1.msk.msra.mxu1 %vm8427_vm15, %v15629_v27  ;;  %v15952_v28 = vpop.permute.xlu0 %15951 }
 0x7f2   :  { %17513 = vmatmul.mubr.msk.f32.vlgmr.msra.gmra.mrb[56].mxu1 %vm8615_vm1, %v17507_v23  ;;  %v15625_v3 = vpop.permute.xlu1 %15624  ;;  %17892 = vmatprep.subr.mxu1 %v18333_v2  ;;  %v10567_v12 = vpop.f32.mrb[68].mxu1 }
 0x7f3   :  { %v15626_v29 = vsel %vm21030_vm0, %v15623_v24, %v15625_v3  ;;  %v15632_v18 = vsel %vm21031_vm2, %v15625_v3, %v15613_v21  ;;  %17894 = vmatprep.mubr.msk.f32.mxu1 %vm18344_vm3, %v18333_v2  ;;  %v10577_v19 = vadd.f32 %v10567_v12, %v10240_v15  ;;  %v17816_v30 = vpop.f32.mrb[69].mxu1  ;;  %v17543_v21 = vld [vmem:[%s20918_s10 + $0xc0] sm:$0xff]  ;;  %vm21043_vm0 = vmmov %vm21040_vm12 }
 0x7f4   :  { %17514 = vmatprep.subr.msk.mxu0 %vm8427_vm15, %v15626_v29  ;;  %17893 = vmatpush3.msk.msra.mxu1 %vm8427_vm15, %v15632_v18  ;;  %vm21044_vm2 = vmmov %vm21043_vm0 }
 0x7f5   :  { %17515 = vmatpush1.msk.msra.mxu0 %vm8427_vm15, %v15627_v31  ;;  %v15950_v32 = vpop.permute.xlu0 %15949  ;;  %vm21045_vm4 = vmmov %vm21043_vm0 }
 0x7f6   :  { %v15968_v33 = vsel %vm21033_vm5, %v15950_v32, %v15952_v28  ;;  %17895 = vmatmul.mubr.msk.f32.vlgmr.msra.gmra.mrb[100].mxu1 %vm8615_vm1, %v17507_v23  ;;  %v15954_v41 = vpop.permute.xlu1 %15953  ;;  %17516 = vmatmul.mubr.msk.f32.vlgmr.msra.gmra.mrb[10].mxu0 %vm8615_vm1, %v17507_v23  ;;  %vm21046_vm5 = vmmov %vm21043_vm0 }
 0x7f7   :  { %v15967_v34 = vsel %vm21034_vm6, %v15952_v28, %v15954_v41  ;;  %16131 = vmatprep.mubr.f32.mxu1 %v18333_v2  ;;  %16060 = vmatprep.mubr.f32.mxu0 %v18333_v2 }
 0x7f8   :  { %17520 = vmatprep.subr.msk.mxu0 %vm8427_vm15, %v15967_v34 }
 0x7f9   :  { %17521 = vmatpush1.msk.msra.mxu0 %vm8427_vm15, %v15968_v33  ;;  %v15958_v35 = vpop.permute.xlu0 %15957 }
 0x7fa   :  { %v15956_v38 = vpop.permute.xlu1 %15955  ;;  %17522 = vmatmul.mubr.msk.f32.vlgmr.msra.gmra.mrb[8].mxu0 %vm8615_vm1, %v17519_v36 }
 0x7fb   :  { %v15965_v37 = vsel %vm21035_vm7, %v15956_v38, %v15958_v35  ;;  %v15966_v48 = vsel %vm21036_vm8, %v15954_v41, %v15956_v38  ;;  %16202 = vmatprep.mubr.f32.mxu0 %v18333_v2 }
 0x7fc   :  { %17523 = vmatprep.subr.msk.mxu1 %vm8427_vm15, %v15965_v37 }
 0x7fd   :  { %17524 = vmatpush1.msk.msra.mxu1 %vm8427_vm15, %v15966_v48  ;;  %v15962_v39 = vpop.permute.xlu0 %15961 }
 0x7fe   :  { %v15969_v40 = vsel %vm21037_vm9, %v15962_v39, %v15950_v32  ;;  %17525 = vmatmul.mubr.msk.f32.vlgmr.msra.gmra.mrb[56].mxu1 %vm8615_vm1, %v17519_v36  ;;  %v15960_v52 = vpop.permute.xlu1 %15959  ;;  %17897 = vmatprep.subr.mxu1 %v18333_v2 }
 0x7ff   :  { %v15963_v54 = vsel %vm21038_vm10, %v15960_v52, %v15962_v39  ;;  %v15964_v42 = vsel %vm21039_vm11, %v15958_v35, %v15960_v52  ;;  %17898 = vmatpush3.msk.msra.mxu1 %vm8427_vm15, %v15969_v40  ;;  %17899 = vmatprep.mubr.msk.f32.mxu1 %vm18344_vm3, %v18333_v2 }
 0x800   :  { %17526 = vmatprep.subr.msk.mxu0 %vm8427_vm15, %v15963_v54 }
 0x801   :  { %17527 = vmatpush1.msk.msra.mxu0 %vm8427_vm15, %v15964_v42  ;;  %v16291_v44 = vpop.permute.xlu0 %16290 }
 0x802   :  { %17900 = vmatmul.mubr.msk.f32.vlgmr.msra.gmra.mrb[102].mxu1 %vm8615_vm1, %v17519_v36  ;;  %v16289_v45 = vpop.permute.xlu1 %16288  ;;  %17528 = vmatmul.mubr.msk.f32.vlgmr.msra.gmra.mrb[10].mxu0 %vm8615_vm1, %v17519_v36  ;;  %v10904_v8 = vpop.f32.mrb[70].mxu1 }
 0x803   :  { %v16304_v56 = vsel %vm7326_vm14, %v16289_v45, %v16291_v44  ;;  %16397 = vmatprep.mubr.f32.mxu0 %v18333_v2  ;;  %16468 = vmatprep.mubr.f32.mxu1 %v18333_v2  ;;  %v10914_v47 = vadd.f32 %v10904_v8, %v10577_v19  ;;  %v17821_v49 = vpop.f32.mrb[71].mxu1 }
 0x804   :  { %17532 = vmatprep.subr.msk.mxu0 %vm8427_vm15, %v16304_v56 }
 0x805   :  { %v16293_v50 = vpop.permute.xlu0 %16292 }
 0x806   :  { %v16287_v53 = vpop.permute.xlu1 %16286  ;;  %v16303_v58 = vsel %vm7326_vm14, %v16291_v44, %v16293_v50 }
 0x807   :  { %v16305_v62 = vsel %vm7326_vm14, %v16287_v53, %v16289_v45 }
 0x808   :  { %17533 = vmatpush1.msk.msra.mxu0 %vm8427_vm15, %v16305_v62 }
 0x809   :  { %v16297_v4 = vpop.permute.xlu0 %16296  ;;  %17534 = vmatmul.mubr.msk.f32.vlgmr.msra.gmra.mrb[8].mxu0 %vm8615_vm1, %v17531_v61 }
 0x80a   :  { %v16295_v63 = vpop.permute.xlu1 %16294  ;;  %16539 = vmatprep.mubr.f32.mxu0 %v18333_v2 }
 0x80b   :  { %v16302_v57 = vsel %vm7326_vm14, %v16293_v50, %v16295_v63  ;;  %v16301_v13 = vsel %vm7326_vm14, %v16295_v63, %v16297_v4 }
 0x80c   :  { %17535 = vmatprep.subr.msk.mxu1 %vm8427_vm15, %v16302_v57 }
 0x80d   :  { %17536 = vmatpush1.msk.msra.mxu1 %vm8427_vm15, %v16303_v58  ;;  %v16626_v6 = vpop.permute.xlu0 %16625 }
 0x80e   :  { %17537 = vmatmul.mubr.msk.f32.vlgmr.msra.gmra.mrb[56].mxu1 %vm8615_vm1, %v17531_v61  ;;  %v16299_v59 = vpop.permute.xlu1 %16298  ;;  %17902 = vmatprep.subr.mxu1 %v18333_v2  ;;  %v11241_v60 = vpop.f32.mrb[72].mxu1 }
 0x80f   :  { %v16300_v7 = vsel %vm7326_vm14, %v16297_v4, %v16299_v59  ;;  %v16306_v9 = vsel %vm7326_vm14, %v16299_v59, %v16287_v53  ;;  %17904 = vmatprep.mubr.msk.f32.mxu1 %vm18344_vm3, %v18333_v2  ;;  %v11251_v10 = vadd.f32 %v11241_v60, %v10914_v47  ;;  %v17826_v1 = vpop.f32.mrb[73].mxu1  ;;  %vm21042_vm14 = vmmov %vm21040_vm12 }
 0x810   :  { %17538 = vmatprep.subr.msk.mxu0 %vm8427_vm15, %v16300_v7  ;;  %17903 = vmatpush3.msk.msra.mxu1 %vm8427_vm15, %v16306_v9 }
 0x811   :  { %17539 = vmatpush1.msk.msra.mxu0 %vm8427_vm15, %v16301_v13  ;;  %v16624_v14 = vpop.permute.xlu0 %16623 }
 0x812   :  { %v16642_v15 = vsel %vm21040_vm12, %v16624_v14, %v16626_v6  ;;  %17540 = vmatmul.mubr.msk.f32.vlgmr.msra.gmra.mrb[10].mxu0 %vm8615_vm1, %v17531_v61  ;;  %17905 = vmatmul.mubr.msk.f32.vlgmr.msra.gmra.mrb[104].mxu1 %vm8615_vm1, %v17531_v61  ;;  %v16628_v16 = vpop.permute.xlu1 %16627 }
 0x813   :  { %v16641_v17 = vsel %vm21041_vm13, %v16626_v6, %v16628_v16  ;;  %16734 = vmatprep.mubr.f32.mxu0 %v18333_v2  ;;  %16805 = vmatprep.mubr.f32.mxu1 %v18333_v2 }
 0x814   :  { %17544 = vmatprep.subr.msk.mxu0 %vm8427_vm15, %v16641_v17 }
 0x815   :  { %17545 = vmatpush1.msk.msra.mxu0 %vm8427_vm15, %v16642_v15  ;;  %v16632_v22 = vpop.permute.xlu0 %16631 }
 0x816   :  { %17546 = vmatmul.mubr.msk.f32.vlgmr.msra.gmra.mrb[8].mxu0 %vm8615_vm1, %v17543_v21  ;;  %v16630_v23 = vpop.permute.xlu1 %16629 }
 0x817   :  { %v16639_v24 = vsel %vm21042_vm14, %v16630_v23, %v16632_v22  ;;  %v16640_v25 = vsel %vm21043_vm0, %v16628_v16, %v16630_v23  ;;  %16876 = vmatprep.mubr.f32.mxu0 %v18333_v2 }
 0x818   :  { %17547 = vmatprep.subr.msk.mxu1 %vm8427_vm15, %v16639_v24 }
 0x819   :  { %17548 = vmatpush1.msk.msra.mxu1 %vm8427_vm15, %v16640_v25  ;;  %v16636_v26 = vpop.permute.xlu0 %16635 }
 0x81a   :  { %v16643_v27 = vsel %vm21044_vm2, %v16636_v26, %v16624_v14  ;;  %17549 = vmatmul.mubr.msk.f32.vlgmr.msra.gmra.mrb[56].mxu1 %vm8615_vm1, %v17543_v21  ;;  %v16634_v28 = vpop.permute.xlu1 %16633  ;;  %17907 = vmatprep.subr.mxu1 %v18333_v2 }
 0x81b   :  { %v16637_v3 = vsel %vm21045_vm4, %v16634_v28, %v16636_v26  ;;  %v16638_v12 = vsel %vm21046_vm5, %v16632_v22, %v16634_v28  ;;  %17908 = vmatpush3.msk.msra.mxu1 %vm8427_vm15, %v16643_v27  ;;  %17909 = vmatprep.mubr.msk.f32.mxu1 %vm18344_vm3, %v18333_v2 }
 0x81c   :  { %17550 = vmatprep.subr.msk.mxu0 %vm8427_vm15, %v16637_v3 }
 0x81d   :  { %17551 = vmatpush1.msk.msra.mxu0 %vm8427_vm15, %v16638_v12 }
 0x81e   :  { %17552 = vmatmul.mubr.msk.f32.vlgmr.msra.gmra.mrb[10].mxu0 %vm8615_vm1, %v17543_v21  ;;  %17910 = vmatmul.mubr.msk.f32.vlgmr.msra.gmra.mrb[106].mxu1 %vm8615_vm1, %v17543_v21  ;;  %v11578_v29 = vpop.f32.mrb[74].mxu1 }
 0x81f   :  { %v11588_v18 = vadd.f32 %v11578_v29, %v11251_v10  ;;  %v17831_v19 = vpop.f32.mrb[75].mxu1 }
 0x82a   :  { %v11915_v30 = vpop.f32.mrb[76].mxu1 }
 0x82b   :  { %v11925_v31 = vadd.f32 %v11915_v30, %v11588_v18  ;;  %v17836_v11 = vpop.f32.mrb[77].mxu1  ;;  %v16964_v22 = vpop.permute.xlu1 %16963 }
 0x83a   :  { %v12252_v32 = vpop.f32.mrb[78].mxu1 }
 0x83b   :  { %v12262_v33 = vadd.f32 %v12252_v32, %v11925_v31  ;;  %v17841_v41 = vpop.f32.mrb[79].mxu1 }
 0x847   :  { %v12589_v34 = vpop.f32.mrb[80].mxu1 }
 0x848   :  { %v12599_v35 = vadd.f32 %v12589_v34, %v12262_v33  ;;  %v17846_v2 = vpop.f32.mrb[81].mxu1 }
 0x851   :  { %v12905_v36 = vpop.f32.mrb[82].mxu1 }
 0x852   :  { %v12915_v38 = vadd.f32 %v12905_v36, %v12599_v35  ;;  %v17851_v37 = vpop.f32.mrb[83].mxu1 }
 0x859   :  { %v13242_v48 = vpop.f32.mrb[84].mxu1 }
 0x85a   :  { %v13252_v39 = vadd.f32 %v13242_v48, %v12915_v38  ;;  %v17856_v40 = vpop.f32.mrb[85].mxu1 }
 0x865   :  { %v13579_v52 = vpop.f32.mrb[86].mxu1 }
 0x866   :  { %v13589_v54 = vadd.f32 %v13579_v52, %v13252_v39  ;;  %v17861_v42 = vpop.f32.mrb[87].mxu1 }
 0x872   :  { %v13916_v44 = vpop.f32.mrb[88].mxu1 }
 0x873   :  { %v13926_v45 = vadd.f32 %v13916_v44, %v13589_v54  ;;  %v17866_v8 = vpop.f32.mrb[89].mxu1  ;;  %v16973_v44 = vld [vmem:[%s20920_s12] sm:$0xff] }
 0x87e   :  { %v14253_v56 = vpop.f32.mrb[90].mxu1 }
 0x87f   :  { %v14263_v47 = vadd.f32 %v14253_v56, %v13926_v45  ;;  %v17871_v49 = vpop.f32.mrb[91].mxu1 }
 0x88e   :  { %v14590_v50 = vpop.f32.mrb[92].mxu1 }
 0x88f   :  { %v14600_v53 = vadd.f32 %v14590_v50, %v14263_v47  ;;  %v17876_v61 = vpop.f32.mrb[93].mxu1 }
 0x89a   :  { %v14927_v62 = vpop.f32.mrb[94].mxu1 }
 0x89b   :  { %v14937_v4 = vadd.f32 %v14927_v62, %v14600_v53  ;;  %v17881_v63 = vpop.f32.mrb[95].mxu1 }
 0x8aa   :  { %v15264_v57 = vpop.f32.mrb[96].mxu1 }
 0x8ab   :  { %v15274_v58 = vadd.f32 %v15264_v57, %v14937_v4  ;;  %v17886_v6 = vpop.f32.mrb[97].mxu1 }
 0x8b6   :  { %v15601_v59 = vpop.f32.mrb[98].mxu1 }
 0x8b7   :  { %v15611_v60 = vadd.f32 %v15601_v59, %v15274_v58  ;;  %v17891_v7 = vpop.f32.mrb[99].mxu1 }
 0x8c9   :  { %v15938_v9 = vpop.f32.mrb[100].mxu1 }
 0x8ca   :  { %v15948_v10 = vadd.f32 %v15938_v9, %v15611_v60  ;;  %v17896_v1 = vpop.f32.mrb[101].mxu1 }
 0x8d5   :  { %v16275_v13 = vpop.f32.mrb[102].mxu1 }
 0x8d6   :  { %v16285_v14 = vadd.f32 %v16275_v13, %v15948_v10  ;;  %v17901_v15 = vpop.f32.mrb[103].mxu1 }
 0x8e5   :  { %v16612_v16 = vpop.f32.mrb[104].mxu1 }
 0x8e6   :  { %v16622_v17 = vadd.f32 %v16612_v16, %v16285_v14  ;;  %v17906_v21 = vpop.f32.mrb[105].mxu1 }
 0x8e9   :  { %v16736_v23 = vpop.f32.mrb[8].mxu0 }
 0x8ea   :  { %v16966_v24 = vadd.f32 %v16964_v22, %v16736_v23  ;;  %v16738_v25 = vpop.f32.mrb[9].mxu0 }
 0x8eb   :  { %v16967_v26 = vadd.f32 %v16964_v22, %v16738_v25 }
 0x8ec   :  { %v16975_v27 = vmul.f32 %v16966_v24, %v19545_v43 }
 0x8ed   :  { %v16976_v28 = vmul.f32 %v16967_v26, %v19547_v46  ;;  %v16807_v3 = vpop.f32.mrb[56].mxu1 }
 0x8ee   :  { %v16968_v12 = vadd.f32 %v16964_v22, %v16807_v3  ;;  %v16809_v29 = vpop.f32.mrb[57].mxu1 }
 0x8ef   :  { %v16982_v18 = vadd.f32 %v16976_v28, %v16975_v27  ;;  %v16969_v19 = vadd.f32 %v16964_v22, %v16809_v29 }
 0x8f0   :  { %v16977_v30 = vmul.f32 %v16968_v12, %v19550_v51 }
 0x8f1   :  { %v16978_v31 = vmul.f32 %v16969_v19, %v19553_v55  ;;  %v16878_v11 = vpop.f32.mrb[10].mxu0  ;;  %v16949_v32 = vpop.f32.mrb[106].mxu1 }
 0x8f2   :  { %v16983_v33 = vadd.f32 %v16982_v18, %v16977_v30  ;;  %v16970_v41 = vadd.f32 %v16964_v22, %v16878_v11  ;;  %v16959_v34 = vadd.f32 %v16949_v32, %v16622_v17  ;;  %v16880_v35 = vpop.f32.mrb[11].mxu0  ;;  %v17911_v2 = vpop.f32.mrb[107].mxu1 }
 0x8f3   :  { %v16971_v36 = vadd.f32 %v16964_v22, %v16880_v35 }
 0x8f4   :  { %v16984_v38 = vadd.f32 %v16983_v33, %v16978_v31  ;;  %v16979_v37 = vmul.f32 %v16970_v41, %v19556_v5  ;;  %v16972_v48 = vadd.f32 %v16964_v22, %v16959_v34 }
 0x8f5   :  { %v16980_v39 = vmul.f32 %v16971_v36, %v19559_v0 }
 0x8f6   :  { %v16985_v40 = vadd.f32 %v16984_v38, %v16979_v37  ;;  %v16981_v52 = vmul.f32 %v16972_v48, %v19562_v20 }
 0x8f8   :  { %v16986_v54 = vadd.f32 %v16985_v40, %v16980_v39 }
 0x8fa   :  { %v16987_v42 = vadd.f32 %v16986_v54, %v16981_v52 }
 0x8fc   :  { %16988 = vadd.xlane.f32.xlu0 %v16987_v42 }
 0x912   :  { %17032 = vperm.xlu0 %18227, %v16973_v44  }
 0x989   :  { %v16989_v45 = vpop.xlane.xlu0 %16988 }
 0x98a   :  { %v16990_v8 = vmul.f32 0.001953125, %v16989_v45 }
 0x98c   :  { %v16991_v56 = vsub.f32 %v16975_v27, %v16990_v8  ;;  %v16992_v47 = vsub.f32 %v16976_v28, %v16990_v8  ;;  %v16993_v49 = vsub.f32 %v16977_v30, %v16990_v8  ;;  %v16994_v50 = vsub.f32 %v16978_v31, %v16990_v8 }
 0x98d   :  { %v16995_v53 = vsub.f32 %v16979_v37, %v16990_v8  ;;  %v16996_v63 = vsub.f32 %v16980_v39, %v16990_v8  ;;  %v16997_v59 = vsub.f32 %v16981_v52, %v16990_v8 }
 0x98e   :  { %v16998_v61 = vmul.f32 %v16991_v56, %v19545_v43  ;;  %v16999_v62 = vmul.f32 %v16992_v47, %v19547_v46  ;;  %v17000_v4 = vmul.f32 %v16993_v49, %v19550_v51  ;;  %v17001_v57 = vmul.f32 %v16994_v50, %v19553_v55 }
 0x98f   :  { %v17002_v60 = vmul.f32 %v16995_v53, %v19556_v5  ;;  %v17003_v10 = vmul.f32 %v16996_v63, %v19559_v0  ;;  %v17004_v43 = vmul.f32 %v16997_v59, %v19562_v20  ;;  %v16974_v5 = vld [vmem:[%s20921_s13] sm:$0xff] }
 0x990   :  { %v17005_v58 = vmul.f32 %v16998_v61, %v16998_v61  ;;  %v17006_v6 = vmul.f32 %v16999_v62, %v16999_v62  ;;  %v17007_v7 = vmul.f32 %v17000_v4, %v17000_v4  ;;  %v17008_v1 = vmul.f32 %v17001_v57, %v17001_v57 }
 0x991   :  { %v17009_v14 = vmul.f32 %v17002_v60, %v17002_v60  ;;  %v17010_v15 = vmul.f32 %v17003_v10, %v17003_v10  ;;  %v17011_v16 = vmul.f32 %v17004_v43, %v17004_v43  ;;  %v17033_v27 = vpop.permute.xlu0 %17032 }
 0x992   :  { %v17012_v9 = vadd.f32 %v17006_v6, %v17005_v58 }
 0x994   :  { %v17013_v13 = vadd.f32 %v17012_v9, %v17007_v7 }
 0x996   :  { %v17014_v46 = vadd.f32 %v17013_v13, %v17008_v1 }
 0x998   :  { %v17015_v51 = vadd.f32 %v17014_v46, %v17009_v14 }
 0x99a   :  { %v17016_v17 = vadd.f32 %v17015_v51, %v17010_v15 }
 0x99c   :  { %v17017_v55 = vadd.f32 %v17016_v17, %v17011_v16 }
 0x99e   :  { %17018 = vadd.xlane.f32.xlu1 %v17017_v55 }
 0x9af   :  { %17044 = vperm.xlu1 %18228, %v16974_v5  }
 0xa2b   :  { %v17019_v21 = vpop.xlane.xlu1 %17018 }
 0xa2c   :  { %v17020_v22 = vmul.f32 0.001953125, %v17019_v21 }
 0xa2e   :  { %v17021_v0 = vadd.f32 1e-05, %v17020_v22 }
 0xa2f   :  { %v17045_v31 = vpop.permute.xlu1 %17044 }
 0xa30   :  { %18289 = vrsqrt.f32 %v17021_v0 }
 0xa3a   :  { %v18290_v23 = vpop.eup %18289 }
 0xa3b   :  { %v17023_v24 = vmul.f32 %v18290_v23, %v16991_v56  ;;  %v17024_v20 = vmul.f32 %v18290_v23, %v16992_v47  ;;  %v17025_v25 = vmul.f32 %v18290_v23, %v16993_v49  ;;  %v17026_v26 = vmul.f32 %v18290_v23, %v16994_v50 }
 0xa3c   :  { %v17027_v28 = vmul.f32 %v18290_v23, %v16995_v53  ;;  %v17028_v3 = vmul.f32 %v18290_v23, %v16996_v63  ;;  %v17029_v12 = vmul.f32 %v18290_v23, %v16997_v59 }
 0xa3d   :  { %v17035_v29 = vmul.f32 %v17033_v27, %v17023_v24  ;;  %v17036_v18 = vmul.f32 %v17033_v27, %v17024_v20  ;;  %v17037_v19 = vmul.f32 %v17033_v27, %v17025_v25  ;;  %v17038_v30 = vmul.f32 %v17033_v27, %v17026_v26  ;;  %v18326_v20 = vld [vmem:[%s20908_s0] sm:$0xff] }
 0xa3e   :  { %v17039_v11 = vmul.f32 %v17033_v27, %v17027_v28  ;;  %v17040_v32 = vmul.f32 %v17033_v27, %v17028_v3  ;;  %v17041_v33 = vmul.f32 %v17033_v27, %v17029_v12  ;;  %v18327_v3 = vld [vmem:[%s20908_s0 + $0x8] sm:$0xff] }
 0xa3f   :  { %v17047_v41 = vadd.f32 %v17045_v31, %v17035_v29  ;;  %v17048_v34 = vadd.f32 %v17045_v31, %v17036_v18  ;;  %v17049_v35 = vadd.f32 %v17045_v31, %v17037_v19  ;;  %v17050_v2 = vadd.f32 %v17045_v31, %v17038_v30  ;;  %v18328_v19 = vld [vmem:[%s20908_s0 + $0x10] sm:$0xff] }
 0xa40   :  { %v17051_v36 = vadd.f32 %v17045_v31, %v17039_v11  ;;  %v17052_v38 = vadd.f32 %v17045_v31, %v17040_v32  ;;  %v20862_v37 = vadd.f32 %v17045_v31, %v17041_v33 }
 0xa41   :  { %v17054_v48 = vsub.f32 0.0, %v17047_v41  ;;  %v17055_v39 = vsub.f32 0.0, %v17048_v34  ;;  %v17056_v40 = vsub.f32 0.0, %v17049_v35  ;;  %v17057_v52 = vsub.f32 0.0, %v17050_v2 }
 0xa42   :  { %v17058_v54 = vsub.f32 0.0, %v17051_v36  ;;  %v17059_v42 = vsub.f32 0.0, %v17052_v38  ;;  %v17060_v44 = vsub.f32 0.0, %v20862_v37 }
 0xa43   :  { %v17061_v45 = vmul.f32 1.442695, %v17054_v48  ;;  %v17063_v8 = vmul.f32 1.442695, %v17055_v39  ;;  %v17065_v56 = vmul.f32 1.442695, %v17056_v40 }
 0xa44   :  { %v17067_v47 = vmul.f32 1.442695, %v17057_v52  ;;  %v17069_v49 = vmul.f32 1.442695, %v17058_v54  ;;  %v17071_v50 = vmul.f32 1.442695, %v17059_v42 }
 0xa45   :  { %18291 = vpow2.f32 %v17061_v45  ;;  %v17073_v53 = vmul.f32 1.442695, %v17060_v44 }
 0xa46   :  { %18293 = vpow2.f32 %v17063_v8 }
 0xa47   :  { %18295 = vpow2.f32 %v17065_v56 }
 0xa48   :  { %18297 = vpow2.f32 %v17067_v47 }
 0xa49   :  { %18299 = vpow2.f32 %v17069_v49 }
 0xa4a   :  { %18301 = vpow2.f32 %v17071_v50 }
 0xa4b   :  { %18303 = vpow2.f32 %v17073_v53 }
 0xa4f   :  { %v18292_v61 = vpop.eup %18291 }
 0xa50   :  { %v18294_v62 = vpop.eup %18293  ;;  %v17075_v4 = vadd.f32 1.0, %v18292_v61 }
 0xa51   :  { %v18296_v63 = vpop.eup %18295  ;;  %v17076_v57 = vadd.f32 1.0, %v18294_v62 }
 0xa52   :  { %v18298_v58 = vpop.eup %18297  ;;  %v17077_v6 = vadd.f32 1.0, %v18296_v63  ;;  %18305 = vrcp.f32 %v17075_v4 }
 0xa53   :  { %v18300_v59 = vpop.eup %18299  ;;  %v17078_v60 = vadd.f32 1.0, %v18298_v58  ;;  %18307 = vrcp.f32 %v17076_v57 }
 0xa54   :  { %v18302_v7 = vpop.eup %18301  ;;  %v17079_v9 = vadd.f32 1.0, %v18300_v59  ;;  %18309 = vrcp.f32 %v17077_v6 }
 0xa55   :  { %v18304_v10 = vpop.eup %18303  ;;  %v17080_v1 = vadd.f32 1.0, %v18302_v7  ;;  %18311 = vrcp.f32 %v17078_v60 }
 0xa56   :  { %v17081_v13 = vadd.f32 1.0, %v18304_v10  ;;  %18313 = vrcp.f32 %v17079_v9 }
 0xa57   :  { %18315 = vrcp.f32 %v17080_v1 }
 0xa58   :  { %18317 = vrcp.f32 %v17081_v13 }
 0xa5c   :  { %v18306_v43 = vpop.eup %18305 }
 0xa5d   :  { %v18308_v14 = vpop.eup %18307  ;;  %v17096_v46 = vmul.f32 %v18306_v43, %v17047_v41 }
 0xa5e   :  { %v18310_v15 = vpop.eup %18309  ;;  %v17097_v51 = vmul.f32 %v18308_v14, %v17048_v34 }
 0xa5f   :  { %v18312_v16 = vpop.eup %18311  ;;  %v17098_v17 = vmul.f32 %v18310_v15, %v17049_v35  ;;  %v17103_v55 = vmul.f32 0.1, %v17096_v46 }
 0xa60   :  { %v18314_v5 = vpop.eup %18313  ;;  %v17099_v21 = vmul.f32 %v18312_v16, %v17050_v2  ;;  %v17104_v22 = vmul.f32 0.1, %v17097_v51 }
 0xa61   :  { %v18316_v0 = vpop.eup %18315  ;;  %v17100_v23 = vmul.f32 %v18314_v5, %v17051_v36  ;;  %v17105_v24 = vmul.f32 0.1, %v17098_v17  ;;  %v17110_v25 = vadd.f32 %v18326_v20, %v17103_v55 }
 0xa62   :  { %v18318_v26 = vpop.eup %18317  ;;  %v17101_v27 = vmul.f32 %v18316_v0, %v17052_v38  ;;  %v17106_v28 = vmul.f32 0.1, %v17099_v21  ;;  %v17111_v12 = vadd.f32 %v18327_v3, %v17104_v22 }
 0xa63   :  { %v17102_v29 = vmul.f32 %v18318_v26, %v20862_v37  ;;  %v17107_v18 = vmul.f32 0.1, %v17100_v23  ;;  %v17112_v30 = vadd.f32 %v18328_v19, %v17105_v24  ;;  %17117 = vst [vmem:[%s20922_s14] sm:$0xff] %v17110_v25 }
 0xa64   :  { %v17108_v31 = vmul.f32 0.1, %v17101_v27 }
 0xa65   :  { %v17109_v33 = vmul.f32 0.1, %v17102_v29 }
 0xa6a   :  { %v18329_v11 = vld [vmem:[%s20908_s0 + $0x18] sm:$0xff] }
 0xa6b   :  { %v17113_v32 = vadd.f32 %v18329_v11, %v17106_v28  ;;  %17118 = vst [vmem:[%s20922_s14 + $0x8] sm:$0xff] %v17111_v12 }
 0xa72   :  { %v18330_v41 = vld [vmem:[%s20908_s0 + $0x20] sm:$0xff] }
 0xa73   :  { %v17114_v34 = vadd.f32 %v18330_v41, %v17107_v18  ;;  %17119 = vst [vmem:[%s20922_s14 + $0x10] sm:$0xff] %v17112_v30 }
 0xa7a   :  { %v18331_v35 = vld [vmem:[%s20908_s0 + $0x28] sm:$0xff] }
 0xa7b   :  { %v17115_v2 = vadd.f32 %v18331_v35, %v17108_v31  ;;  %17120 = vst [vmem:[%s20922_s14 + $0x18] sm:$0xff] %v17113_v32 }
 0xa82   :  { %v18332_v36 = vld [vmem:[%s20908_s0 + $0x30] sm:$0xff] }
 0xa83   :  { %v17116_v38 = vadd.f32 %v18332_v36, %v17109_v33  ;;  %17121 = vst [vmem:[%s20922_s14 + $0x20] sm:$0xff] %v17114_v34  ;;  %17122 = vst [vmem:[%s20922_s14 + $0x28] sm:$0xff] %v17115_v2 }
 0xa85   :  { %17123 = vst [vmem:[%s20922_s14 + $0x30] sm:$0xff] %v17116_v38 }

</bundles_post_ra>
